<compile_context>
chip_gen: v7x
topology: tpu7x:2x2x1
jax: 0.10.0
libtpu: 0.0.40
codegen_flags: <defaults>
</compile_context>

<pallas_src>
import functools

import jax
import jax.numpy as jnp
from jax import lax
from jax.experimental import pallas as pl
from jax.experimental.pallas import tpu as pltpu


def _round_up(x, m):
    return (x + m - 1) // m * m


def _pick_tile_h(ho, wo):
    """Smallest divisor of ho whose M tile (tile_h*wo) is a multiple of 128."""
    for d in range(1, ho + 1):
        if ho % d == 0 and (d * wo) % 128 == 0:
            return d
    return ho  # fallback: whole image (block equals full dim -> still legal)


def _vmem_limit_bytes():
    """~3/4 of this generation's physical VMEM (v7x ~48 MiB, v5e/v6e ~96 MiB)."""
    cap = 64 * 1024 * 1024
    try:
        cap = int(getattr(pltpu.get_tpu_info(), "vmem_capacity_bytes", cap)) or cap
    except Exception:
        pass
    return min(cap * 3 // 4, 100 * 1024 * 1024)


def _conv_tile(x_ref, w_ref, patch_ref, *, kh, kw, cin, stride, tile_h, wo):
    """One row-tile of the convolution as a single im2col MXU matmul.

    x_ref:     (Hp, Wp, Cin) padded bf16 image (whole image, VMEM resident).
    w_ref:     (KH*KW*Cin, Coutp) bf16 weight matrix.
    patch_ref: (tile_h*Wo, KH*KW*Cin) bf16 VMEM scratch (im2col staging).
    Returns the (tile_h*Wo, Coutp) f32 accumulator.
    """
    rt = pl.program_id(1)
    tile_m = tile_h * wo
    r0 = pl.multiple_of(rt * (tile_h * stride), tile_h * stride)
    for i in range(kh):
        if stride == 1:
            rows = x_ref[pl.ds(r0 + i, tile_h), :, :]          # (tile_h, Wp, Cin)
        else:
            # TODO(synk): wrapper-side space-to-depth would make this unit-stride.
            rows = x_ref[pl.ds(r0 + i, (tile_h - 1) * stride + 1), :, :][::stride]
        for j in range(kw):
            if stride == 1:
                tap = rows[:, j:j + wo, :]                     # (tile_h, Wo, Cin)
            else:
                tap = rows[:, j:j + (wo - 1) * stride + 1:stride, :]
            col = (i * kw + j) * cin
            patch_ref[:, col:col + cin] = tap.reshape(tile_m, cin)
    # One MXU matmul with contraction depth KH*KW*Cin (vs Cin for per-tap dots).
    return jnp.dot(patch_ref[...], w_ref[...], preferred_element_type=jnp.float32)


def _stats_kernel(x_ref, w_ref, stats_ref, patch_ref, *,
                  kh, kw, cin, stride, tile_h, wo):
    """Pass 1: accumulate per-channel sum / sum-of-squares across row tiles."""
    rt = pl.program_id(1)
    acc = _conv_tile(x_ref, w_ref, patch_ref,
                     kh=kh, kw=kw, cin=cin, stride=stride, tile_h=tile_h, wo=wo)

    @pl.when(rt == 0)
    def _():
        stats_ref[...] = jnp.zeros(stats_ref.shape, stats_ref.dtype)

    # TODO(synk): E[x^2]-mean^2 in f32 is cancellation-prone for very large M;
    # switch to a Welford / shifted-sum combine if that regime matters.
    stats_ref[0:1, :] += jnp.sum(acc, axis=0, keepdims=True)
    stats_ref[1:2, :] += jnp.sum(acc * acc, axis=0, keepdims=True)


def _bn_relu_kernel(x_ref, w_ref, stats_ref, gamma_ref, beta_ref, out_ref,
                    patch_ref, *, kh, kw, cin, stride, tile_h, wo,
                    cout_sub, inv_m, eps):
    """Pass 2: recompute conv tile, fused BN affine + ReLU, transposed store."""
    acc = _conv_tile(x_ref, w_ref, patch_ref,
                     kh=kh, kw=kw, cin=cin, stride=stride, tile_h=tile_h, wo=wo)
    # Fused BN scale/shift recomputed from the global stats (tiny VPU/EUP work).
    mean = stats_ref[0:1, :] * inv_m                            # (1, Coutp)
    var = jnp.maximum(stats_ref[1:2, :] * inv_m - mean * mean, 0.0)
    scale = gamma_ref[...] * lax.rsqrt(var + eps)
    shift = beta_ref[...] - mean * scale
    y = jnp.maximum(acc * scale + shift, 0.0)                   # (tile_m, Coutp)
    # One XLU transpose, then store only the real channels:
    # (Cout_sub sublanes, tile_m lanes) with tile_m a multiple of 128 -> dense vst.
    out_ref[...] = jnp.transpose(y)[:cout_sub, :]


def conv_block_forward(x_nchw, weight_oihw, bias, gamma, beta, *,
                       stride=1, padding=0, eps=1e-5):
    """Forward of convBlock.  Input/output in PyTorch NCHW layout."""
    del bias  # exactly cancelled by BatchNorm's mean subtraction (dead compute)
    n, cin, h, w = x_nchw.shape
    cout, _, kh, kw = weight_oihw.shape
    hp, wp = h + 2 * padding, w + 2 * padding
    ho = (hp - kh) // stride + 1
    wo = (wp - kw) // stride + 1
    k_dim = kh * kw * cin
    coutp = _round_up(cout, 128)       # MXU / lane padding for the matmul
    cout_sub = _round_up(cout, 8)      # sublane padding for the stored output
    m_total = n * ho * wo

    tile_h = _pick_tile_h(ho, wo)
    n_rt = ho // tile_h
    tile_m = tile_h * wo

    # ---- layout glue mandated by the NCHW interface (tiny one-time XLA ops) ----
    x_nhwc = jnp.transpose(x_nchw, (0, 2, 3, 1))
    xp = jnp.pad(x_nhwc, ((0, 0), (padding, padding), (padding, padding), (0, 0)))
    xp = xp.astype(jnp.bfloat16)
    # OIHW -> (KH*KW*Cin, Coutp) im2col weight matrix (row order = (kh, kw, cin)).
    w_mat = jnp.transpose(weight_oihw, (2, 3, 1, 0)).reshape(k_dim, cout)
    w_mat = jnp.pad(w_mat, ((0, 0), (0, coutp - cout))).astype(jnp.bfloat16)
    gamma_p = jnp.pad(gamma.astype(jnp.float32), (0, coutp - cout)).reshape(1, coutp)
    beta_p = jnp.pad(beta.astype(jnp.float32), (0, coutp - cout)).reshape(1, coutp)

    grid = (n, n_rt)
    vmem_limit = _vmem_limit_bytes()
    flops = 2 * m_total * k_dim * coutp

    x_spec = pl.BlockSpec((None, hp, wp, cin), lambda b, rt: (b, 0, 0, 0))
    w_spec = pl.BlockSpec((k_dim, coutp), lambda b, rt: (0, 0))
    patch_scratch = pltpu.VMEM((tile_m, k_dim), jnp.bfloat16)
    conv_kw = dict(kh=kh, kw=kw, cin=cin, stride=stride, tile_h=tile_h, wo=wo)

    # Pass 1: per-image BN partials, accumulated across row tiles in-kernel.
    stats = pl.pallas_call(
        functools.partial(_stats_kernel, **conv_kw),
        out_shape=jax.ShapeDtypeStruct((n, 2, coutp), jnp.float32),
        grid=grid,
        in_specs=[x_spec, w_spec],
        out_specs=pl.BlockSpec((None, 2, coutp), lambda b, rt: (b, 0, 0)),
        scratch_shapes=[patch_scratch],
        compiler_params=pltpu.CompilerParams(
            dimension_semantics=("parallel", "arbitrary"),
            vmem_limit_bytes=vmem_limit),
        cost_estimate=pl.CostEstimate(
            flops=flops, transcendentals=0,
            bytes_accessed=xp.size * 2 + w_mat.size * 2 + n * 2 * coutp * 4),
    )(xp, w_mat)

    stats_sum = jnp.sum(stats, axis=0)  # (2, Coutp): the only inter-pass XLA op

    # Pass 2: recompute conv tiles, fused BN + ReLU, channel-sublane store.
    out = pl.pallas_call(
        functools.partial(_bn_relu_kernel, cout_sub=cout_sub,
                          inv_m=1.0 / m_total, eps=eps, **conv_kw),
        out_shape=jax.ShapeDtypeStruct((n, cout_sub, ho * wo), jnp.float32),
        grid=grid,
        in_specs=[x_spec, w_spec,
                  pl.BlockSpec((2, coutp), lambda b, rt: (0, 0)),
                  pl.BlockSpec((1, coutp), lambda b, rt: (0, 0)),
                  pl.BlockSpec((1, coutp), lambda b, rt: (0, 0))],
        out_specs=pl.BlockSpec((None, cout_sub, tile_m), lambda b, rt: (b, 0, rt)),
        scratch_shapes=[patch_scratch],
        compiler_params=pltpu.CompilerParams(
            dimension_semantics=("parallel", "parallel"),
            vmem_limit_bytes=vmem_limit),
        cost_estimate=pl.CostEstimate(
            flops=flops, transcendentals=coutp * n * n_rt,
            bytes_accessed=xp.size * 2 + w_mat.size * 2 + n * cout_sub * ho * wo * 4),
    )(xp, w_mat, stats_sum, gamma_p, beta_p)

    # Output is already channel-major: drop sublane padding, reshape to NCHW.
    return out[:, :cout, :].reshape(n, cout, ho, wo)


def _reference(x, weight, bias, gamma, beta, stride, padding, eps):
    y = lax.conv_general_dilated(
        x, weight, (stride, stride), [(padding, padding)] * 2,
        dimension_numbers=('NCHW', 'OIHW', 'NCHW'))
    y = y + bias[None, :, None, None]
    mean = jnp.mean(y, axis=(0, 2, 3), keepdims=True)
    var = jnp.mean((y - mean) ** 2, axis=(0, 2, 3), keepdims=True)
    y = (y - mean) * lax.rsqrt(var + eps) * gamma[None, :, None, None] \
        + beta[None, :, None, None]
    return jnp.maximum(y, 0.0)


if __name__ == "__main__":
    # convBlock(in_channel=4, out_channel=8, kernel_size=3, stride=1, padding=1)
    N, CIN, H, W = 2, 4, 16, 16
    COUT, KH, KW = 8, 3, 3
    STRIDE, PADDING, EPS = 1, 1, 1e-5

    key = jax.random.PRNGKey(0)
    kx, kw_, kb = jax.random.split(key, 3)

    x = jax.random.normal(kx, (N, CIN, H, W), dtype=jnp.float32)
    fan_in = CIN * KH * KW
    weight = jax.random.normal(kw_, (COUT, CIN, KH, KW), dtype=jnp.float32) \
        * (1.0 / jnp.sqrt(fan_in))
    bias = jax.random.normal(kb, (COUT,), dtype=jnp.float32) * 0.1
    gamma = jnp.ones((COUT,), dtype=jnp.float32)   # BatchNorm2d default init
    beta = jnp.zeros((COUT,), dtype=jnp.float32)

    fwd = jax.jit(functools.partial(conv_block_forward,
                                    stride=STRIDE, padding=PADDING, eps=EPS))
    out = jax.block_until_ready(fwd(x, weight, bias, gamma, beta))

    ref = _reference(x, weight, bias, gamma, beta, STRIDE, PADDING, EPS)
    assert out.shape == ref.shape == (N, COUT, H, W)
    # bf16 MXU inputs -> slightly looser tolerance than pure-f32.
    if not jnp.allclose(out, ref, atol=2e-2, rtol=2e-2):
        err = float(jnp.max(jnp.abs(out - ref)))
        raise SystemExit(f"mismatch vs reference (max abs err = {err:.4e})")

    print("KERNEL_OK")
</pallas_src>

<mosaic_0001>
module attributes {stable_mosaic.version = 11 : i64} {
  func.func @_stats_kernel(%arg0: i32, %arg1: i32, %arg2: memref<1x18x18x4xbf16, #tpu.memory_space<vmem>>, %arg3: memref<36x128xbf16, #tpu.memory_space<vmem>>, %arg4: memref<1x2x128xf32, #tpu.memory_space<vmem>>, %arg5: memref<128x36xbf16, #tpu.memory_space<vmem>>) attributes {dimension_semantics = [#tpu.dimension_semantics<parallel>, #tpu.dimension_semantics<arbitrary>], iteration_bounds = array<i64: 2, 2>, scalar_prefetch = 0 : i64, scratch_operands = 1 : i64, tpu.core_type = #tpu.core_type<tc>, window_params = [{transform_indices = @transform_0, window_bounds = array<i64: 1, 18, 18, 4>}, {pipeline_mode = #tpu.pipeline_mode<synchronous>, transform_indices = @transform_1, window_bounds = array<i64: 36, 128>}, {transform_indices = @transform_2, window_bounds = array<i64: 1, 2, 128>}]} {
    %c8_i32 = arith.constant 8 : i32
    %0 = arith.muli %arg1, %c8_i32 : i32
    %1 = tpu.assume_multiple %0, 8 : i32
    %c0_i32 = arith.constant 0 : i32
    %2 = arith.addi %1, %c0_i32 : i32
    %c0 = arith.constant 0 : index
    %3 = arith.index_cast %2 : i32 to index
    %c0_0 = arith.constant 0 : index
    %c0_1 = arith.constant 0 : index
    %4 = vector.load %arg2[%c0, %3, %c0_0, %c0_1] : memref<1x18x18x4xbf16, #tpu.memory_space<vmem>>, vector<1x8x18x4xbf16>
    %5 = vector.shape_cast %4 : vector<1x8x18x4xbf16> to vector<8x18x4xbf16>
    %6 = vector.extract_strided_slice %5 {offsets = [0, 0, 0], sizes = [8, 16, 4], strides = [1, 1, 1]} : vector<8x18x4xbf16> to vector<8x16x4xbf16>
    %7 = vector.shape_cast %6 : vector<8x16x4xbf16> to vector<128x4xbf16>
    %c0_2 = arith.constant 0 : index
    %c0_3 = arith.constant 0 : index
    %8 = vector.load %arg5[%c0_2, %c0_3] : memref<128x36xbf16, #tpu.memory_space<vmem>>, vector<128x4xbf16>
    tpu.vector_store %arg5[%c0_2, %c0_3], %7 {strides = array<i32>} : memref<128x36xbf16, #tpu.memory_space<vmem>>, vector<128x4xbf16>,
    %9 = vector.extract_strided_slice %5 {offsets = [0, 1, 0], sizes = [8, 16, 4], strides = [1, 1, 1]} : vector<8x18x4xbf16> to vector<8x16x4xbf16>
    %10 = vector.shape_cast %9 : vector<8x16x4xbf16> to vector<128x4xbf16>
    %c0_4 = arith.constant 0 : index
    %c4 = arith.constant 4 : index
    %11 = vector.load %arg5[%c0_4, %c4] : memref<128x36xbf16, #tpu.memory_space<vmem>>, vector<128x4xbf16>
    tpu.vector_store %arg5[%c0_4, %c4], %10 {strides = array<i32>} : memref<128x36xbf16, #tpu.memory_space<vmem>>, vector<128x4xbf16>,
    %12 = vector.extract_strided_slice %5 {offsets = [0, 2, 0], sizes = [8, 16, 4], strides = [1, 1, 1]} : vector<8x18x4xbf16> to vector<8x16x4xbf16>
    %13 = vector.shape_cast %12 : vector<8x16x4xbf16> to vector<128x4xbf16>
    %c0_5 = arith.constant 0 : index
    %c8 = arith.constant 8 : index
    %14 = vector.load %arg5[%c0_5, %c8] : memref<128x36xbf16, #tpu.memory_space<vmem>>, vector<128x4xbf16>
    tpu.vector_store %arg5[%c0_5, %c8], %13 {strides = array<i32>} : memref<128x36xbf16, #tpu.memory_space<vmem>>, vector<128x4xbf16>,
    %c1_i32 = arith.constant 1 : i32
    %15 = arith.addi %1, %c1_i32 : i32
    %c0_6 = arith.constant 0 : index
    %16 = arith.index_cast %15 : i32 to index
    %c0_7 = arith.constant 0 : index
    %c0_8 = arith.constant 0 : index
    %17 = vector.load %arg2[%c0_6, %16, %c0_7, %c0_8] : memref<1x18x18x4xbf16, #tpu.memory_space<vmem>>, vector<1x8x18x4xbf16>
    %18 = vector.shape_cast %17 : vector<1x8x18x4xbf16> to vector<8x18x4xbf16>
    %19 = vector.extract_strided_slice %18 {offsets = [0, 0, 0], sizes = [8, 16, 4], strides = [1, 1, 1]} : vector<8x18x4xbf16> to vector<8x16x4xbf16>
    %20 = vector.shape_cast %19 : vector<8x16x4xbf16> to vector<128x4xbf16>
    %c0_9 = arith.constant 0 : index
    %c12 = arith.constant 12 : index
    %21 = vector.load %arg5[%c0_9, %c12] : memref<128x36xbf16, #tpu.memory_space<vmem>>, vector<128x4xbf16>
    tpu.vector_store %arg5[%c0_9, %c12], %20 {strides = array<i32>} : memref<128x36xbf16, #tpu.memory_space<vmem>>, vector<128x4xbf16>,
    %22 = vector.extract_strided_slice %18 {offsets = [0, 1, 0], sizes = [8, 16, 4], strides = [1, 1, 1]} : vector<8x18x4xbf16> to vector<8x16x4xbf16>
    %23 = vector.shape_cast %22 : vector<8x16x4xbf16> to vector<128x4xbf16>
    %c0_10 = arith.constant 0 : index
    %c16 = arith.constant 16 : index
    %24 = vector.load %arg5[%c0_10, %c16] : memref<128x36xbf16, #tpu.memory_space<vmem>>, vector<128x4xbf16>
    tpu.vector_store %arg5[%c0_10, %c16], %23 {strides = array<i32>} : memref<128x36xbf16, #tpu.memory_space<vmem>>, vector<128x4xbf16>,
    %25 = vector.extract_strided_slice %18 {offsets = [0, 2, 0], sizes = [8, 16, 4], strides = [1, 1, 1]} : vector<8x18x4xbf16> to vector<8x16x4xbf16>
    %26 = vector.shape_cast %25 : vector<8x16x4xbf16> to vector<128x4xbf16>
    %c0_11 = arith.constant 0 : index
    %c20 = arith.constant 20 : index
    %27 = vector.load %arg5[%c0_11, %c20] : memref<128x36xbf16, #tpu.memory_space<vmem>>, vector<128x4xbf16>
    tpu.vector_store %arg5[%c0_11, %c20], %26 {strides = array<i32>} : memref<128x36xbf16, #tpu.memory_space<vmem>>, vector<128x4xbf16>,
    %c2_i32 = arith.constant 2 : i32
    %28 = arith.addi %1, %c2_i32 : i32
    %c0_12 = arith.constant 0 : index
    %29 = arith.index_cast %28 : i32 to index
    %c0_13 = arith.constant 0 : index
    %c0_14 = arith.constant 0 : index
    %30 = vector.load %arg2[%c0_12, %29, %c0_13, %c0_14] : memref<1x18x18x4xbf16, #tpu.memory_space<vmem>>, vector<1x8x18x4xbf16>
    %31 = vector.shape_cast %30 : vector<1x8x18x4xbf16> to vector<8x18x4xbf16>
    %32 = vector.extract_strided_slice %31 {offsets = [0, 0, 0], sizes = [8, 16, 4], strides = [1, 1, 1]} : vector<8x18x4xbf16> to vector<8x16x4xbf16>
    %33 = vector.shape_cast %32 : vector<8x16x4xbf16> to vector<128x4xbf16>
    %c0_15 = arith.constant 0 : index
    %c24 = arith.constant 24 : index
    %34 = vector.load %arg5[%c0_15, %c24] : memref<128x36xbf16, #tpu.memory_space<vmem>>, vector<128x4xbf16>
    tpu.vector_store %arg5[%c0_15, %c24], %33 {strides = array<i32>} : memref<128x36xbf16, #tpu.memory_space<vmem>>, vector<128x4xbf16>,
    %35 = vector.extract_strided_slice %31 {offsets = [0, 1, 0], sizes = [8, 16, 4], strides = [1, 1, 1]} : vector<8x18x4xbf16> to vector<8x16x4xbf16>
    %36 = vector.shape_cast %35 : vector<8x16x4xbf16> to vector<128x4xbf16>
    %c0_16 = arith.constant 0 : index
    %c28 = arith.constant 28 : index
    %37 = vector.load %arg5[%c0_16, %c28] : memref<128x36xbf16, #tpu.memory_space<vmem>>, vector<128x4xbf16>
    tpu.vector_store %arg5[%c0_16, %c28], %36 {strides = array<i32>} : memref<128x36xbf16, #tpu.memory_space<vmem>>, vector<128x4xbf16>,
    %38 = vector.extract_strided_slice %31 {offsets = [0, 2, 0], sizes = [8, 16, 4], strides = [1, 1, 1]} : vector<8x18x4xbf16> to vector<8x16x4xbf16>
    %39 = vector.shape_cast %38 : vector<8x16x4xbf16> to vector<128x4xbf16>
    %c0_17 = arith.constant 0 : index
    %c32 = arith.constant 32 : index
    %40 = vector.load %arg5[%c0_17, %c32] : memref<128x36xbf16, #tpu.memory_space<vmem>>, vector<128x4xbf16>
    tpu.vector_store %arg5[%c0_17, %c32], %39 {strides = array<i32>} : memref<128x36xbf16, #tpu.memory_space<vmem>>, vector<128x4xbf16>,
    %c0_18 = arith.constant 0 : index
    %c0_19 = arith.constant 0 : index
    %41 = vector.load %arg5[%c0_18, %c0_19] : memref<128x36xbf16, #tpu.memory_space<vmem>>, vector<128x36xbf16>
    %c0_20 = arith.constant 0 : index
    %c0_21 = arith.constant 0 : index
    %42 = vector.load %arg3[%c0_20, %c0_21] : memref<36x128xbf16, #tpu.memory_space<vmem>>, vector<36x128xbf16>
    %cst = arith.constant dense<0.000000e+00> : vector<128x128xf32>
    %43 = tpu.matmul %41, %42, %cst {dimension_numbers = #tpu.dot_dimension_numbers<[1], [0], [0], [1], [0, 0, 1, 1], [], []>} : vector<128x36xbf16>, vector<36x128xbf16>, vector<128x128xf32> -> vector<128x128xf32>
    %c0_i32_22 = arith.constant 0 : i32
    %44 = arith.cmpi eq, %arg1, %c0_i32_22 : i32
    %45 = arith.extui %44 : i1 to i32
    %c0_i32_23 = arith.constant 0 : i32
    %46 = arith.cmpi ne, %45, %c0_i32_23 : i32
    scf.if %46 {
      %cst_37 = arith.constant 0.000000e+00 : f32
      %64 = vector.broadcast %cst_37 : f32 to vector<2x128xf32>
      %c0_38 = arith.constant 0 : index
      %c0_39 = arith.constant 0 : index
      %c0_40 = arith.constant 0 : index
      %65 = vector.load %arg4[%c0_38, %c0_39, %c0_40] : memref<1x2x128xf32, #tpu.memory_space<vmem>>, vector<1x2x128xf32>
      %66 = vector.shape_cast %65 : vector<1x2x128xf32> to vector<2x128xf32>
      %67 = vector.shape_cast %64 : vector<2x128xf32> to vector<1x2x128xf32>
      tpu.vector_store %arg4[%c0_38, %c0_39, %c0_40], %67 {strides = array<i32>} : memref<1x2x128xf32, #tpu.memory_space<vmem>>, vector<1x2x128xf32>,
    } else {
    }
    %c0_24 = arith.constant 0 : index
    %c0_25 = arith.constant 0 : index
    %c0_26 = arith.constant 0 : index
    %47 = vector.load %arg4[%c0_24, %c0_25, %c0_26] : memref<1x2x128xf32, #tpu.memory_space<vmem>>, vector<1x1x128xf32>
    %48 = vector.shape_cast %47 : vector<1x1x128xf32> to vector<1x128xf32>
    %cst_27 = arith.constant dense<0.000000e+00> : vector<128xf32>
    %49 = vector.multi_reduction <add>, %43, %cst_27 [0] : vector<128x128xf32> to vector<128xf32>
    %50 = vector.shape_cast %49 : vector<128xf32> to vector<1x128xf32>
    %51 = arith.addf %48, %50 : vector<1x128xf32>
    %c0_28 = arith.constant 0 : index
    %c0_29 = arith.constant 0 : index
    %c0_30 = arith.constant 0 : index
    %52 = vector.load %arg4[%c0_28, %c0_29, %c0_30] : memref<1x2x128xf32, #tpu.memory_space<vmem>>, vector<1x1x128xf32>
    %53 = vector.shape_cast %52 : vector<1x1x128xf32> to vector<1x128xf32>
    %54 = vector.shape_cast %51 : vector<1x128xf32> to vector<1x1x128xf32>
    tpu.vector_store %arg4[%c0_28, %c0_29, %c0_30], %54 {strides = array<i32>} : memref<1x2x128xf32, #tpu.memory_space<vmem>>, vector<1x1x128xf32>,
    %c0_31 = arith.constant 0 : index
    %c1 = arith.constant 1 : index
    %c0_32 = arith.constant 0 : index
    %55 = vector.load %arg4[%c0_31, %c1, %c0_32] : memref<1x2x128xf32, #tpu.memory_space<vmem>>, vector<1x1x128xf32>
    %56 = vector.shape_cast %55 : vector<1x1x128xf32> to vector<1x128xf32>
    %57 = arith.mulf %43, %43 : vector<128x128xf32>
    %cst_33 = arith.constant dense<0.000000e+00> : vector<128xf32>
    %58 = vector.multi_reduction <add>, %57, %cst_33 [0] : vector<128x128xf32> to vector<128xf32>
    %59 = vector.shape_cast %58 : vector<128xf32> to vector<1x128xf32>
    %60 = arith.addf %56, %59 : vector<1x128xf32>
    %c0_34 = arith.constant 0 : index
    %c1_35 = arith.constant 1 : index
    %c0_36 = arith.constant 0 : index
    %61 = vector.load %arg4[%c0_34, %c1_35, %c0_36] : memref<1x2x128xf32, #tpu.memory_space<vmem>>, vector<1x1x128xf32>
    %62 = vector.shape_cast %61 : vector<1x1x128xf32> to vector<1x128xf32>
    %63 = vector.shape_cast %60 : vector<1x128xf32> to vector<1x1x128xf32>
    tpu.vector_store %arg4[%c0_34, %c1_35, %c0_36], %63 {strides = array<i32>} : memref<1x2x128xf32, #tpu.memory_space<vmem>>, vector<1x1x128xf32>,
    return
  }
  func.func @transform_0(%arg0: i32, %arg1: i32) -> (i32, i32, i32, i32) {
    %c0_i32 = arith.constant 0 : i32
    %c0_i32_0 = arith.constant 0 : i32
    %c0_i32_1 = arith.constant 0 : i32
    %c0_i32_2 = arith.constant 0 : i32
    return %arg0, %c0_i32, %c0_i32_0, %c0_i32_1 : i32, i32, i32, i32
  }
  func.func @transform_1(%arg0: i32, %arg1: i32) -> (i32, i32) {
    %c0_i32 = arith.constant 0 : i32
    %c0_i32_0 = arith.constant 0 : i32
    %c0_i32_1 = arith.constant 0 : i32
    return %c0_i32, %c0_i32_0 : i32, i32
  }
  func.func @transform_2(%arg0: i32, %arg1: i32) -> (i32, i32, i32) {
    %c0_i32 = arith.constant 0 : i32
    %c0_i32_0 = arith.constant 0 : i32
    %c0_i32_1 = arith.constant 0 : i32
    return %arg0, %c0_i32, %c0_i32_0 : i32, i32, i32
  }
}

module attributes {stable_mosaic.version = 11 : i64} {
  func.func @_bn_relu_kernel(%arg0: i32, %arg1: i32, %arg2: memref<1x18x18x4xbf16, #tpu.memory_space<vmem>>, %arg3: memref<36x128xbf16, #tpu.memory_space<vmem>>, %arg4: memref<2x128xf32, #tpu.memory_space<vmem>>, %arg5: memref<1x128xf32, #tpu.memory_space<vmem>>, %arg6: memref<1x128xf32, #tpu.memory_space<vmem>>, %arg7: memref<1x8x128xf32, #tpu.memory_space<vmem>>, %arg8: memref<128x36xbf16, #tpu.memory_space<vmem>>) attributes {dimension_semantics = [#tpu.dimension_semantics<parallel>, #tpu.dimension_semantics<parallel>], iteration_bounds = array<i64: 2, 2>, scalar_prefetch = 0 : i64, scratch_operands = 1 : i64, tpu.core_type = #tpu.core_type<tc>, window_params = [{transform_indices = @transform_0, window_bounds = array<i64: 1, 18, 18, 4>}, {pipeline_mode = #tpu.pipeline_mode<synchronous>, transform_indices = @transform_1, window_bounds = array<i64: 36, 128>}, {pipeline_mode = #tpu.pipeline_mode<synchronous>, transform_indices = @transform_2, window_bounds = array<i64: 2, 128>}, {pipeline_mode = #tpu.pipeline_mode<synchronous>, transform_indices = @transform_3, window_bounds = array<i64: 1, 128>}, {pipeline_mode = #tpu.pipeline_mode<synchronous>, transform_indices = @transform_4, window_bounds = array<i64: 1, 128>}, {transform_indices = @transform_5, window_bounds = array<i64: 1, 8, 128>}]} {
    %c8_i32 = arith.constant 8 : i32
    %0 = arith.muli %arg1, %c8_i32 : i32
    %1 = tpu.assume_multiple %0, 8 : i32
    %c0_i32 = arith.constant 0 : i32
    %2 = arith.addi %1, %c0_i32 : i32
    %c0 = arith.constant 0 : index
    %3 = arith.index_cast %2 : i32 to index
    %c0_0 = arith.constant 0 : index
    %c0_1 = arith.constant 0 : index
    %4 = vector.load %arg2[%c0, %3, %c0_0, %c0_1] : memref<1x18x18x4xbf16, #tpu.memory_space<vmem>>, vector<1x8x18x4xbf16>
    %5 = vector.shape_cast %4 : vector<1x8x18x4xbf16> to vector<8x18x4xbf16>
    %6 = vector.extract_strided_slice %5 {offsets = [0, 0, 0], sizes = [8, 16, 4], strides = [1, 1, 1]} : vector<8x18x4xbf16> to vector<8x16x4xbf16>
    %7 = vector.shape_cast %6 : vector<8x16x4xbf16> to vector<128x4xbf16>
    %c0_2 = arith.constant 0 : index
    %c0_3 = arith.constant 0 : index
    %8 = vector.load %arg8[%c0_2, %c0_3] : memref<128x36xbf16, #tpu.memory_space<vmem>>, vector<128x4xbf16>
    tpu.vector_store %arg8[%c0_2, %c0_3], %7 {strides = array<i32>} : memref<128x36xbf16, #tpu.memory_space<vmem>>, vector<128x4xbf16>,
    %9 = vector.extract_strided_slice %5 {offsets = [0, 1, 0], sizes = [8, 16, 4], strides = [1, 1, 1]} : vector<8x18x4xbf16> to vector<8x16x4xbf16>
    %10 = vector.shape_cast %9 : vector<8x16x4xbf16> to vector<128x4xbf16>
    %c0_4 = arith.constant 0 : index
    %c4 = arith.constant 4 : index
    %11 = vector.load %arg8[%c0_4, %c4] : memref<128x36xbf16, #tpu.memory_space<vmem>>, vector<128x4xbf16>
    tpu.vector_store %arg8[%c0_4, %c4], %10 {strides = array<i32>} : memref<128x36xbf16, #tpu.memory_space<vmem>>, vector<128x4xbf16>,
    %12 = vector.extract_strided_slice %5 {offsets = [0, 2, 0], sizes = [8, 16, 4], strides = [1, 1, 1]} : vector<8x18x4xbf16> to vector<8x16x4xbf16>
    %13 = vector.shape_cast %12 : vector<8x16x4xbf16> to vector<128x4xbf16>
    %c0_5 = arith.constant 0 : index
    %c8 = arith.constant 8 : index
    %14 = vector.load %arg8[%c0_5, %c8] : memref<128x36xbf16, #tpu.memory_space<vmem>>, vector<128x4xbf16>
    tpu.vector_store %arg8[%c0_5, %c8], %13 {strides = array<i32>} : memref<128x36xbf16, #tpu.memory_space<vmem>>, vector<128x4xbf16>,
    %c1_i32 = arith.constant 1 : i32
    %15 = arith.addi %1, %c1_i32 : i32
    %c0_6 = arith.constant 0 : index
    %16 = arith.index_cast %15 : i32 to index
    %c0_7 = arith.constant 0 : index
    %c0_8 = arith.constant 0 : index
    %17 = vector.load %arg2[%c0_6, %16, %c0_7, %c0_8] : memref<1x18x18x4xbf16, #tpu.memory_space<vmem>>, vector<1x8x18x4xbf16>
    %18 = vector.shape_cast %17 : vector<1x8x18x4xbf16> to vector<8x18x4xbf16>
    %19 = vector.extract_strided_slice %18 {offsets = [0, 0, 0], sizes = [8, 16, 4], strides = [1, 1, 1]} : vector<8x18x4xbf16> to vector<8x16x4xbf16>
    %20 = vector.shape_cast %19 : vector<8x16x4xbf16> to vector<128x4xbf16>
    %c0_9 = arith.constant 0 : index
    %c12 = arith.constant 12 : index
    %21 = vector.load %arg8[%c0_9, %c12] : memref<128x36xbf16, #tpu.memory_space<vmem>>, vector<128x4xbf16>
    tpu.vector_store %arg8[%c0_9, %c12], %20 {strides = array<i32>} : memref<128x36xbf16, #tpu.memory_space<vmem>>, vector<128x4xbf16>,
    %22 = vector.extract_strided_slice %18 {offsets = [0, 1, 0], sizes = [8, 16, 4], strides = [1, 1, 1]} : vector<8x18x4xbf16> to vector<8x16x4xbf16>
    %23 = vector.shape_cast %22 : vector<8x16x4xbf16> to vector<128x4xbf16>
    %c0_10 = arith.constant 0 : index
    %c16 = arith.constant 16 : index
    %24 = vector.load %arg8[%c0_10, %c16] : memref<128x36xbf16, #tpu.memory_space<vmem>>, vector<128x4xbf16>
    tpu.vector_store %arg8[%c0_10, %c16], %23 {strides = array<i32>} : memref<128x36xbf16, #tpu.memory_space<vmem>>, vector<128x4xbf16>,
    %25 = vector.extract_strided_slice %18 {offsets = [0, 2, 0], sizes = [8, 16, 4], strides = [1, 1, 1]} : vector<8x18x4xbf16> to vector<8x16x4xbf16>
    %26 = vector.shape_cast %25 : vector<8x16x4xbf16> to vector<128x4xbf16>
    %c0_11 = arith.constant 0 : index
    %c20 = arith.constant 20 : index
    %27 = vector.load %arg8[%c0_11, %c20] : memref<128x36xbf16, #tpu.memory_space<vmem>>, vector<128x4xbf16>
    tpu.vector_store %arg8[%c0_11, %c20], %26 {strides = array<i32>} : memref<128x36xbf16, #tpu.memory_space<vmem>>, vector<128x4xbf16>,
    %c2_i32 = arith.constant 2 : i32
    %28 = arith.addi %1, %c2_i32 : i32
    %c0_12 = arith.constant 0 : index
    %29 = arith.index_cast %28 : i32 to index
    %c0_13 = arith.constant 0 : index
    %c0_14 = arith.constant 0 : index
    %30 = vector.load %arg2[%c0_12, %29, %c0_13, %c0_14] : memref<1x18x18x4xbf16, #tpu.memory_space<vmem>>, vector<1x8x18x4xbf16>
    %31 = vector.shape_cast %30 : vector<1x8x18x4xbf16> to vector<8x18x4xbf16>
    %32 = vector.extract_strided_slice %31 {offsets = [0, 0, 0], sizes = [8, 16, 4], strides = [1, 1, 1]} : vector<8x18x4xbf16> to vector<8x16x4xbf16>
    %33 = vector.shape_cast %32 : vector<8x16x4xbf16> to vector<128x4xbf16>
    %c0_15 = arith.constant 0 : index
    %c24 = arith.constant 24 : index
    %34 = vector.load %arg8[%c0_15, %c24] : memref<128x36xbf16, #tpu.memory_space<vmem>>, vector<128x4xbf16>
    tpu.vector_store %arg8[%c0_15, %c24], %33 {strides = array<i32>} : memref<128x36xbf16, #tpu.memory_space<vmem>>, vector<128x4xbf16>,
    %35 = vector.extract_strided_slice %31 {offsets = [0, 1, 0], sizes = [8, 16, 4], strides = [1, 1, 1]} : vector<8x18x4xbf16> to vector<8x16x4xbf16>
    %36 = vector.shape_cast %35 : vector<8x16x4xbf16> to vector<128x4xbf16>
    %c0_16 = arith.constant 0 : index
    %c28 = arith.constant 28 : index
    %37 = vector.load %arg8[%c0_16, %c28] : memref<128x36xbf16, #tpu.memory_space<vmem>>, vector<128x4xbf16>
    tpu.vector_store %arg8[%c0_16, %c28], %36 {strides = array<i32>} : memref<128x36xbf16, #tpu.memory_space<vmem>>, vector<128x4xbf16>,
    %38 = vector.extract_strided_slice %31 {offsets = [0, 2, 0], sizes = [8, 16, 4], strides = [1, 1, 1]} : vector<8x18x4xbf16> to vector<8x16x4xbf16>
    %39 = vector.shape_cast %38 : vector<8x16x4xbf16> to vector<128x4xbf16>
    %c0_17 = arith.constant 0 : index
    %c32 = arith.constant 32 : index
    %40 = vector.load %arg8[%c0_17, %c32] : memref<128x36xbf16, #tpu.memory_space<vmem>>, vector<128x4xbf16>
    tpu.vector_store %arg8[%c0_17, %c32], %39 {strides = array<i32>} : memref<128x36xbf16, #tpu.memory_space<vmem>>, vector<128x4xbf16>,
    %c0_18 = arith.constant 0 : index
    %c0_19 = arith.constant 0 : index
    %41 = vector.load %arg8[%c0_18, %c0_19] : memref<128x36xbf16, #tpu.memory_space<vmem>>, vector<128x36xbf16>
    %c0_20 = arith.constant 0 : index
    %c0_21 = arith.constant 0 : index
    %42 = vector.load %arg3[%c0_20, %c0_21] : memref<36x128xbf16, #tpu.memory_space<vmem>>, vector<36x128xbf16>
    %cst = arith.constant dense<0.000000e+00> : vector<128x128xf32>
    %43 = tpu.matmul %41, %42, %cst {dimension_numbers = #tpu.dot_dimension_numbers<[1], [0], [0], [1], [0, 0, 1, 1], [], []>} : vector<128x36xbf16>, vector<36x128xbf16>, vector<128x128xf32> -> vector<128x128xf32>
    %c0_22 = arith.constant 0 : index
    %c0_23 = arith.constant 0 : index
    %44 = vector.load %arg4[%c0_22, %c0_23] : memref<2x128xf32, #tpu.memory_space<vmem>>, vector<1x128xf32>
    %cst_24 = arith.constant 0.001953125 : f32
    %45 = vector.broadcast %cst_24 : f32 to vector<1x128xf32>
    %46 = arith.mulf %44, %45 : vector<1x128xf32>
    %c1 = arith.constant 1 : index
    %c0_25 = arith.constant 0 : index
    %47 = vector.load %arg4[%c1, %c0_25] : memref<2x128xf32, #tpu.memory_space<vmem>>, vector<1x128xf32>
    %cst_26 = arith.constant 0.001953125 : f32
    %48 = vector.broadcast %cst_26 : f32 to vector<1x128xf32>
    %49 = arith.mulf %47, %48 : vector<1x128xf32>
    %50 = arith.mulf %46, %46 : vector<1x128xf32>
    %51 = arith.subf %49, %50 : vector<1x128xf32>
    %cst_27 = arith.constant 0.000000e+00 : f32
    %52 = vector.broadcast %cst_27 : f32 to vector<1x128xf32>
    %53 = arith.maximumf %51, %52 : vector<1x128xf32>
    %c0_28 = arith.constant 0 : index
    %c0_29 = arith.constant 0 : index
    %54 = vector.load %arg5[%c0_28, %c0_29] : memref<1x128xf32, #tpu.memory_space<vmem>>, vector<1x128xf32>
    %cst_30 = arith.constant 9.99999974E-6 : f32
    %55 = vector.broadcast %cst_30 : f32 to vector<1x128xf32>
    %56 = arith.addf %53, %55 : vector<1x128xf32>
    %57 = math.rsqrt %56 : vector<1x128xf32>
    %58 = arith.mulf %54, %57 : vector<1x128xf32>
    %c0_31 = arith.constant 0 : index
    %c0_32 = arith.constant 0 : index
    %59 = vector.load %arg6[%c0_31, %c0_32] : memref<1x128xf32, #tpu.memory_space<vmem>>, vector<1x128xf32>
    %60 = arith.mulf %46, %58 : vector<1x128xf32>
    %61 = arith.subf %59, %60 : vector<1x128xf32>
    %62 = vector.broadcast %58 : vector<1x128xf32> to vector<128x128xf32>
    %63 = arith.mulf %43, %62 : vector<128x128xf32>
    %64 = vector.broadcast %61 : vector<1x128xf32> to vector<128x128xf32>
    %65 = arith.addf %63, %64 : vector<128x128xf32>
    %cst_33 = arith.constant 0.000000e+00 : f32
    %66 = vector.broadcast %cst_33 : f32 to vector<128x128xf32>
    %67 = arith.maximumf %65, %66 : vector<128x128xf32>
    %68 = tpu.transpose %67, [1, 0] : vector<128x128xf32> -> vector<128x128xf32>
    %69 = vector.extract_strided_slice %68 {offsets = [0, 0], sizes = [8, 128], strides = [1, 1]} : vector<128x128xf32> to vector<8x128xf32>
    %c0_34 = arith.constant 0 : index
    %c0_35 = arith.constant 0 : index
    %c0_36 = arith.constant 0 : index
    %70 = vector.load %arg7[%c0_34, %c0_35, %c0_36] : memref<1x8x128xf32, #tpu.memory_space<vmem>>, vector<1x8x128xf32>
    %71 = vector.shape_cast %70 : vector<1x8x128xf32> to vector<8x128xf32>
    %72 = vector.shape_cast %69 : vector<8x128xf32> to vector<1x8x128xf32>
    tpu.vector_store %arg7[%c0_34, %c0_35, %c0_36], %72 {strides = array<i32>} : memref<1x8x128xf32, #tpu.memory_space<vmem>>, vector<1x8x128xf32>,
    return
  }
  func.func @transform_0(%arg0: i32, %arg1: i32) -> (i32, i32, i32, i32) {
    %c0_i32 = arith.constant 0 : i32
    %c0_i32_0 = arith.constant 0 : i32
    %c0_i32_1 = arith.constant 0 : i32
    %c0_i32_2 = arith.constant 0 : i32
    return %arg0, %c0_i32, %c0_i32_0, %c0_i32_1 : i32, i32, i32, i32
  }
  func.func @transform_1(%arg0: i32, %arg1: i32) -> (i32, i32) {
    %c0_i32 = arith.constant 0 : i32
    %c0_i32_0 = arith.constant 0 : i32
    %c0_i32_1 = arith.constant 0 : i32
    return %c0_i32, %c0_i32_0 : i32, i32
  }
  func.func @transform_2(%arg0: i32, %arg1: i32) -> (i32, i32) {
    %c0_i32 = arith.constant 0 : i32
    %c0_i32_0 = arith.constant 0 : i32
    %c0_i32_1 = arith.constant 0 : i32
    return %c0_i32, %c0_i32_0 : i32, i32
  }
  func.func @transform_3(%arg0: i32, %arg1: i32) -> (i32, i32) {
    %c0_i32 = arith.constant 0 : i32
    %c0_i32_0 = arith.constant 0 : i32
    %c0_i32_1 = arith.constant 0 : i32
    return %c0_i32, %c0_i32_0 : i32, i32
  }
  func.func @transform_4(%arg0: i32, %arg1: i32) -> (i32, i32) {
    %c0_i32 = arith.constant 0 : i32
    %c0_i32_0 = arith.constant 0 : i32
    %c0_i32_1 = arith.constant 0 : i32
    return %c0_i32, %c0_i32_0 : i32, i32
  }
  func.func @transform_5(%arg0: i32, %arg1: i32) -> (i32, i32, i32) {
    %c0_i32 = arith.constant 0 : i32
    %c0_i32_0 = arith.constant 0 : i32
    return %arg0, %c0_i32, %arg1 : i32, i32, i32
  }
}

</mosaic_0001>

<bundles_post_ra>
// kernel: conv_block_forward.2
= control target key start
LH: loop header
LB: loop body
LE: loop exit
PB: predicated region body
PF: predicated region fallthrough
CT: control target
= control target key end

     0   :  { %s2211_s9 = smov 0   ;;  %s2213_s10 = smov 0   ;;  %s3135_s0 = inlined_call_operand.vmem [shape: bf16[2,18,18,4], index: 0, kind: input, shape index: {}]   ;;  %s3136_s1 = inlined_call_operand.vmem [shape: bf16[36,128], index: 1, kind: input, shape index: {}]   ;;  %s3137_s2 = inlined_call_operand.vmem [shape: f32[2,2,128], index: 2, kind: output, shape index: {}]  }
   0x1   :  { %s2215_s11 = smov 0   ;;  %s2217_s12 = smov 0  }
   0x2   :  { %s2219_s13 = smov 0  }
   0x3 LB: > { %s21_s14 = sadd.s32 1, %s2177_s11  ;;  %s24_s15 = sadd.s32 1, %s2181_s12  ;;  %s2185_s13 = sphi %s2219_s13, %s12_s13   ;;  %s2181_s12 = sphi %s2217_s12, %s3145_s12   ;;  %s2177_s11 = sphi %s2215_s11, %s3144_s11   ;;  %s2173_s10 = sphi %s2213_s10, %s3143_s10   ;;  %s2169_s9 = sphi %s2211_s9, %s3142_s9  }
   0x4   : > { %p22_p0 = scmp.ge.s32.totalorder %s21_s14, 2  ;;  %p1859_p1 = scmp.ge.s32.totalorder %s2185_s13, 1 }
   0x5   : > { %p124_p2 = scmp.lt.s32.totalorder %s2185_s13, 5 }
   0x6   : > { %s3147_s14 = smov (%p22_p0, %s21_s14), 0  ;;  %s3149_s15 = smov (!%p22_p0, %s24_s15), %s2181_s12 }
   0x7   : > { %p125_p3 = pnand %p1859_p1, %p124_p2  ;;  %p26_p4 = scmp.ge.s32.totalorder %s3149_s15, 2 }
   0x8   : > { %p145_p5 = scmp.lt.s32.totalorder (!%p125_p3), %s2173_s10, 1  ;;  %s2027_s16 = smul.u32 (!%p125_p3), 96, %s2169_s9  ;;  %vm500_vm0 = vcmask (!%p125_p3), 1042432   ;;  %vm501_vm1 = vcmask (!%p125_p3), 1046532   ;;  %vm240_vm3 = vsmask.f32 (!%p125_p3), 3328 }
   0x9   : > { %s3151_s15 = smov (%p26_p4, %s3149_s15), 0  ;;  %128 = sbr.rel (%p125_p3) target bundleno = 563 (0x233), region = 28 }
   0xa   : > { %s2187_s26 = smov (!%p125_p3), 12   ;;  %vm2326_vm2 = vmor (!%p125_p3), %vm500_vm0, %vm501_vm1  ;;  %vm241_vm4 = vsmask.f32 (!%p125_p3), 7440  ;;  %s2188_s27 = smov (!%p125_p3), 8   ;;  %vm231_vm6 = vcmask (!%p125_p3), 31744   ;;  %vm483_vm7 = vcmask (!%p125_p3), 64544  }
   0xb   : > { %vm2385_vm5 = vmor (!%p125_p3), %vm240_vm3, %vm241_vm4  ;;  %s2189_s28 = smov (!%p125_p3), 4   ;;  %s2190_s29 = smov (!%p125_p3), 16   ;;  %vm607_vm8 = vcmask (!%p125_p3), 97344   ;;  %vm708_vm9 = vcmask (!%p125_p3), 130144   ;;  %vm957_vm10 = vcmask (!%p125_p3), 162944   ;;  %vm1611_vm11 = vcmask (!%p125_p3), 1041408  }
   0xc   : > { %s2191_s30 = smov (!%p125_p3), 20   ;;  %s2192_s3 = smov (!%p125_p3), 24   ;;  %vm1078_vm12 = vcmask (!%p125_p3), 195744   ;;  %vm1179_vm13 = vcmask (!%p125_p3), 228544   ;;  %vm1428_vm14 = vcmask (!%p125_p3), 261344   ;;  %vm1549_vm15 = vcmask (!%p125_p3), 294144  }
   0xd   : > { %s2193_s4 = smov (!%p125_p3), 28   ;;  %s2194_s7 = smov (!%p125_p3), 32   ;;  %vm1586_vm0 = vcmask (!%p125_p3), 293888  }
   0xe   : > { %p2024_p6 = scmp.ne.s32.totalorder (!%p125_p3), %s2169_s9, 0 }
  0x10   : > { %s3153_s10 = smov (!%p145_p5, %s2173_s10), 1 }
  0x11   : > { %s2069_s17 = smul.u32 216, %s3153_s10  ;;  %s1861_s18 = sshll.u32 %s3153_s10, 1 }
  0x12   : > { %s2247_s21 = scalar_lea.vmem %s3137_s2, %s1861_s18 }
  0x13   : > { %s149_s24 = scalar_lea.vmem %s3135_s0, %s2069_s17 }
  0x14   : > { %s2252_s25 = scalar_lea.vmem %s149_s24, %s2027_s16 }
  0x15   : > { %v2255_v0 = vld [vmem:[%s2252_s25 + $0x3c] sm:$0xf]  ;;  %v2258_v1 = vld [vmem:[%s2252_s25 + $0x40] sm:$0xf]  ;;  %v2261_v2 = vld [vmem:[%s2252_s25 + $0xc] sm:$0xf] }
  0x16   : > { %v1927_v3 = vcombine.low %v2255_v0, %v2258_v1  ;;  %v814_v4 = vshrl.u32 %v2255_v0, 16  ;;  %v817_v5 = vshll.u32 %v2255_v0, 16  ;;  %v823_v6 = vshll.u32 %v2258_v1, 16  ;;  %v2269_v7 = vld [vmem:[%s2252_s25 + $0x10] sm:$0xf] }
  0x17   : > { %v827_v8 = vshrl.u32 %v2258_v1, 16  ;;  %v1923_v9 = vcombine.low %v2261_v2, %v2269_v7  ;;  %v718_v10 = vshrl.u32 %v2261_v2, 16  ;;  %v721_v11 = vshll.u32 %v2261_v2, 16  ;;  %v2277_v12 = vld [vmem:[%s2252_s25 + $0x48] sm:$0xf] }
  0x18   : > { %v2279_v13 = vrot.slane %v814_v4, 4  ;;  %v2281_v14 = vrot.slane %v817_v5, 5  ;;  %692 = vrot.lane.b32.xlu1 %v1927_v3, %s2187_s26  ;;  %v727_v15 = vshll.u32 %v2269_v7, 16  ;;  %v731_v16 = vshrl.u32 %v2269_v7, 16  ;;  %v2287_v17 = vld [vmem:[%s2252_s25 + $0x4c] sm:$0xf] }
  0x19   : > { %v2289_v18 = vrot.slane %v827_v8, 4  ;;  %v2291_v19 = vrot.slane %v718_v10, 4  ;;  %v2293_v20 = vrot.slane %v721_v11, 5  ;;  %684 = vrot.lane.b32.xlu0 %v1923_v9, %s2187_s26  ;;  %v1928_v21 = vcombine.low %v2277_v12, %v2287_v17  ;;  %v2299_v22 = vld [vmem:[%s2252_s25 + $0x18] sm:$0xf] }
  0x1a   : > { %v2301_v23 = vrot.slane %v731_v16, 4  ;;  %v838_v24 = vshrl.u32 %v2277_v12, 16  ;;  %v841_v25 = vshll.u32 %v2277_v12, 16  ;;  %v851_v26 = vshrl.u32 %v2287_v17, 16  ;;  %v2307_v27 = vld [vmem:[%s2252_s25 + $0x1c] sm:$0xf] }
  0x1b   : > { %v1924_v28 = vcombine.low %v2299_v22, %v2307_v27  ;;  %v742_v29 = vshrl.u32 %v2299_v22, 16  ;;  %v745_v30 = vshll.u32 %v2299_v22, 16  ;;  %v755_v31 = vshrl.u32 %v2307_v27, 16  ;;  %v2315_v32 = vld [vmem:[%s2252_s25 + $0x30] sm:$0xf] }
  0x1c   : > { %694 = vrot.lane.b32.xlu1 %v1928_v21, %s2187_s26  ;;  %v2319_v33 = vld [vmem:[%s2252_s25 + $0x34] sm:$0xf]  ;;  %v2322_v34 = vld [vmem:[%s2252_s25 + $0x38] sm:$0x1]  ;;  %v1885_v36 = vrot.slane %v2315_v32, 9  ;;  %v340_v37 = vshrl.u32 %v2315_v32, 16  ;;  %v820_v51 = vor.u32 %v2281_v14, %v2279_v13  ;;  %v724_v62 = vor.u32 %v2293_v20, %v2291_v19 }
  0x1d   : > { %686 = vrot.lane.b32.xlu0 %v1924_v28, %s2187_s26  ;;  %v533_v38 = vrot.slane %v2319_v33, 5  ;;  %v536_v39 = vrot.slane %v2322_v34, 5  ;;  %v159_v40 = vld [vmem:[%s2252_s25] sm:$0xf]  ;;  %v2337_v41 = vld [vmem:[%s2252_s25 + $0x4] sm:$0xf] }
  0x1e   : > { %v2340_v42 = vld [vmem:[%s2252_s25 + $0x8] sm:$0x1]  ;;  %v1881_v43 = vrot.slane %v159_v40, 9  ;;  %v505_v44 = vrot.slane %v2337_v41, 5  ;;  %v2344_v45 = vld [vmem:[%s2252_s25 + $0x3c] sm:$0xf] }
  0x1f   : > { %v534_v46 = vsel %vm2326_vm2, %v1885_v36, %v533_v38  ;;  %v535_v47 = vrot.slane %v533_v38, 4  ;;  %v508_v48 = vrot.slane %v2340_v42, 5  ;;  %v2350_v49 = vld [vmem:[%s2252_s25 + $0x40] sm:$0xf]  ;;  %v2353_v50 = vld [vmem:[%s2252_s25 + $0x44] sm:$0x1] }
  0x20   : > { %v506_v52 = vsel %vm2326_vm2, %v1881_v43, %v505_v44  ;;  %v507_v53 = vrot.slane %v505_v44, 4  ;;  %v1886_v54 = vrot.slane %v2344_v45, 9  ;;  %v540_v55 = vrot.slane %v2350_v49, 5  ;;  %v162_v56 = vld [vmem:[%s2252_s25 + $0xc] sm:$0xf] }
  0x21   : > { %v537_v57 = vsel %vm2326_vm2, %v535_v47, %v536_v39  ;;  %v543_v58 = vrot.slane %v2353_v50, 5  ;;  %v163_v59 = vld [vmem:[%s2252_s25 + $0x10] sm:$0xf]  ;;  %v164_v60 = vld [vmem:[%s2252_s25 + $0x14] sm:$0x1]  ;;  %v1882_v61 = vrot.slane %v162_v56, 9 }
  0x22   : > { %v1893_v63 = vcombine.low %v534_v46, %v537_v57  ;;  %v509_v3 = vsel %vm2326_vm2, %v507_v53, %v508_v48  ;;  %v541_v4 = vsel %vm2326_vm2, %v1886_v54, %v540_v55  ;;  %v542_v5 = vrot.slane %v540_v55, 4 }
  0x23   : > { %v1889_v8 = vcombine.low %v506_v52, %v509_v3  ;;  %v512_v9 = vrot.slane %v163_v59, 5  ;;  %v515_v10 = vrot.slane %v164_v60, 5  ;;  %v268_v11 = vshrl.u32 %v162_v56, 16 }
  0x24   : > { %591 = vrot.lane.b32.xlu1 %v1893_v63, %s2188_s27  ;;  %v544_v16 = vsel %vm2326_vm2, %v542_v5, %v543_v58  ;;  %v271_v21 = vshll.u32 %v162_v56, 16  ;;  %v277_v28 = vshll.u32 %v163_v59, 16  ;;  %v281_v36 = vshrl.u32 %v163_v59, 16 }
  0x25   : > { %583 = vrot.lane.b32.xlu0 %v1889_v8, %s2188_s27  ;;  %v1894_v38 = vcombine.low %v541_v4, %v544_v16  ;;  %v513_v39 = vsel %vm2326_vm2, %v1882_v61, %v512_v9  ;;  %v514_v43 = vrot.slane %v512_v9, 4  ;;  %v270_v44 = vrot.slane %v268_v11, 4 }
  0x26   : > { %v273_v46 = vrot.slane %v271_v21, 5  ;;  %v279_v47 = vrot.slane %v277_v28, 5  ;;  %v283_v48 = vrot.slane %v281_v36, 4  ;;  %v287_v52 = vshll.u32 %v164_v60, 16 }
  0x27   : > { %v516_v53 = vsel %vm2326_vm2, %v514_v43, %v515_v10  ;;  %v244_v54 = vshrl.u32 %v159_v40, 16  ;;  %v247_v55 = vshll.u32 %v159_v40, 16  ;;  %v253_v56 = vshll.u32 %v2337_v41, 16 }
  0x28   : > { %593 = vrot.lane.b32.xlu1 %v1894_v38, %s2188_s27  ;;  %v1890_v57 = vcombine.low %v513_v39, %v516_v53  ;;  %v274_v58 = vor.u32 %v273_v46, %v270_v44  ;;  %v284_v59 = vor.u32 %v283_v48, %v279_v47  ;;  %v289_v63 = vrot.slane %v287_v52, 5 }
  0x29   : > { %v246_v60 = vrot.slane %v244_v54, 4  ;;  %v249_v3 = vrot.slane %v247_v55, 5  ;;  %v255_v4 = vrot.slane %v253_v56, 5  ;;  %v257_v5 = vshrl.u32 %v2337_v41, 16 }
  0x2a   : > { %585 = vrot.lane.b32.xlu0 %v1890_v57, %s2188_s27  ;;  %v275_v40 = vrot.slane %v274_v58, 4  ;;  %v285_v8 = vrot.slane %v284_v59, 4  ;;  %v263_v9 = vshll.u32 %v2340_v42, 16  ;;  %v364_v10 = vshrl.u32 %v2344_v45, 16 }
  0x2b   : > { %v250_v11 = vor.u32 %v249_v3, %v246_v60  ;;  %v259_v16 = vrot.slane %v257_v5, 4  ;;  %v367_v21 = vshll.u32 %v2344_v45, 16  ;;  %v373_v28 = vshll.u32 %v2350_v49, 16  ;;  %v2413_v3 = vld [vmem:[%s2252_s25 + $0x44] sm:$0x1] }
  0x2c   : > { %v280_v36 = vsel %vm2385_vm5, %v275_v40, %v279_v47  ;;  %v290_v41 = vsel %vm2385_vm5, %v285_v8, %v289_v63  ;;  %v265_v38 = vrot.slane %v263_v9, 5  ;;  %v366_v39 = vrot.slane %v364_v10, 4 }
  0x2d   : > { %v1874_v43 = vcombine.low %v280_v36, %v290_v41  ;;  %v251_v44 = vrot.slane %v250_v11, 4  ;;  %v260_v46 = vor.u32 %v259_v16, %v255_v4  ;;  %v369_v42 = vrot.slane %v367_v21, 5 }
  0x2e   : > { %v375_v48 = vrot.slane %v373_v28, 5  ;;  %v377_v52 = vshrl.u32 %v2350_v49, 16  ;;  %v383_v53 = vshll.u32 %v2353_v50, 16  ;;  %v342_v45 = vrot.slane %v340_v37, 4 }
  0x2f   : > { %461 = vrot.lane.b32.xlu1 %v1874_v43, %s2189_s28  ;;  %v256_v47 = vsel %vm2385_vm5, %v251_v44, %v255_v4  ;;  %v261_v54 = vrot.slane %v260_v46, 4  ;;  %v370_v55 = vor.u32 %v369_v42, %v366_v39  ;;  %v343_v56 = vshll.u32 %v2315_v32, 16  ;;  %v2416_v32 = vld [vmem:[%s2252_s25 + $0x14] sm:$0x1] }
  0x30   : > { %v379_v57 = vrot.slane %v377_v52, 4  ;;  %v385_v58 = vrot.slane %v383_v53, 5  ;;  %v349_v49 = vshll.u32 %v2319_v33, 16  ;;  %v353_v50 = vshrl.u32 %v2319_v33, 16 }
  0x31   : > { %v266_v37 = vsel %vm2385_vm5, %v261_v54, %v265_v38  ;;  %v371_v59 = vrot.slane %v370_v55, 4  ;;  %v345_v63 = vrot.slane %v343_v56, 5  ;;  %v359_v60 = vshll.u32 %v2322_v34, 16 }
  0x32   : > { %v1873_v4 = vcombine.low %v256_v47, %v266_v37  ;;  %v380_v5 = vor.u32 %v379_v57, %v375_v48  ;;  %v351_v40 = vrot.slane %v349_v49, 5  ;;  %v355_v8 = vrot.slane %v353_v50, 4 }
  0x33   : > { %v376_v9 = vsel %vm2385_vm5, %v371_v59, %v375_v48  ;;  %v346_v10 = vor.u32 %v345_v63, %v342_v45  ;;  %v361_v33 = vrot.slane %v359_v60, 5  ;;  %v821_v11 = vrot.slane %v820_v51, 4 }
  0x34   : > { %459 = vrot.lane.b32.xlu0 %v1873_v4, %s2189_s28  ;;  %v381_v34 = vrot.slane %v380_v5, 4  ;;  %v356_v16 = vor.u32 %v355_v8, %v351_v40  ;;  %v825_v21 = vrot.slane %v823_v6, 5  ;;  %v833_v28 = vshll.u32 %v2413_v3, 16 }
  0x35   : > { %v347_v36 = vrot.slane %v346_v10, 4  ;;  %v725_v41 = vrot.slane %v724_v62, 4  ;;  %v729_v38 = vrot.slane %v727_v15, 5  ;;  %v737_v13 = vshll.u32 %v2416_v32, 16  ;;  %v2443_v15 = vld [vmem:[%s2252_s25 + $0x50] sm:$0x1] }
  0x36   : > { %v386_v14 = vsel %vm2385_vm5, %v381_v34, %v385_v58  ;;  %v357_v51 = vrot.slane %v356_v16, 4  ;;  %v826_v39 = vsel %vm2385_vm5, %v821_v11, %v825_v21  ;;  %v830_v6 = vor.u32 %v2289_v18, %v825_v21 }
  0x37   : > { %v1878_v43 = vcombine.low %v376_v9, %v386_v14  ;;  %v352_v44 = vsel %vm2385_vm5, %v347_v36, %v351_v40  ;;  %v835_v19 = vrot.slane %v833_v28, 5  ;;  %v730_v20 = vsel %vm2385_vm5, %v725_v41, %v729_v38 }
  0x38   : > { %v362_v62 = vsel %vm2385_vm5, %v357_v51, %v361_v33  ;;  %v831_v46 = vrot.slane %v830_v6, 4  ;;  %v734_v42 = vor.u32 %v2301_v23, %v729_v38  ;;  %v739_v48 = vrot.slane %v737_v13, 5 }
  0x39   : > { %469 = vrot.lane.b32.xlu1 %v1878_v43, %s2189_s28  ;;  %v1877_v18 = vcombine.low %v352_v44, %v362_v62  ;;  %v840_v52 = vrot.slane %v838_v24, 4  ;;  %v843_v53 = vrot.slane %v841_v25, 5  ;;  %v847_v45 = vshll.u32 %v2287_v17, 16  ;;  %v2461_v24 = vld [vmem:[%s2252_s25 + $0x20] sm:$0x1] }
  0x3a   : > { %v836_v47 = vsel %vm2385_vm5, %v831_v46, %v835_v19  ;;  %v735_v54 = vrot.slane %v734_v42, 4  ;;  %v853_v55 = vrot.slane %v851_v26, 4  ;;  %v857_v23 = vshll.u32 %v2443_v15, 16  ;;  %v2500_v43 = vld [vmem:[%s2252_s25 + $0x48] sm:$0xf] }
  0x3b   : > { %467 = vrot.lane.b32.xlu0 %v1877_v18, %s2189_s28  ;;  %v1935_v56 = vcombine.low %v826_v39, %v836_v47  ;;  %v844_v57 = vor.u32 %v843_v53, %v840_v52  ;;  %v849_v58 = vrot.slane %v847_v45, 5  ;;  %v744_v25 = vrot.slane %v742_v29, 4  ;;  %v2503_v44 = vld [vmem:[%s2252_s25 + $0x4c] sm:$0xf]  ;;  %v2510_v46 = vld [vmem:[%s2252_s25 + $0x18] sm:$0xf] }
  0x3c   : > { %v740_v49 = vsel %vm2385_vm5, %v735_v54, %v739_v48  ;;  %v859_v50 = vrot.slane %v857_v23, 5  ;;  %v747_v37 = vrot.slane %v745_v30, 5  ;;  %v751_v26 = vshll.u32 %v2307_v27, 16  ;;  %v2513_v42 = vld [vmem:[%s2252_s25 + $0x1c] sm:$0xf] }
  0x3d   : > { %941 = vrot.lane.b32.xlu1 %v1935_v56, %s2190_s29  ;;  %v1931_v59 = vcombine.low %v730_v20, %v740_v49  ;;  %v845_v63 = vrot.slane %v844_v57, 4  ;;  %v854_v60 = vor.u32 %v853_v55, %v849_v58  ;;  %v757_v4 = vrot.slane %v755_v31, 4  ;;  %v2525_v45 = vld [vmem:[%s2252_s25 + $0x54] sm:$0xf]  ;;  %v2528_v47 = vld [vmem:[%s2252_s25 + $0x58] sm:$0xf] }
  0x3e   : > { %v748_v5 = vor.u32 %v747_v37, %v744_v25  ;;  %v753_v29 = vrot.slane %v751_v26, 5  ;;  %v761_v40 = vshll.u32 %v2461_v24, 16  ;;  %v1943_v8 = vrot.slane %v2255_v0, 9  ;;  %v2538_v57 = vld [vmem:[%s2252_s25 + $0x24] sm:$0xf] }
  0x3f   : > { %933 = vrot.lane.b32.xlu0 %v1931_v59, %s2190_s29  ;;  %v850_v30 = vsel %vm2385_vm5, %v845_v63, %v849_v58  ;;  %v855_v9 = vrot.slane %v854_v60, 4  ;;  %v1004_v10 = vrot.slane %v2258_v1, 5  ;;  %v1007_v33 = vrot.slane %v2413_v3, 5  ;;  %v2541_v58 = vld [vmem:[%s2252_s25 + $0x28] sm:$0xf] }
  0x40   : > { %v749_v11 = vrot.slane %v748_v5, 4  ;;  %v758_v34 = vor.u32 %v757_v4, %v753_v29  ;;  %v763_v16 = vrot.slane %v761_v40, 5  ;;  %v1939_v31 = vrot.slane %v2261_v2, 9  ;;  %v2552_v60 = vld [vmem:[%s2252_s25 + $0x50] sm:$0x1] }
  0x41   : > { %v860_v21 = vsel %vm2385_vm5, %v855_v9, %v859_v50  ;;  %v1005_v0 = vsel %vm2326_vm2, %v1943_v8, %v1004_v10  ;;  %v1006_v28 = vrot.slane %v1004_v10, 4  ;;  %v976_v36 = vrot.slane %v2269_v7, 5 }
  0x42   : > { %v1936_v41 = vcombine.low %v850_v30, %v860_v21  ;;  %v754_v1 = vsel %vm2385_vm5, %v749_v11, %v753_v29  ;;  %v759_v3 = vrot.slane %v758_v34, 4  ;;  %v979_v38 = vrot.slane %v2416_v32, 5 }
  0x43   : > { %v1008_v2 = vsel %vm2326_vm2, %v1006_v28, %v1007_v33  ;;  %v977_v13 = vsel %vm2326_vm2, %v1939_v31, %v976_v36  ;;  %v978_v14 = vrot.slane %v976_v36, 4  ;;  %v1944_v51 = vrot.slane %v2277_v12, 9  ;;  %v2564_v33 = vld [vmem:[%s2252_s25 + $0x20] sm:$0x1] }
  0x44   : > { %943 = vrot.lane.b32.xlu1 %v1936_v41, %s2190_s29  ;;  %v764_v7 = vsel %vm2385_vm5, %v759_v3, %v763_v16  ;;  %v1951_v39 = vcombine.low %v1005_v0, %v1008_v2  ;;  %v1011_v6 = vrot.slane %v2287_v17, 5  ;;  %v1014_v32 = vrot.slane %v2443_v15, 5 }
  0x45   : > { %v1932_v19 = vcombine.low %v754_v1, %v764_v7  ;;  %v980_v12 = vsel %vm2326_vm2, %v978_v14, %v979_v38  ;;  %v1940_v20 = vrot.slane %v2299_v22, 9  ;;  %v983_v62 = vrot.slane %v2307_v27, 5 }
  0x46   : > { %v1947_v17 = vcombine.low %v977_v13, %v980_v12  ;;  %v1012_v15 = vsel %vm2326_vm2, %v1944_v51, %v1011_v6  ;;  %v1013_v48 = vrot.slane %v1011_v6, 4  ;;  %v986_v18 = vrot.slane %v2461_v24, 5  ;;  %v2573_v51 = vld [vmem:[%s2252_s25 + $0x5c] sm:$0x1] }
  0x47   : > { %935 = vrot.lane.b32.xlu0 %v1932_v19, %s2190_s29  ;;  %v984_v22 = vsel %vm2326_vm2, %v1940_v20, %v983_v62  ;;  %v985_v52 = vrot.slane %v983_v62, 4  ;;  %v1985_v27 = vcombine.low %v2500_v43, %v2503_v44  ;;  %v1285_v53 = vshrl.u32 %v2500_v43, 16 }
  0x48   : > { %1062 = vrot.lane.b32.xlu1 %v1951_v39, %s2191_s30  ;;  %v1015_v54 = vsel %vm2326_vm2, %v1013_v48, %v1014_v32  ;;  %v1288_v55 = vshll.u32 %v2500_v43, 16  ;;  %v1298_v23 = vshrl.u32 %v2503_v44, 16  ;;  %v1981_v56 = vcombine.low %v2510_v46, %v2513_v42 }
  0x49   : > { %v1952_v24 = vcombine.low %v1012_v15, %v1015_v54  ;;  %v987_v25 = vsel %vm2326_vm2, %v985_v52, %v986_v18  ;;  %v1189_v49 = vshrl.u32 %v2510_v46, 16  ;;  %v1192_v50 = vshll.u32 %v2510_v46, 16 }
  0x4a   : > { %v1948_v37 = vcombine.low %v984_v22, %v987_v25  ;;  %v1202_v26 = vshrl.u32 %v2513_v42, 16  ;;  %v1986_v59 = vcombine.low %v2525_v45, %v2528_v47  ;;  %v1309_v63 = vshrl.u32 %v2525_v45, 16  ;;  %v2586_v25 = vld [vmem:[%s2252_s25 + $0x2c] sm:$0x1] }
  0x4b   : > { %1054 = vrot.lane.b32.xlu0 %v1947_v17, %s2191_s30  ;;  %v1312_v4 = vshll.u32 %v2525_v45, 16  ;;  %v1322_v5 = vshrl.u32 %v2528_v47, 16  ;;  %v1982_v29 = vcombine.low %v2538_v57, %v2541_v58  ;;  %v1213_v40 = vshrl.u32 %v2538_v57, 16 }
  0x4c   : > { %1064 = vrot.lane.b32.xlu1 %v1952_v24, %s2191_s30  ;;  %v1216_v8 = vshll.u32 %v2538_v57, 16  ;;  %v1226_v30 = vshrl.u32 %v2541_v58, 16  ;;  %v1287_v9 = vrot.slane %v1285_v53, 4  ;;  %v1290_v10 = vrot.slane %v1288_v55, 5 }
  0x4d   : > { %v1294_v11 = vshll.u32 %v2503_v44, 16  ;;  %v1300_v34 = vrot.slane %v1298_v23, 4  ;;  %v1304_v16 = vshll.u32 %v2552_v60, 16  ;;  %v1191_v31 = vrot.slane %v1189_v49, 4 }
  0x4e   : > { %v1291_v21 = vor.u32 %v1290_v10, %v1287_v9  ;;  %v1194_v0 = vrot.slane %v1192_v50, 5  ;;  %v1198_v28 = vshll.u32 %v2513_v42, 16  ;;  %v1204_v36 = vrot.slane %v1202_v26, 4 }
  0x4f   : > { %1056 = vrot.lane.b32.xlu0 %v1948_v37, %s2191_s30  ;;  %v1296_v41 = vrot.slane %v1294_v11, 5  ;;  %v1306_v1 = vrot.slane %v1304_v16, 5  ;;  %v1208_v3 = vshll.u32 %v2564_v33, 16  ;;  %v1311_v38 = vrot.slane %v1309_v63, 4 }
  0x50   : > { %1163 = vrot.lane.b32.xlu1 %v1985_v27, %s2192_s3  ;;  %v1292_v2 = vrot.slane %v1291_v21, 4  ;;  %v1195_v13 = vor.u32 %v1194_v0, %v1191_v31  ;;  %v1200_v14 = vrot.slane %v1198_v28, 5  ;;  %v1314_v7 = vrot.slane %v1312_v4, 5  ;;  %v2606_v31 = vld [vmem:[%s2252_s25 + $0x4c] sm:$0xf] }
  0x51   : > { %v1301_v39 = vor.u32 %v1300_v34, %v1296_v41  ;;  %v1210_v6 = vrot.slane %v1208_v3, 5  ;;  %v1318_v32 = vshll.u32 %v2528_v47, 16  ;;  %v1324_v19 = vrot.slane %v1322_v5, 4 }
  0x52   : > { %v1297_v12 = vsel %vm2385_vm5, %v1292_v2, %v1296_v41  ;;  %v1196_v20 = vrot.slane %v1195_v13, 4  ;;  %v1205_v62 = vor.u32 %v1204_v36, %v1200_v14  ;;  %v1315_v17 = vor.u32 %v1314_v7, %v1311_v38  ;;  %v2617_v41 = vld [vmem:[%s2252_s25 + $0x50] sm:$0x1]  ;;  %v2630_v7 = vld [vmem:[%s2252_s25 + $0x18] sm:$0xf] }
  0x53   : > { %1155 = vrot.lane.b32.xlu0 %v1981_v56, %s2192_s3  ;;  %v1302_v15 = vrot.slane %v1301_v39, 4  ;;  %v1320_v48 = vrot.slane %v1318_v32, 5  ;;  %v1328_v18 = vshll.u32 %v2573_v51, 16  ;;  %v1215_v22 = vrot.slane %v1213_v40, 4 }
  0x54   : > { %1165 = vrot.lane.b32.xlu1 %v1986_v59, %s2192_s3  ;;  %v1201_v52 = vsel %vm2385_vm5, %v1196_v20, %v1200_v14  ;;  %v1206_v27 = vrot.slane %v1205_v62, 4  ;;  %v1316_v53 = vrot.slane %v1315_v17, 4  ;;  %v1218_v54 = vrot.slane %v1216_v8, 5 }
  0x55   : > { %v1307_v55 = vsel %vm2385_vm5, %v1302_v15, %v1306_v1  ;;  %v1325_v23 = vor.u32 %v1324_v19, %v1320_v48  ;;  %v1330_v24 = vrot.slane %v1328_v18, 5  ;;  %v1222_v56 = vshll.u32 %v2541_v58, 16  ;;  %v2136_v18 = vld [vmem:[%s3136_s1] sm:$0xff]  }
  0x56   : > { %v1993_v49 = vcombine.low %v1297_v12, %v1307_v55  ;;  %v1211_v50 = vsel %vm2385_vm5, %v1206_v27, %v1210_v6  ;;  %v1321_v37 = vsel %vm2385_vm5, %v1316_v53, %v1320_v48  ;;  %v1219_v26 = vor.u32 %v1218_v54, %v1215_v22  ;;  %v2633_v12 = vld [vmem:[%s2252_s25 + $0x1c] sm:$0xf]  ;;  %v2639_v48 = vld [vmem:[%s2252_s25 + $0x20] sm:$0x1]  ;;  %2039 = vmatprep.subr.bf16.mxu0 %v2136_v18 }
  0x57   : > { %1157 = vrot.lane.b32.xlu0 %v1982_v29, %s2192_s3  ;;  %v1989_v59 = vcombine.low %v1201_v52, %v1211_v50  ;;  %v1326_v63 = vrot.slane %v1325_v23, 4  ;;  %v1224_v4 = vrot.slane %v1222_v56, 5  ;;  %v1228_v5 = vrot.slane %v1226_v30, 4  ;;  %v2603_v30 = vld [vmem:[%s2252_s25 + $0x48] sm:$0xf]  ;;  %2061 = vmatprep.subr.bf16.mxu1 %v2136_v18 }
  0x58   : > { %1412 = vrot.lane.b32.xlu1 %v1993_v49, %s2193_s4  ;;  %v1220_v40 = vrot.slane %v1219_v26, 4  ;;  %v1232_v8 = vshll.u32 %v2586_v25, 16  ;;  %v2001_v9 = vrot.slane %v2500_v43, 9  ;;  %v1475_v10 = vrot.slane %v2503_v44, 5  ;;  %2040 = vmatpush3.bf16.msra.mxu0 %v2136_v18 }
  0x59   : > { %v1331_v11 = vsel %vm2385_vm5, %v1326_v63, %v1330_v24  ;;  %v1229_v29 = vor.u32 %v1228_v5, %v1224_v4  ;;  %v1478_v34 = vrot.slane %v2552_v60, 5  ;;  %v1997_v16 = vrot.slane %v2510_v46, 9  ;;  %2064 = vmatpush3.bf16.msra.mxu1 %v2136_v18  ;;  %v2137_v5 = vld [vmem:[%s3136_s1 + $0x8] sm:$0xff]  }
  0x5a   : > { %v1994_v21 = vcombine.low %v1321_v37, %v1331_v11  ;;  %v1225_v0 = vsel %vm2385_vm5, %v1220_v40, %v1224_v4  ;;  %v1234_v43 = vrot.slane %v1232_v8, 5  ;;  %v1476_v44 = vsel %vm2326_vm2, %v2001_v9, %v1475_v10  ;;  %v2660_v11 = vld [vmem:[%s2252_s25 + $0x54] sm:$0xf]  ;;  %2041 = vmatprep.subr.bf16.mxu0 %v2137_v5  ;;  %2062 = vmatprep.subr.bf16.mxu1 %v2137_v5 }
  0x5b   : > { %1404 = vrot.lane.b32.xlu0 %v1989_v59, %s2193_s4  ;;  %v1230_v28 = vrot.slane %v1229_v29, 4  ;;  %v1477_v36 = vrot.slane %v1475_v10, 4  ;;  %v1447_v60 = vrot.slane %v2513_v42, 5  ;;  %v1450_v46 = vrot.slane %v2564_v33, 5 }
  0x5c   : > { %1414 = vrot.lane.b32.xlu1 %v1994_v21, %s2193_s4  ;;  %v388_v1 = vshrl.u32 %v2603_v30, 16  ;;  %v391_v3 = vshll.u32 %v2603_v30, 16  ;;  %v397_v38 = vshll.u32 %v2606_v31, 16  ;;  %v401_v2 = vshrl.u32 %v2606_v31, 16  ;;  %v2667_v21 = vld [vmem:[%s2252_s25 + $0x58] sm:$0xf]  ;;  %2042 = vmatpush3.bf16.msra.mxu0 %v2137_v5 }
  0x5d   : > { %v1235_v13 = vsel %vm2385_vm5, %v1230_v28, %v1234_v43  ;;  %v1479_v42 = vsel %vm2326_vm2, %v1477_v36, %v1478_v34  ;;  %v1448_v33 = vsel %vm2326_vm2, %v1997_v16, %v1447_v60  ;;  %v1449_v14 = vrot.slane %v1447_v60, 4  ;;  %2065 = vmatpush3.bf16.msra.mxu1 %v2137_v5 }
  0x5e   : > { %v1990_v39 = vcombine.low %v1225_v0, %v1235_v13  ;;  %v2009_v6 = vcombine.low %v1476_v44, %v1479_v42  ;;  %v390_v32 = vrot.slane %v388_v1, 4  ;;  %v393_v19 = vrot.slane %v391_v3, 5  ;;  %v2680_v1 = vld [vmem:[%s2252_s25 + $0x5c] sm:$0x1] }
  0x5f   : > { %v1451_v20 = vsel %vm2326_vm2, %v1449_v14, %v1450_v46  ;;  %v399_v62 = vrot.slane %v397_v38, 5  ;;  %v403_v17 = vrot.slane %v401_v2, 4  ;;  %v407_v15 = vshll.u32 %v2617_v41, 16 }
  0x60   : > { %1406 = vrot.lane.b32.xlu0 %v1990_v39, %s2193_s4  ;;  %1533 = vrot.lane.b32.xlu1 %v2009_v6, %s2194_s7  ;;  %v2005_v22 = vcombine.low %v1448_v33, %v1451_v20  ;;  %v394_v52 = vor.u32 %v393_v19, %v390_v32  ;;  %v292_v27 = vshrl.u32 %v2630_v7, 16  ;;  %v295_v53 = vshll.u32 %v2630_v7, 16  ;;  %v2692_v33 = vld [vmem:[%s2252_s25 + $0x28] sm:$0xf] }
  0x61   : > { %v404_v54 = vor.u32 %v403_v17, %v399_v62  ;;  %v409_v55 = vrot.slane %v407_v15, 5  ;;  %v301_v23 = vshll.u32 %v2633_v12, 16  ;;  %v305_v24 = vshrl.u32 %v2633_v12, 16  ;;  %v2699_v17 = vld [vmem:[%s2252_s25 + $0x2c] sm:$0x1] }
  0x62   : > { %v395_v56 = vrot.slane %v394_v52, 4  ;;  %v294_v49 = vrot.slane %v292_v27, 4  ;;  %v297_v50 = vrot.slane %v295_v53, 5  ;;  %v311_v37 = vshll.u32 %v2639_v48, 16 }
  0x63   : > { %v405_v26 = vrot.slane %v404_v54, 4  ;;  %v303_v59 = vrot.slane %v301_v23, 5  ;;  %v307_v63 = vrot.slane %v305_v24, 4  ;;  %v2002_v4 = vrot.slane %v2525_v45, 9 }
  0x64   : > { %1525 = vrot.lane.b32.xlu0 %v2005_v22, %s2194_s7  ;;  %v400_v40 = vsel %vm2385_vm5, %v395_v56, %v399_v62  ;;  %v298_v8 = vor.u32 %v297_v50, %v294_v49  ;;  %v313_v9 = vrot.slane %v311_v37, 5  ;;  %v1482_v10 = vrot.slane %v2528_v47, 5 }
  0x65   : > { %v410_v29 = vsel %vm2385_vm5, %v405_v26, %v409_v55  ;;  %v308_v34 = vor.u32 %v307_v63, %v303_v59  ;;  %v1485_v45 = vrot.slane %v2573_v51, 5  ;;  %v1998_v16 = vrot.slane %v2538_v57, 9 }
  0x66   : > { %v1879_v0 = vcombine.low %v400_v40, %v410_v29  ;;  %v299_v43 = vrot.slane %v298_v8, 4  ;;  %v1483_v47 = vsel %vm2326_vm2, %v2002_v4, %v1482_v10  ;;  %v1484_v44 = vrot.slane %v1482_v10, 4 }
  0x67   : > { %v309_v28 = vrot.slane %v308_v34, 4  ;;  %v1454_v51 = vrot.slane %v2541_v58, 5  ;;  %v1457_v57 = vrot.slane %v2586_v25, 5  ;;  %v412_v36 = vshrl.u32 %v2660_v11, 16  ;;  %v2685_v58 = vld [vmem:[%s2252_s25 + $0x24] sm:$0xf] }
  0x68   : > { %471 = vrot.lane.b32.xlu1 %v1879_v0, %s2189_s28  ;;  %v304_v60 = vsel %vm2385_vm5, %v299_v43, %v303_v59  ;;  %v1486_v46 = vsel %vm2326_vm2, %v1484_v44, %v1485_v45  ;;  %v415_v3 = vshll.u32 %v2660_v11, 16  ;;  %v421_v38 = vshll.u32 %v2667_v21, 16 }
  0x69   : > { %v314_v25 = vsel %vm2385_vm5, %v309_v28, %v313_v9  ;;  %v2010_v2 = vcombine.low %v1483_v47, %v1486_v46  ;;  %v1455_v13 = vsel %vm2326_vm2, %v1998_v16, %v1454_v51  ;;  %v1456_v42 = vrot.slane %v1454_v51, 4  ;;  %v2729_v46 = vld [vmem:[%s2252_s25 + $0x54] sm:$0xf] }
  0x6a   : > { %v1875_v14 = vcombine.low %v304_v60, %v314_v25  ;;  %v414_v39 = vrot.slane %v412_v36, 4  ;;  %v417_v6 = vrot.slane %v415_v3, 5  ;;  %v423_v32 = vrot.slane %v421_v38, 5 }
  0x6b   : > { %v1458_v19 = vsel %vm2326_vm2, %v1456_v42, %v1457_v57  ;;  %v425_v20 = vshrl.u32 %v2667_v21, 16  ;;  %v431_v62 = vshll.u32 %v2680_v1, 16  ;;  %v316_v15 = vshrl.u32 %v2685_v58, 16 }
  0x6c   : > { %463 = vrot.lane.b32.xlu0 %v1875_v14, %s2189_s28  ;;  %1535 = vrot.lane.b32.xlu1 %v2010_v2, %s2194_s7  ;;  %v2006_v18 = vcombine.low %v1455_v13, %v1458_v19  ;;  %v418_v22 = vor.u32 %v417_v6, %v414_v39  ;;  %v319_v52 = vshll.u32 %v2685_v58, 16  ;;  %v325_v27 = vshll.u32 %v2692_v33, 16  ;;  %v2739_v13 = vld [vmem:[%s2252_s25 + $0x24] sm:$0xf] }
  0x6d   : > { %v427_v53 = vrot.slane %v425_v20, 4  ;;  %v433_v54 = vrot.slane %v431_v62, 5  ;;  %v318_v55 = vrot.slane %v316_v15, 4  ;;  %v329_v23 = vshrl.u32 %v2692_v33, 16 }
  0x6e   : > { %v419_v24 = vrot.slane %v418_v22, 4  ;;  %v321_v56 = vrot.slane %v319_v52, 5  ;;  %v327_v49 = vrot.slane %v325_v27, 5  ;;  %v335_v50 = vshll.u32 %v2699_v17, 16  ;;  %v2759_v52 = vld [vmem:[%s2252_s25 + $0x60] sm:$0xf] }
  0x6f   : > { %v428_v37 = vor.u32 %v427_v53, %v423_v32  ;;  %v331_v26 = vrot.slane %v329_v23, 4  ;;  %v1887_v59 = vrot.slane %v2603_v30, 9  ;;  %v547_v63 = vrot.slane %v2606_v31, 5  ;;  %v2762_v27 = vld [vmem:[%s2252_s25 + $0x64] sm:$0xf] }
  0x70   : > { %1527 = vrot.lane.b32.xlu0 %v2006_v18, %s2194_s7  ;;  %v424_v4 = vsel %vm2385_vm5, %v419_v24, %v423_v32  ;;  %v322_v5 = vor.u32 %v321_v56, %v318_v55  ;;  %v337_v40 = vrot.slane %v335_v50, 5  ;;  %v550_v8 = vrot.slane %v2617_v41, 5  ;;  %v2746_v32 = vld [vmem:[%s2252_s25 + $0x28] sm:$0xf]  ;;  %v2771_v24 = vld [vmem:[%s2252_s25 + $0x30] sm:$0xf] }
  0x71   : > { %v429_v9 = vrot.slane %v428_v37, 4  ;;  %v332_v10 = vor.u32 %v331_v26, %v327_v49  ;;  %v548_v29 = vsel %vm2326_vm2, %v1887_v59, %v547_v63  ;;  %v549_v34 = vrot.slane %v547_v63, 4  ;;  %v2774_v56 = vld [vmem:[%s2252_s25 + $0x34] sm:$0xf] }
  0x72   : > { %v323_v45 = vrot.slane %v322_v5, 4  ;;  %v1883_v16 = vrot.slane %v2630_v7, 9  ;;  %v519_v0 = vrot.slane %v2633_v12, 5  ;;  %v522_v43 = vrot.slane %v2639_v48, 5  ;;  %v2732_v48 = vld [vmem:[%s2252_s25 + $0x58] sm:$0xf] }
  0x73   : > { %v434_v47 = vsel %vm2385_vm5, %v429_v9, %v433_v54  ;;  %v333_v41 = vrot.slane %v332_v10, 4  ;;  %v551_v44 = vsel %vm2326_vm2, %v549_v34, %v550_v8  ;;  %v1888_v28 = vrot.slane %v2660_v11, 9 }
  0x74   : > { %v1880_v51 = vcombine.low %v424_v4, %v434_v47  ;;  %v328_v57 = vsel %vm2385_vm5, %v323_v45, %v327_v49  ;;  %v1895_v36 = vcombine.low %v548_v29, %v551_v44  ;;  %v520_v60 = vsel %vm2326_vm2, %v1883_v16, %v519_v0 }
  0x75   : > { %v338_v3 = vsel %vm2385_vm5, %v333_v41, %v337_v40  ;;  %v521_v38 = vrot.slane %v519_v0, 4  ;;  %v554_v25 = vrot.slane %v2667_v21, 5  ;;  %v557_v2 = vrot.slane %v2680_v1, 5  ;;  %v2786_v40 = vld [vmem:[%s2252_s25 + $0x5c] sm:$0x1] }
  0x76   : > { %473 = vrot.lane.b32.xlu1 %v1880_v51, %s2189_s28  ;;  %v1876_v42 = vcombine.low %v328_v57, %v338_v3  ;;  %v1884_v14 = vrot.slane %v2685_v58, 9  ;;  %v526_v39 = vrot.slane %v2692_v33, 5  ;;  %v529_v6 = vrot.slane %v2699_v17, 5 }
  0x77   : > { %v523_v19 = vsel %vm2326_vm2, %v521_v38, %v522_v43  ;;  %v555_v1 = vsel %vm2326_vm2, %v1888_v28, %v554_v25  ;;  %v556_v20 = vrot.slane %v554_v25, 4  ;;  %v1929_v62 = vcombine.low %v2729_v46, %v2732_v48  ;;  %v2797_v43 = vld [vmem:[%s2252_s25 + $0x2c] sm:$0x1] }
  0x78   : > { %465 = vrot.lane.b32.xlu0 %v1876_v42, %s2189_s28  ;;  %v1891_v15 = vcombine.low %v520_v60, %v523_v19  ;;  %v527_v17 = vsel %vm2326_vm2, %v1884_v14, %v526_v39  ;;  %v528_v18 = vrot.slane %v526_v39, 4  ;;  %v862_v22 = vshrl.u32 %v2729_v46, 16 }
  0x79   : > { %v558_v53 = vsel %vm2326_vm2, %v556_v20, %v557_v2  ;;  %v865_v54 = vshll.u32 %v2729_v46, 16  ;;  %v875_v55 = vshrl.u32 %v2732_v48, 16  ;;  %v1925_v23 = vcombine.low %v2739_v13, %v2746_v32 }
  0x7a   : > { %595 = vrot.lane.b32.xlu1 %v1895_v36, %s2188_s27  ;;  %v1896_v49 = vcombine.low %v555_v1, %v558_v53  ;;  %v530_v50 = vsel %vm2326_vm2, %v528_v18, %v529_v6  ;;  %v766_v37 = vshrl.u32 %v2739_v13, 16  ;;  %v769_v26 = vshll.u32 %v2739_v13, 16  ;;  %v2806_v6 = vld [vmem:[%s2252_s25 + $0x68] sm:$0x1] }
  0x7b   : > { %v1892_v59 = vcombine.low %v527_v17, %v530_v50  ;;  %v779_v63 = vshrl.u32 %v2746_v32, 16  ;;  %v1930_v4 = vcombine.low %v2759_v52, %v2762_v27  ;;  %v886_v5 = vshrl.u32 %v2759_v52, 16 }
  0x7c   : > { %587 = vrot.lane.b32.xlu0 %v1891_v15, %s2188_s27  ;;  %v889_v8 = vshll.u32 %v2759_v52, 16  ;;  %v899_v9 = vshrl.u32 %v2762_v27, 16  ;;  %v1926_v10 = vcombine.low %v2771_v24, %v2774_v56  ;;  %v790_v29 = vshrl.u32 %v2771_v24, 16 }
  0x7d   : > { %v793_v34 = vshll.u32 %v2771_v24, 16  ;;  %v803_v45 = vshrl.u32 %v2774_v56, 16  ;;  %v864_v16 = vrot.slane %v862_v22, 4  ;;  %v867_v0 = vrot.slane %v865_v54, 5 }
  0x7e   : > { %597 = vrot.lane.b32.xlu1 %v1896_v49, %s2188_s27  ;;  %v871_v47 = vshll.u32 %v2732_v48, 16  ;;  %v877_v41 = vrot.slane %v875_v55, 4  ;;  %v881_v44 = vshll.u32 %v2786_v40, 16  ;;  %v768_v28 = vrot.slane %v766_v37, 4 }
  0x7f   : > { %v868_v51 = vor.u32 %v867_v0, %v864_v16  ;;  %v771_v57 = vrot.slane %v769_v26, 5  ;;  %v775_v36 = vshll.u32 %v2746_v32, 16  ;;  %v781_v60 = vrot.slane %v779_v63, 4  ;;  %v2820_v16 = vld [vmem:[%s2252_s25 + $0x38] sm:$0x1] }
  0x80   : > { %589 = vrot.lane.b32.xlu0 %v1892_v59, %s2188_s27  ;;  %v873_v3 = vrot.slane %v871_v47, 5  ;;  %v883_v38 = vrot.slane %v881_v44, 5  ;;  %v785_v25 = vshll.u32 %v2797_v43, 16  ;;  %v888_v2 = vrot.slane %v886_v5, 4 }
  0x81   : > { %v869_v42 = vrot.slane %v868_v51, 4  ;;  %v772_v14 = vor.u32 %v771_v57, %v768_v28  ;;  %v777_v39 = vrot.slane %v775_v36, 5  ;;  %v891_v19 = vrot.slane %v889_v8, 5 }
  0x82   : > { %696 = vrot.lane.b32.xlu1 %v1929_v62, %s2187_s26  ;;  %v878_v1 = vor.u32 %v877_v41, %v873_v3  ;;  %v787_v20 = vrot.slane %v785_v25, 5  ;;  %v895_v15 = vshll.u32 %v2762_v27, 16  ;;  %v901_v17 = vrot.slane %v899_v9, 4 }
  0x83   : > { %v874_v18 = vsel %vm2385_vm5, %v869_v42, %v873_v3  ;;  %v773_v22 = vrot.slane %v772_v14, 4  ;;  %v782_v53 = vor.u32 %v781_v60, %v777_v39  ;;  %v892_v54 = vor.u32 %v891_v19, %v888_v2 }
  0x84   : > { %688 = vrot.lane.b32.xlu0 %v1925_v23, %s2187_s26  ;;  %v879_v55 = vrot.slane %v878_v1, 4  ;;  %v897_v49 = vrot.slane %v895_v15, 5  ;;  %v905_v50 = vshll.u32 %v2806_v6, 16  ;;  %v792_v37 = vrot.slane %v790_v29, 4 }
  0x85   : > { %v778_v62 = vsel %vm2385_vm5, %v773_v22, %v777_v39  ;;  %v783_v26 = vrot.slane %v782_v53, 4  ;;  %v893_v59 = vrot.slane %v892_v54, 4  ;;  %v795_v63 = vrot.slane %v793_v34, 5 }
  0x86   : > { %698 = vrot.lane.b32.xlu1 %v1930_v4, %s2187_s26  ;;  %v884_v5 = vsel %vm2385_vm5, %v879_v55, %v883_v38  ;;  %v902_v8 = vor.u32 %v901_v17, %v897_v49  ;;  %v907_v9 = vrot.slane %v905_v50, 5  ;;  %v799_v23 = vshll.u32 %v2774_v56, 16  ;;  %v2851_v17 = vld [vmem:[%s2252_s25 + $0x64] sm:$0xf] }
  0x87   : > { %v1937_v0 = vcombine.low %v874_v18, %v884_v5  ;;  %v788_v29 = vsel %vm2385_vm5, %v783_v26, %v787_v20  ;;  %v898_v47 = vsel %vm2385_vm5, %v893_v59, %v897_v49  ;;  %v796_v41 = vor.u32 %v795_v63, %v792_v37  ;;  %v2876_v26 = vld [vmem:[%s2252_s25 + $0x34] sm:$0xf] }
  0x88   : > { %690 = vrot.lane.b32.xlu0 %v1926_v10, %s2187_s26  ;;  %v1933_v4 = vcombine.low %v778_v62, %v788_v29  ;;  %v903_v34 = vrot.slane %v902_v8, 4  ;;  %v801_v44 = vrot.slane %v799_v23, 5  ;;  %v805_v28 = vrot.slane %v803_v45, 4  ;;  %v2873_v62 = vld [vmem:[%s2252_s25 + $0x30] sm:$0xf] }
  0x89   : > { %v797_v51 = vrot.slane %v796_v41, 4  ;;  %v809_v57 = vshll.u32 %v2820_v16, 16  ;;  %v1945_v36 = vrot.slane %v2729_v46, 9  ;;  %v1018_v60 = vrot.slane %v2732_v48, 5  ;;  %v2884_v8 = vld [vmem:[%s2252_s25 + $0x6c] sm:$0xf] }
  0x8a   : > { %945 = vrot.lane.b32.xlu1 %v1937_v0, %s2190_s29  ;;  %v908_v3 = vsel %vm2385_vm5, %v903_v34, %v907_v9  ;;  %v806_v38 = vor.u32 %v805_v28, %v801_v44  ;;  %v1021_v10 = vrot.slane %v2786_v40, 5  ;;  %v1941_v25 = vrot.slane %v2739_v13, 9  ;;  %v2844_v40 = vld [vmem:[%s2252_s25 + $0x60] sm:$0xf]  ;;  %v2853_v18 = vpop.permute.xlu1 %692  ;;  %v2887_v9 = vld [vmem:[%s2252_s25 + $0x70] sm:$0xf] }
  0x8b   : > { %v1938_v45 = vcombine.low %v898_v47, %v908_v3  ;;  %v802_v2 = vsel %vm2385_vm5, %v797_v51, %v801_v44  ;;  %v811_v42 = vrot.slane %v809_v57, 5  ;;  %v1019_v46 = vsel %vm2326_vm2, %v1945_v36, %v1018_v60  ;;  %v2864_v54 = vpop.permute.xlu0 %684  ;;  %v2894_v47 = vld [vmem:[%s2252_s25 + $0x3c] sm:$0xf]  ;;  %v2897_v41 = vld [vmem:[%s2252_s25 + $0x40] sm:$0xf] }
  0x8c   : > { %937 = vrot.lane.b32.xlu0 %v1933_v4, %s2190_s29  ;;  %v807_v48 = vrot.slane %v806_v38, 4  ;;  %v1020_v14 = vrot.slane %v1018_v60, 4  ;;  %v990_v39 = vrot.slane %v2746_v32, 5  ;;  %v993_v19 = vrot.slane %v2797_v43, 5  ;;  %v2913_v38 = vld [vmem:[%s2252_s25 + $0x68] sm:$0x1] }
  0x8d   : > { %v1946_v13 = vrot.slane %v2759_v52, 9  ;;  %v1025_v1 = vrot.slane %v2762_v27, 5  ;;  %v1028_v20 = vrot.slane %v2806_v6, 5  ;;  %v1942_v15 = vrot.slane %v2771_v24, 9 }
  0x8e   : > { %947 = vrot.lane.b32.xlu1 %v1938_v45, %s2190_s29  ;;  %v812_v32 = vsel %vm2385_vm5, %v807_v48, %v811_v42  ;;  %v1022_v52 = vsel %vm2326_vm2, %v1020_v14, %v1021_v10  ;;  %v991_v27 = vsel %vm2326_vm2, %v1941_v25, %v990_v39  ;;  %v992_v43 = vrot.slane %v990_v39, 4  ;;  %v2904_v51 = vpop.permute.xlu1 %694 }
  0x8f   : > { %v1934_v6 = vcombine.low %v802_v2, %v812_v32  ;;  %v1953_v24 = vcombine.low %v1019_v46, %v1022_v52  ;;  %v1026_v22 = vsel %vm2326_vm2, %v1946_v13, %v1025_v1  ;;  %v1027_v53 = vrot.slane %v1025_v1, 4  ;;  %v2920_v42 = vpop.permute.xlu0 %686 }
  0x90   : > { %v994_v55 = vsel %vm2326_vm2, %v992_v43, %v993_v19  ;;  %v997_v49 = vrot.slane %v2774_v56, 5  ;;  %v1000_v50 = vrot.slane %v2820_v16, 5  ;;  %v1987_v37 = vcombine.low %v2844_v40, %v2851_v17  ;;  %v2926_v19 = vld [vmem:[%s2252_s25 + $0x38] sm:$0x1] }
  0x91   : > { %939 = vrot.lane.b32.xlu0 %v1934_v6, %s2190_s29  ;;  %v1949_v59 = vcombine.low %v991_v27, %v994_v55  ;;  %v1029_v63 = vsel %vm2326_vm2, %v1027_v53, %v1028_v20  ;;  %v1333_v5 = vshrl.u32 %v2844_v40, 16  ;;  %v1336_v56 = vshll.u32 %v2844_v40, 16 }
  0x92   : > { %1066 = vrot.lane.b32.xlu1 %v1953_v24, %s2191_s30  ;;  %v1954_v16 = vcombine.low %v1026_v22, %v1029_v63  ;;  %v998_v23 = vsel %vm2326_vm2, %v1942_v15, %v997_v49  ;;  %v999_v0 = vrot.slane %v997_v49, 4  ;;  %v1346_v29 = vshrl.u32 %v2851_v17, 16  ;;  %v2937_v63 = vld [vmem:[%s2252_s25 + $0x74] sm:$0x1] }
  0x93   : > { %v1983_v4 = vcombine.low %v2873_v62, %v2876_v26  ;;  %v1237_v34 = vshrl.u32 %v2873_v62, 16  ;;  %v1240_v44 = vshll.u32 %v2873_v62, 16  ;;  %v1250_v28 = vshrl.u32 %v2876_v26, 16 }
  0x94   : > { %v1001_v57 = vsel %vm2326_vm2, %v999_v0, %v1000_v50  ;;  %v1988_v36 = vcombine.low %v2884_v8, %v2887_v9  ;;  %v1357_v60 = vshrl.u32 %v2884_v8, 16  ;;  %v1360_v3 = vshll.u32 %v2884_v8, 16 }
  0x95   : > { %1058 = vrot.lane.b32.xlu0 %v1949_v59, %s2191_s30  ;;  %v1950_v10 = vcombine.low %v998_v23, %v1001_v57  ;;  %v1370_v25 = vshrl.u32 %v2887_v9, 16  ;;  %v1984_v45 = vcombine.low %v2894_v47, %v2897_v41  ;;  %v1261_v2 = vshrl.u32 %v2894_v47, 16 }
  0x96   : > { %1068 = vrot.lane.b32.xlu1 %v1954_v16, %s2191_s30  ;;  %v1264_v46 = vshll.u32 %v2894_v47, 16  ;;  %v1274_v48 = vshrl.u32 %v2897_v41, 16  ;;  %v1335_v14 = vrot.slane %v1333_v5, 4  ;;  %v1338_v39 = vrot.slane %v1336_v56, 5  ;;  %v2933_v55 = vpop.permute.xlu1 %591 }
  0x97   : > { %v1342_v13 = vshll.u32 %v2851_v17, 16  ;;  %v1348_v1 = vrot.slane %v1346_v29, 4  ;;  %v1352_v20 = vshll.u32 %v2913_v38, 16  ;;  %v1239_v15 = vrot.slane %v1237_v34, 4  ;;  %v2940_v29 = vpop.permute.xlu0 %583 }
  0x98   : > { %v1339_v32 = vor.u32 %v1338_v39, %v1335_v14  ;;  %v1242_v52 = vrot.slane %v1240_v44, 5  ;;  %v1246_v27 = vshll.u32 %v2876_v26, 16  ;;  %v1252_v43 = vrot.slane %v1250_v28, 4 }
  0x99   : > { %1060 = vrot.lane.b32.xlu0 %v1950_v10, %s2191_s30  ;;  %v1344_v6 = vrot.slane %v1342_v13, 5  ;;  %v1354_v24 = vrot.slane %v1352_v20, 5  ;;  %v1256_v22 = vshll.u32 %v2926_v19, 16  ;;  %v1359_v53 = vrot.slane %v1357_v60, 4 }
  0x9a   : > { %1167 = vrot.lane.b32.xlu1 %v1987_v37, %s2192_s3  ;;  %v1340_v49 = vrot.slane %v1339_v32, 4  ;;  %v1243_v50 = vor.u32 %v1242_v52, %v1239_v15  ;;  %v1248_v59 = vrot.slane %v1246_v27, 5  ;;  %v1362_v5 = vrot.slane %v1360_v3, 5  ;;  %v2952_v32 = vld [vmem:[%s2252_s25 + $0x44] sm:$0x1]  ;;  %v2955_v52 = vpop.permute.xlu1 %593 }
  0x9b   : > { %v1349_v56 = vor.u32 %v1348_v1, %v1344_v6  ;;  %v1258_v16 = vrot.slane %v1256_v22, 5  ;;  %v1366_v23 = vshll.u32 %v2887_v9, 16  ;;  %v1372_v0 = vrot.slane %v1370_v25, 4 }
  0x9c   : > { %v1345_v34 = vsel %vm2385_vm5, %v1340_v49, %v1344_v6  ;;  %v1244_v44 = vrot.slane %v1243_v50, 4  ;;  %v1253_v28 = vor.u32 %v1252_v43, %v1248_v59  ;;  %v1363_v37 = vor.u32 %v1362_v5, %v1359_v53  ;;  %v2962_v53 = vpop.permute.xlu0 %585 }
  0x9d   : > { %1159 = vrot.lane.b32.xlu0 %v1983_v4, %s2192_s3  ;;  %v1350_v57 = vrot.slane %v1349_v56, 4  ;;  %v1368_v60 = vrot.slane %v1366_v23, 5  ;;  %v1376_v3 = vshll.u32 %v2937_v63, 16  ;;  %v1263_v10 = vrot.slane %v1261_v2, 4 }
  0x9e   : > { %1169 = vrot.lane.b32.xlu1 %v1988_v36, %s2192_s3  ;;  %v1249_v25 = vsel %vm2385_vm5, %v1244_v44, %v1248_v59  ;;  %v1254_v14 = vrot.slane %v1253_v28, 4  ;;  %v1364_v39 = vrot.slane %v1363_v37, 4  ;;  %v1266_v13 = vrot.slane %v1264_v46, 5 }
  0x9f   : > { %v1355_v1 = vsel %vm2385_vm5, %v1350_v57, %v1354_v24  ;;  %v1373_v20 = vor.u32 %v1372_v0, %v1368_v60  ;;  %v1378_v15 = vrot.slane %v1376_v3, 5  ;;  %v1270_v4 = vshll.u32 %v2897_v41, 16 }
  0xa0   : > { %v1995_v2 = vcombine.low %v1345_v34, %v1355_v1  ;;  %v1259_v36 = vsel %vm2385_vm5, %v1254_v14, %v1258_v16  ;;  %v1369_v27 = vsel %vm2385_vm5, %v1364_v39, %v1368_v60  ;;  %v1267_v43 = vor.u32 %v1266_v13, %v1263_v10 }
  0xa1   : > { %1161 = vrot.lane.b32.xlu0 %v1984_v45, %s2192_s3  ;;  %v1991_v46 = vcombine.low %v1249_v25, %v1259_v36  ;;  %v1374_v6 = vrot.slane %v1373_v20, 4  ;;  %v1272_v24 = vrot.slane %v1270_v4, 5  ;;  %v1276_v22 = vrot.slane %v1274_v48, 4  ;;  %v462_v57 = vpop.permute.xlu1 %461  ;;  %v2139_v4 = vld [vmem:[%s2252_s25 + $0xc] sm:$0xf] }
  0xa2   : > { %1416 = vrot.lane.b32.xlu1 %v1995_v2, %s2193_s4  ;;  %v1268_v49 = vrot.slane %v1267_v43, 4  ;;  %v1280_v50 = vshll.u32 %v2952_v32, 16  ;;  %v2003_v59 = vrot.slane %v2844_v40, 9  ;;  %v1489_v5 = vrot.slane %v2851_v17, 5  ;;  %v2140_v2 = vld [vmem:[%s2252_s25 + $0x10] sm:$0xf] }
  0xa3   : > { %v1379_v56 = vsel %vm2385_vm5, %v1374_v6, %v1378_v15  ;;  %v1277_v16 = vor.u32 %v1276_v22, %v1272_v24  ;;  %v1492_v45 = vrot.slane %v2913_v38, 5  ;;  %v1999_v23 = vrot.slane %v2873_v62, 9  ;;  %v2141_v43 = vld [vmem:[%s2252_s25] sm:$0xf] }
  0xa4   : > { %v1996_v48 = vcombine.low %v1369_v27, %v1379_v56  ;;  %v1273_v0 = vsel %vm2385_vm5, %v1268_v49, %v1272_v24  ;;  %v1282_v34 = vrot.slane %v1280_v50, 5  ;;  %v1490_v44 = vsel %vm2326_vm2, %v2003_v59, %v1489_v5  ;;  %v2143_v24 = vld [vmem:[%s2252_s25 + $0x3c] sm:$0xf]  ;;  %v2144_v22 = vld [vmem:[%s2252_s25 + $0x40] sm:$0xf] }
  0xa5   : > { %1408 = vrot.lane.b32.xlu0 %v1991_v46, %s2193_s4  ;;  %v1278_v40 = vrot.slane %v1277_v16, 4  ;;  %v1491_v17 = vrot.slane %v1489_v5, 4  ;;  %v1461_v28 = vrot.slane %v2876_v26, 5  ;;  %v1464_v37 = vrot.slane %v2926_v19, 5  ;;  %v2142_v46 = vld [vmem:[%s2252_s25 + $0x4] sm:$0xf] }
  0xa6   : > { %1418 = vrot.lane.b32.xlu1 %v1996_v48, %s2193_s4  ;;  %v2004_v62 = vrot.slane %v2884_v8, 9  ;;  %v1496_v38 = vrot.slane %v2887_v9, 5  ;;  %v1499_v60 = vrot.slane %v2937_v63, 5  ;;  %v2000_v3 = vrot.slane %v2894_v47, 9  ;;  %v460_v14 = vpop.permute.xlu0 %459  ;;  %v2145_v50 = vld [vmem:[%s2252_s25 + $0x30] sm:$0xf] }
  0xa7   : > { %v1283_v10 = vsel %vm2385_vm5, %v1278_v40, %v1282_v34  ;;  %v1493_v25 = vsel %vm2326_vm2, %v1491_v17, %v1492_v45  ;;  %v1462_v26 = vsel %vm2326_vm2, %v1999_v23, %v1461_v28  ;;  %v1463_v19 = vrot.slane %v1461_v28, 4  ;;  %v2146_v59 = vld [vmem:[%s2252_s25 + $0x34] sm:$0xf]  ;;  %v2138_v45 = vld [vmem:[%s3136_s1 + $0x10] ss:$0 sps:$4 sm:$0x33]  }
  0xa8   : > { %v1992_v39 = vcombine.low %v1273_v0, %v1283_v10  ;;  %v2011_v8 = vcombine.low %v1490_v44, %v1493_v25  ;;  %v1497_v9 = vsel %vm2326_vm2, %v2004_v62, %v1496_v38  ;;  %v1498_v63 = vrot.slane %v1496_v38, 4  ;;  %2067 = vmatprep.subr.msk.bf16.mxu0 %vm1611_vm11, %v2138_v45  ;;  %2068 = vmatprep.subr.msk.bf16.mxu1 %vm1611_vm11, %v2138_v45 }
  0xa9   : > { %v1465_v61 = vsel %vm2326_vm2, %v1463_v19, %v1464_v37  ;;  %v1468_v47 = vrot.slane %v2897_v41, 5  ;;  %v1471_v13 = vrot.slane %v2952_v32, 5  ;;  %v1866_v36 = vcombine.low %v2139_v4, %v2140_v2 }
  0xaa   : > { %1410 = vrot.lane.b32.xlu0 %v1992_v39, %s2193_s4  ;;  %1537 = vrot.lane.b32.xlu1 %v2011_v8, %s2194_s7  ;;  %v2007_v1 = vcombine.low %v1462_v26, %v1465_v61  ;;  %v1500_v20 = vsel %vm2326_vm2, %v1498_v63, %v1499_v60  ;;  %v1865_v6 = vcombine.low %v2141_v43, %v2142_v46 }
  0xab   : > { %v2012_v15 = vcombine.low %v1497_v9, %v1500_v20  ;;  %v1469_v41 = vsel %vm2326_vm2, %v2000_v3, %v1468_v47  ;;  %v1470_v32 = vrot.slane %v1468_v47, 4  ;;  %v470_v27 = vpop.permute.xlu1 %469  ;;  %v1870_v49 = vcombine.low %v2143_v24, %v2144_v22  ;;  %233 = vst.msk [vmem:[#allocation2 + $0x8] sm:$0xff] %vm231_vm6, %v1866_v36 }
  0xac   : > { %v1869_v5 = vcombine.low %v2145_v50, %v2146_v59  ;;  %485 = vst.msk [vmem:[#allocation2 + $0x8] sm:$0xff] %vm483_vm7, %v462_v57  ;;  %v1871_v35 = vcombine.low %v2603_v30, %v2606_v31  ;;  %v1867_v0 = vcombine.low %v2630_v7, %v2633_v12  ;;  %v1872_v34 = vcombine.low %v2660_v11, %v2667_v21 }
  0xad   : > { %v1472_v56 = vsel %vm2326_vm2, %v1470_v32, %v1471_v13  ;;  %v468_v16 = vpop.permute.xlu0 %467  ;;  %232 = vst.msk [vmem:[#allocation2] sm:$0xff] %vm231_vm6, %v1865_v6  ;;  %237 = vst.msk [vmem:[#allocation2 + $0x28] sm:$0xff] %vm231_vm6, %v1870_v49  ;;  %v1868_v30 = vcombine.low %v2685_v58, %v2692_v33  ;;  %v1613_v7 = vsel %vm1611_vm11, %v2138_v45, 0 }
  0xae   : > { %1529 = vrot.lane.b32.xlu0 %v2007_v1, %s2194_s7  ;;  %1539 = vrot.lane.b32.xlu1 %v2012_v15, %s2194_s7  ;;  %v2008_v23 = vcombine.low %v1469_v41, %v1472_v56  ;;  %236 = vst.msk [vmem:[#allocation2 + $0x20] sm:$0xff] %vm231_vm6, %v1869_v5  ;;  %238 = vst.msk [vmem:[#allocation2 + $0x30] sm:$0xff] %vm231_vm6, %v1871_v35 }
  0xaf   : > { %609 = vst.msk [vmem:[#allocation2 + $0x8] sm:$0xff] %vm607_vm8, %v2962_v53  ;;  %v942_v48 = vpop.permute.xlu1 %941  ;;  %2044 = vmatpush3.bf16.msra.mxu0 %v1613_v7  ;;  %2066 = vmatpush3.bf16.msra.mxu1 %v1613_v7 }
  0xb0   : > { %484 = vst.msk [vmem:[#allocation2] sm:$0xff] %vm483_vm7, %v460_v14  ;;  %489 = vst.msk [vmem:[#allocation2 + $0x28] sm:$0xff] %vm483_vm7, %v470_v27 }
  0xb1   : > { %488 = vst.msk [vmem:[#allocation2 + $0x20] sm:$0xff] %vm483_vm7, %v468_v16  ;;  %v934_v31 = vpop.permute.xlu0 %933 }
  0xb2   : > { %608 = vst.msk [vmem:[#allocation2] sm:$0xff] %vm607_vm8, %v2940_v29  ;;  %613 = vst.msk [vmem:[#allocation2 + $0x28] sm:$0xff] %vm607_vm8, %v2955_v52  ;;  %1531 = vrot.lane.b32.xlu0 %v2008_v23, %s2194_s7 }
  0xb3   : > { %612 = vst.msk [vmem:[#allocation2 + $0x20] sm:$0xff] %vm607_vm8, %v2933_v55 }
  0xb4   : > { %710 = vst.msk [vmem:[#allocation2 + $0x8] sm:$0xff] %vm708_vm9, %v2920_v42  ;;  %713 = vst.msk [vmem:[#allocation2 + $0x20] sm:$0xff] %vm708_vm9, %v2853_v18 }
  0xb5   : > { %709 = vst.msk [vmem:[#allocation2] sm:$0xff] %vm708_vm9, %v2864_v54  ;;  %714 = vst.msk [vmem:[#allocation2 + $0x28] sm:$0xff] %vm708_vm9, %v2904_v51 }
  0xb6   : > { %234 = vst.msk [vmem:[#allocation2 + $0x10] sm:$0xff] %vm231_vm6, %v1867_v0  ;;  %239 = vst.msk [vmem:[#allocation2 + $0x38] sm:$0xff] %vm231_vm6, %v1872_v34  ;;  %v944_v12 = vpop.permute.xlu1 %943 }
  0xb7   : > { %235 = vst.msk [vmem:[#allocation2 + $0x18] sm:$0xff] %vm231_vm6, %v1868_v30 }
  0xb8   : > { %962 = vst.msk [vmem:[#allocation2 + $0x20] sm:$0xff] %vm957_vm10, %v942_v48  ;;  %958 = vst.msk [vmem:[#allocation2] sm:$0xff] %vm957_vm10, %v934_v31 }
  0xb9   : > { %963 = vst.msk [vmem:[#allocation2 + $0x28] sm:$0xff] %vm957_vm10, %v944_v12  ;;  %v936_v11 = vpop.permute.xlu0 %935 }
  0xba   : > { %959 = vst.msk [vmem:[#allocation2 + $0x8] sm:$0xff] %vm957_vm10, %v936_v11  ;;  %v1063_v21 = vpop.permute.xlu1 %1062 }
  0xbb   : > { %1083 = vst.msk [vmem:[#allocation2 + $0x20] sm:$0xff] %vm1078_vm12, %v1063_v21 }
  0xbd   : > { %v1055_v58 = vpop.permute.xlu0 %1054 }
  0xbe   : > { %1079 = vst.msk [vmem:[#allocation2] sm:$0xff] %vm1078_vm12, %v1055_v58  ;;  %v1065_v33 = vpop.permute.xlu1 %1064 }
  0xbf   : > { %1084 = vst.msk [vmem:[#allocation2 + $0x28] sm:$0xff] %vm1078_vm12, %v1065_v33 }
  0xc1   : > { %v1057_v18 = vpop.permute.xlu0 %1056 }
  0xc2   : > { %1080 = vst.msk [vmem:[#allocation2 + $0x8] sm:$0xff] %vm1078_vm12, %v1057_v18  ;;  %v1164_v54 = vpop.permute.xlu1 %1163 }
  0xc3   : > { %1184 = vst.msk [vmem:[#allocation2 + $0x20] sm:$0xff] %vm1179_vm13, %v1164_v54 }
  0xc5   : > { %v1156_v51 = vpop.permute.xlu0 %1155 }
  0xc6   : > { %1180 = vst.msk [vmem:[#allocation2] sm:$0xff] %vm1179_vm13, %v1156_v51  ;;  %v1166_v42 = vpop.permute.xlu1 %1165 }
  0xc7   : > { %1185 = vst.msk [vmem:[#allocation2 + $0x28] sm:$0xff] %vm1179_vm13, %v1166_v42 }
  0xc9   : > { %v1158_v55 = vpop.permute.xlu0 %1157 }
  0xca   : > { %1181 = vst.msk [vmem:[#allocation2 + $0x8] sm:$0xff] %vm1179_vm13, %v1158_v55  ;;  %v1413_v29 = vpop.permute.xlu1 %1412 }
  0xcb   : > { %1433 = vst.msk [vmem:[#allocation2 + $0x20] sm:$0xff] %vm1428_vm14, %v1413_v29  ;;  %v2195_v29 = vmov (!%p2024_p6), 0.0  }
  0xcc   : > { %1716 = vst [vmem:[%s2247_s21] sm:$0x3] (!%p2024_p6), %v2195_v29 }
  0xcd   : > { %v1405_v52 = vpop.permute.xlu0 %1404 }
  0xce   : > { %1429 = vst.msk [vmem:[#allocation2] sm:$0xff] %vm1428_vm14, %v1405_v52  ;;  %v1415_v53 = vpop.permute.xlu1 %1414 }
  0xcf   : > { %1434 = vst.msk [vmem:[#allocation2 + $0x28] sm:$0xff] %vm1428_vm14, %v1415_v53 }
  0xd2   : > { %v1407_v44 = vpop.permute.xlu0 %1406  ;;  %v1534_v40 = vpop.permute.xlu1 %1533 }
  0xd3   : > { %1430 = vst.msk [vmem:[#allocation2 + $0x8] sm:$0xff] %vm1428_vm14, %v1407_v44 }
  0xd4   : > { %1554 = vst.msk [vmem:[#allocation2 + $0x20] sm:$0xff] %vm1549_vm15, %v1534_v40 }
  0xd6   : > { %v1526_v17 = vpop.permute.xlu0 %1525 }
  0xd7   : > { %1550 = vst.msk [vmem:[#allocation2] sm:$0xff] %vm1549_vm15, %v1526_v17 }
  0xda   : > { %v472_v28 = vpop.permute.xlu1 %471 }
  0xdb   : > { %v1562_v37 = vld [vmem:[#allocation2 + $0x20] sm:$0xff]  ;;  %490 = vst.msk [vmem:[#allocation2 + $0x30] sm:$0xff] %vm483_vm7, %v472_v28 }
  0xdc   : > { %2053 = vmatprep.mubr.msk.bf16.mxu1 %vm1586_vm0, %v1562_v37 }
  0xde   : > { %v464_v57 = vpop.permute.xlu0 %463  ;;  %v1536_v62 = vpop.permute.xlu1 %1535  ;;  %v1558_v38 = vld [vmem:[#allocation2] sm:$0xff] }
  0xdf   : > { %486 = vst.msk [vmem:[#allocation2 + $0x10] sm:$0xff] %vm483_vm7, %v464_v57  ;;  %2045 = vmatprep.mubr.msk.bf16.mxu0 %vm1586_vm0, %v1558_v38 }
  0xe0   : > { %1555 = vst.msk [vmem:[#allocation2 + $0x28] sm:$0xff] %vm1549_vm15, %v1536_v62 }
  0xe2   : > { %v1528_v60 = vpop.permute.xlu0 %1527 }
  0xe3   : > { %1551 = vst.msk [vmem:[#allocation2 + $0x8] sm:$0xff] %vm1549_vm15, %v1528_v60 }
  0xe7   : > { %v1563_v3 = vld [vmem:[#allocation2 + $0x28] sm:$0xff] }
  0xe8   : > { %2054 = vmatmul.mubr.msk.bf16.vlgmr.msra.gmra.mrb[0].mxu1 %vm1586_vm0, %v1563_v3  ;;  %v474_v10 = vpop.permute.xlu1 %473 }
  0xe9   : > { %491 = vst.msk [vmem:[#allocation2 + $0x38] sm:$0xff] %vm483_vm7, %v474_v10 }
  0xea   : > { %v466_v25 = vpop.permute.xlu0 %465  ;;  %v1559_v26 = vld [vmem:[#allocation2 + $0x8] sm:$0xff] }
  0xeb   : > { %487 = vst.msk [vmem:[#allocation2 + $0x18] sm:$0xff] %vm483_vm7, %v466_v25  ;;  %2046 = vmatmul.mubr.msk.bf16.vlgmr.msra.gmra.mrb[0].mxu0 %vm1586_vm0, %v1559_v26 }
  0xec   : > { %v596_v19 = vpop.permute.xlu1 %595 }
  0xed   : > { %614 = vst.msk [vmem:[#allocation2 + $0x30] sm:$0xff] %vm607_vm8, %v596_v19 }
  0xee   : > { %v588_v14 = vpop.permute.xlu0 %587 }
  0xef   : > { %610 = vst.msk [vmem:[#allocation2 + $0x10] sm:$0xff] %vm607_vm8, %v588_v14 }
  0xf0   : > { %v598_v39 = vpop.permute.xlu1 %597 }
  0xf1   : > { %615 = vst.msk [vmem:[#allocation2 + $0x38] sm:$0xff] %vm607_vm8, %v598_v39 }
  0xf2   : > { %v590_v8 = vpop.permute.xlu0 %589 }
  0xf3   : > { %611 = vst.msk [vmem:[#allocation2 + $0x18] sm:$0xff] %vm607_vm8, %v590_v8 }
  0xf4   : > { %v697_v9 = vpop.permute.xlu1 %696 }
  0xf5   : > { %715 = vst.msk [vmem:[#allocation2 + $0x30] sm:$0xff] %vm708_vm9, %v697_v9 }
  0xf6   : > { %v689_v63 = vpop.permute.xlu0 %688 }
  0xf7   : > { %711 = vst.msk [vmem:[#allocation2 + $0x10] sm:$0xff] %vm708_vm9, %v689_v63 }
  0xf8   : > { %v699_v61 = vpop.permute.xlu1 %698 }
  0xf9   : > { %716 = vst.msk [vmem:[#allocation2 + $0x38] sm:$0xff] %vm708_vm9, %v699_v61 }
  0xfa   : > { %v691_v47 = vpop.permute.xlu0 %690 }
  0xfb   : > { %712 = vst.msk [vmem:[#allocation2 + $0x18] sm:$0xff] %vm708_vm9, %v691_v47 }
  0xfc   : > { %v946_v13 = vpop.permute.xlu1 %945 }
  0xfd   : > { %964 = vst.msk [vmem:[#allocation2 + $0x30] sm:$0xff] %vm957_vm10, %v946_v13 }
  0xfe   : > { %v938_v1 = vpop.permute.xlu0 %937 }
  0xff   : > { %960 = vst.msk [vmem:[#allocation2 + $0x10] sm:$0xff] %vm957_vm10, %v938_v1 }
 0x100   : > { %v948_v20 = vpop.permute.xlu1 %947 }
 0x101   : > { %965 = vst.msk [vmem:[#allocation2 + $0x38] sm:$0xff] %vm957_vm10, %v948_v20 }
 0x103   : > { %v940_v15 = vpop.permute.xlu0 %939 }
 0x104   : > { %961 = vst.msk [vmem:[#allocation2 + $0x18] sm:$0xff] %vm957_vm10, %v940_v15  ;;  %v1067_v41 = vpop.permute.xlu1 %1066 }
 0x105   : > { %1085 = vst.msk [vmem:[#allocation2 + $0x30] sm:$0xff] %vm1078_vm12, %v1067_v41 }
 0x107   : > { %v1059_v32 = vpop.permute.xlu0 %1058 }
 0x108   : > { %1081 = vst.msk [vmem:[#allocation2 + $0x10] sm:$0xff] %vm1078_vm12, %v1059_v32  ;;  %v1069_v4 = vpop.permute.xlu1 %1068 }
 0x109   : > { %1086 = vst.msk [vmem:[#allocation2 + $0x38] sm:$0xff] %vm1078_vm12, %v1069_v4 }
 0x10b   : > { %v1061_v2 = vpop.permute.xlu0 %1060 }
 0x10c   : > { %1082 = vst.msk [vmem:[#allocation2 + $0x18] sm:$0xff] %vm1078_vm12, %v1061_v2  ;;  %v1168_v36 = vpop.permute.xlu1 %1167 }
 0x10d   : > { %1186 = vst.msk [vmem:[#allocation2 + $0x30] sm:$0xff] %vm1179_vm13, %v1168_v36 }
 0x10f   : > { %v1160_v27 = vpop.permute.xlu0 %1159 }
 0x110   : > { %1182 = vst.msk [vmem:[#allocation2 + $0x10] sm:$0xff] %vm1179_vm13, %v1160_v27  ;;  %v1170_v43 = vpop.permute.xlu1 %1169 }
 0x111   : > { %1187 = vst.msk [vmem:[#allocation2 + $0x38] sm:$0xff] %vm1179_vm13, %v1170_v43 }
 0x113   : > { %v1162_v46 = vpop.permute.xlu0 %1161 }
 0x114   : > { %1183 = vst.msk [vmem:[#allocation2 + $0x18] sm:$0xff] %vm1179_vm13, %v1162_v46  ;;  %v1417_v6 = vpop.permute.xlu1 %1416 }
 0x115   : > { %1435 = vst.msk [vmem:[#allocation2 + $0x30] sm:$0xff] %vm1428_vm14, %v1417_v6 }
 0x117   : > { %v1409_v24 = vpop.permute.xlu0 %1408 }
 0x118   : > { %1431 = vst.msk [vmem:[#allocation2 + $0x10] sm:$0xff] %vm1428_vm14, %v1409_v24  ;;  %v1419_v22 = vpop.permute.xlu1 %1418 }
 0x119   : > { %1436 = vst.msk [vmem:[#allocation2 + $0x38] sm:$0xff] %vm1428_vm14, %v1419_v22 }
 0x11c   : > { %v1411_v49 = vpop.permute.xlu0 %1410  ;;  %v1538_v50 = vpop.permute.xlu1 %1537 }
 0x11d   : > { %1432 = vst.msk [vmem:[#allocation2 + $0x18] sm:$0xff] %vm1428_vm14, %v1411_v49 }
 0x11e   : > { %1556 = vst.msk [vmem:[#allocation2 + $0x30] sm:$0xff] %vm1549_vm15, %v1538_v50 }
 0x120   : > { %v1530_v59 = vpop.permute.xlu0 %1529  ;;  %v1540_v5 = vpop.permute.xlu1 %1539 }
 0x121   : > { %1552 = vst.msk [vmem:[#allocation2 + $0x10] sm:$0xff] %vm1549_vm15, %v1530_v59  ;;  %1557 = vst.msk [vmem:[#allocation2 + $0x38] sm:$0xff] %vm1549_vm15, %v1540_v5 }
 0x124   : > { %v1532_v56 = vpop.permute.xlu0 %1531 }
 0x125   : > { %v1564_v16 = vld [vmem:[#allocation2 + $0x30] sm:$0xff]  ;;  %1553 = vst.msk [vmem:[#allocation2 + $0x18] sm:$0xff] %vm1549_vm15, %v1532_v56 }
 0x126   : > { %2057 = vmatprep.mubr.msk.bf16.mxu1 %vm1586_vm0, %v1564_v16 }
 0x128   : > { %v1560_v45 = vld [vmem:[#allocation2 + $0x10] sm:$0xff]  ;;  %v1565_v23 = vld [vmem:[#allocation2 + $0x38] sm:$0xff] }
 0x129   : > { %2049 = vmatprep.mubr.msk.bf16.mxu0 %vm1586_vm0, %v1560_v45  ;;  %2058 = vmatmul.mubr.msk.bf16.gmra.mrb[4].mxu1 %vm1586_vm0, %v1565_v23 }
 0x12c   : > { %v1561_v35 = vld [vmem:[#allocation2 + $0x18] sm:$0xff] }
 0x12d   : > { %2050 = vmatmul.mubr.msk.bf16.gmra.mrb[4].mxu0 %vm1586_vm0, %v1561_v35 }
 0x1bb   : > { %v2055_v48 = vpop.f32.mrb[0].mxu1 }
 0x1bc   : > { %v1681_v0 = vpop.f32.mrb[1].mxu1 }
 0x1bd   : > { %v2056_v34 = vpop.f32.mrb[2].mxu1 }
 0x1be   : > { %v1684_v30 = vpop.f32.mrb[3].mxu1  ;;  %v2047_v31 = vpop.f32.mrb[0].mxu0 }
 0x1bf   : > { %v1649_v7 = vpop.f32.mrb[1].mxu0 }
 0x1c0   : > { %v2048_v12 = vpop.f32.mrb[2].mxu0 }
 0x1c1   : > { %v1652_v11 = vpop.f32.mrb[3].mxu0 }
 0x1fc   : > { %v2059_v21 = vpop.f32.mrb[4].mxu1 }
 0x1fd   : > { %v1697_v58 = vpop.f32.mrb[5].mxu1  ;;  %1715 = sbr.rel (%p2024_p6) target bundleno = 516 (0x204), region = 32 }
 0x1fe   : > { %v2060_v33 = vpop.f32.mrb[6].mxu1 }
 0x1ff   : > { %v1700_v18 = vpop.f32.mrb[7].mxu1 }
 0x200   : > { %v2051_v54 = vpop.f32.mrb[4].mxu0 }
 0x201   : > { %v1665_v51 = vpop.f32.mrb[5].mxu0 }
 0x202   : > { %v2052_v42 = vpop.f32.mrb[6].mxu0 }
 0x203   : > { %v1668_v55 = vpop.f32.mrb[7].mxu0 }
 0x204 PF: > { %v1718_v52 = vadd.f32 %v1652_v11, %v1649_v7  ;;  %v1742_v53 = vmul.f32 %v1649_v7, %v1649_v7  ;;  %v1743_v44 = vmul.f32 %v1652_v11, %v1652_v11  ;;  %v1744_v17 = vmul.f32 %v2047_v31, %v2047_v31  ;;  %v1717_v11 = vld [vmem:[%s2247_s21] sm:$0x1] }
 0x205   : > { %v1745_v37 = vmul.f32 %v2048_v12, %v2048_v12  ;;  %v1746_v38 = vmul.f32 %v1665_v51, %v1665_v51  ;;  %v1747_v10 = vmul.f32 %v1668_v55, %v1668_v55  ;;  %v1748_v19 = vmul.f32 %v2051_v54, %v2051_v54 }
 0x206   : > { %v1719_v40 = vadd.f32 %v2047_v31, %v1718_v52  ;;  %v1758_v57 = vadd.f32 %v1743_v44, %v1742_v53  ;;  %v1749_v8 = vmul.f32 %v2052_v42, %v2052_v42  ;;  %v1750_v61 = vmul.f32 %v1681_v0, %v1681_v0 }
 0x207   : > { %v1751_v1 = vmul.f32 %v1684_v30, %v1684_v30  ;;  %v1752_v41 = vmul.f32 %v2055_v48, %v2055_v48  ;;  %v1753_v2 = vmul.f32 %v2056_v34, %v2056_v34  ;;  %v1754_v43 = vmul.f32 %v1697_v58, %v1697_v58 }
 0x208   : > { %v1720_v28 = vadd.f32 %v2048_v12, %v1719_v40  ;;  %v1759_v60 = vadd.f32 %v1758_v57, %v1744_v17  ;;  %v1755_v24 = vmul.f32 %v1700_v18, %v1700_v18  ;;  %v1756_v50 = vmul.f32 %v2059_v21, %v2059_v21 }
 0x209   : > { %v1757_v56 = vmul.f32 %v2060_v33, %v2060_v33 }
 0x20a   : > { %v1721_v62 = vadd.f32 %v1720_v28, %v1665_v51  ;;  %v1760_v25 = vadd.f32 %v1759_v60, %v1745_v37 }
 0x20c   : > { %v1722_v3 = vadd.f32 %v1721_v62, %v1668_v55  ;;  %v1761_v14 = vadd.f32 %v1760_v25, %v1746_v38 }
 0x20e   : > { %v1723_v26 = vadd.f32 %v2051_v54, %v1722_v3  ;;  %v1762_v9 = vadd.f32 %v1761_v14, %v1747_v10 }
 0x210   : > { %v1724_v39 = vadd.f32 %v2052_v42, %v1723_v26  ;;  %v1763_v47 = vadd.f32 %v1762_v9, %v1748_v19 }
 0x212   : > { %v1725_v63 = vadd.f32 %v1724_v39, %v1681_v0  ;;  %v1764_v20 = vadd.f32 %v1763_v47, %v1749_v8 }
 0x214   : > { %v1726_v13 = vadd.f32 %v1725_v63, %v1684_v30  ;;  %v1765_v32 = vadd.f32 %v1764_v20, %v1750_v61 }
 0x216   : > { %v1727_v15 = vadd.f32 %v2055_v48, %v1726_v13  ;;  %v1766_v36 = vadd.f32 %v1765_v32, %v1751_v1 }
 0x218   : > { %v1728_v4 = vadd.f32 %v2056_v34, %v1727_v15  ;;  %v1767_v46 = vadd.f32 %v1766_v36, %v1752_v41 }
 0x21a   : > { %v1729_v27 = vadd.f32 %v1728_v4, %v1697_v58  ;;  %v1768_v22 = vadd.f32 %v1767_v46, %v1753_v2 }
 0x21c   : > { %v1730_v6 = vadd.f32 %v1729_v27, %v1700_v18  ;;  %v1769_v59 = vadd.f32 %v1768_v22, %v1754_v43 }
 0x21e   : > { %v1731_v49 = vadd.f32 %v2059_v21, %v1730_v6  ;;  %v1770_v16 = vadd.f32 %v1769_v59, %v1755_v24 }
 0x220   : > { %v1732_v5 = vadd.f32 %v2060_v33, %v1731_v49  ;;  %v1771_v23 = vadd.f32 %v1770_v16, %v1756_v50  ;;  %v1741_v33 = vld [vmem:[%s2247_s21 + $0x1] sm:$0x1] }
 0x222   : > { %v1733_v45 = vrot.slane %v1732_v5, 4  ;;  %v1772_v48 = vadd.f32 %v1771_v23, %v1757_v56 }
 0x224   : > { %v1734_v35 = vadd.f32 %v1733_v45, %v1732_v5  ;;  %v1773_v34 = vrot.slane %v1772_v48, 4 }
 0x226   : > { %v1735_v0 = vrot.slane %v1734_v35, 2  ;;  %v1774_v31 = vadd.f32 %v1773_v34, %v1772_v48 }
 0x228   : > { %v1736_v30 = vadd.f32 %v1735_v0, %v1734_v35  ;;  %v1775_v12 = vrot.slane %v1774_v31, 2 }
 0x22a   : > { %v1737_v7 = vrot.slane %v1736_v30, 1  ;;  %v1776_v21 = vadd.f32 %v1775_v12, %v1774_v31 }
 0x22c   : > { %v1738_v58 = vadd.f32 %v1737_v7, %v1736_v30  ;;  %v1777_v54 = vrot.slane %v1776_v21, 1 }
 0x22e   : > { %v1739_v18 = vadd.f32 %v1738_v58, %v1717_v11  ;;  %v1778_v51 = vadd.f32 %v1777_v54, %v1776_v21 }
 0x230   : > { %1740 = vst [vmem:[%s2247_s21] sm:$0x1] %v1739_v18  ;;  %v1779_v42 = vadd.f32 %v1778_v51, %v1741_v33 }
 0x232   : > { %1780 = vst [vmem:[%s2247_s21 + $0x1] sm:$0x1] %v1779_v42 }
 0x233 PF: > { %s12_s13 = sadd.s32 1, %s2185_s13   ;;  %s3142_s9 = smov %s2177_s11 }
 0x234   : > { %p9_p7 = scmp.ge.s32.totalorder %s12_s13, 6   ;;  %s3143_s10 = smov %s2181_s12 }
 0x235   : > { %s3144_s11 = smov %s3147_s14  ;;  %s3145_s12 = smov %s3151_s15 }
 0x236   :  { %11 = sbr.rel (!%p9_p7) target bundleno = 3 (0x3), region = 65 }

// kernel: conv_block_forward.3
= control target key start
LH: loop header
LB: loop body
LE: loop exit
PB: predicated region body
PF: predicated region fallthrough
CT: control target
= control target key end

     0   :  { %s2371_s18 = smov 0   ;;  %s2373_s19 = smov 0   ;;  %s3207_s0 = inlined_call_operand.vmem [shape: bf16[2,18,18,4], index: 0, kind: input, shape index: {}]   ;;  %s3208_s1 = inlined_call_operand.vmem [shape: bf16[36,128], index: 1, kind: input, shape index: {}]   ;;  %s3209_s2 = inlined_call_operand.vmem [shape: f32[2,128], index: 2, kind: input, shape index: {}]   ;;  %s3210_s3 = inlined_call_operand.vmem [shape: f32[1,128], index: 3, kind: input, shape index: {}]   ;;  %s3211_s4 = inlined_call_operand.vmem [shape: f32[1,128], index: 4, kind: input, shape index: {}]   ;;  %s3212_s5 = inlined_call_operand.vmem [shape: f32[2,8,256], index: 5, kind: output, shape index: {}]  }
   0x1   :  { %s2375_s20 = smov 0   ;;  %s2377_s21 = smov 0  }
   0x2   :  { %s2379_s22 = smov 0  }
   0x3 LB: > { %s24_s23 = sadd.s32 1, %s2323_s20  ;;  %s27_s24 = sadd.s32 1, %s2327_s21  ;;  %s2331_s22 = sphi %s2379_s22, %s15_s22   ;;  %s2327_s21 = sphi %s2377_s21, %s3220_s21   ;;  %s2323_s20 = sphi %s2375_s20, %s3219_s20   ;;  %s2319_s19 = sphi %s2373_s19, %s3218_s19   ;;  %s2315_s18 = sphi %s2371_s18, %s3217_s18  }
   0x4   : > { %p25_p0 = scmp.ge.s32.totalorder %s24_s23, 2  ;;  %p2004_p1 = scmp.ge.s32.totalorder %s2331_s22, 1 }
   0x5   : > { %p201_p2 = scmp.lt.s32.totalorder %s2331_s22, 5 }
   0x6   : > { %s3222_s23 = smov (%p25_p0, %s24_s23), 0  ;;  %s3224_s24 = smov (!%p25_p0, %s27_s24), %s2327_s21 }
   0x7   : > { %p202_p3 = pnand %p2004_p1, %p201_p2  ;;  %p29_p4 = scmp.ge.s32.totalorder %s3224_s24, 2 }
   0x8   : > { %p232_p5 = scmp.lt.s32.totalorder (!%p202_p3), %s2319_s19, 1  ;;  %s2172_s25 = smul.u32 (!%p202_p3), 96, %s2315_s18  ;;  %vm591_vm0 = vcmask (!%p202_p3), 1042432   ;;  %vm592_vm1 = vcmask (!%p202_p3), 1046532   ;;  %vm331_vm3 = vsmask.f32 (!%p202_p3), 3328 }
   0x9   : > { %s3226_s24 = smov (%p29_p4, %s3224_s24), 0  ;;  %205 = sbr.rel (%p202_p3) target bundleno = 600 (0x258), region = 40 }
   0xa   : > { %s2333_s6 = smov (!%p202_p3), 12   ;;  %vm2469_vm2 = vmor (!%p202_p3), %vm591_vm0, %vm592_vm1  ;;  %vm332_vm4 = vsmask.f32 (!%p202_p3), 7440  ;;  %s2334_s7 = smov (!%p202_p3), 24   ;;  %vm322_vm6 = vcmask (!%p202_p3), 31744   ;;  %vm574_vm7 = vcmask (!%p202_p3), 64544  }
   0xb   : > { %s2335_s8 = smov (!%p202_p3), 20   ;;  %s2336_s9 = smov (!%p202_p3), 8   ;;  %vm2509_vm5 = vmor (!%p202_p3), %vm331_vm3, %vm332_vm4  ;;  %vm698_vm8 = vcmask (!%p202_p3), 97344   ;;  %vm799_vm9 = vcmask (!%p202_p3), 130144   ;;  %vm1048_vm10 = vcmask (!%p202_p3), 162944   ;;  %vm1702_vm11 = vcmask (!%p202_p3), 1041408  }
   0xc   : > { %s2337_s10 = smov (!%p202_p3), 4   ;;  %s2338_s11 = smov (!%p202_p3), 16   ;;  %vm1169_vm12 = vcmask (!%p202_p3), 195744   ;;  %vm1270_vm13 = vcmask (!%p202_p3), 228544   ;;  %vm1519_vm14 = vcmask (!%p202_p3), 261344   ;;  %vm1640_vm15 = vcmask (!%p202_p3), 294144  }
   0xd   : > { %s2339_s16 = smov (!%p202_p3), 28   ;;  %s2340_s17 = smov (!%p202_p3), 32   ;;  %vm1677_vm0 = vcmask (!%p202_p3), 293888  }
   0xe   : > { %p239_p6 = scmp.lt.s32.totalorder (!%p202_p3), %s2315_s18, 1 }
  0x10   : > { %s3228_s19 = smov (!%p232_p5, %s2319_s19), 1  ;;  %s3230_s18 = smov (!%p239_p6, %s2315_s18), 1 }
  0x11   : > { %s2214_s26 = smul.u32 216, %s3228_s19 }
  0x13   : > { %s236_s29 = scalar_lea.vmem %s3207_s0, %s2214_s26 }
  0x14   : > { %s2410_s30 = scalar_lea.vmem %s236_s29, %s2172_s25 }
  0x15   : > { %v2413_v0 = vld [vmem:[%s2410_s30 + $0x18] sm:$0xf]  ;;  %v2416_v1 = vld [vmem:[%s2410_s30 + $0x1c] sm:$0xf]  ;;  %v2045_v2 = vld [vmem:[%s2410_s30 + $0xc] sm:$0xf] }
  0x16   : > { %v2070_v3 = vcombine.low %v2413_v0, %v2416_v1  ;;  %v833_v4 = vshrl.u32 %v2413_v0, 16  ;;  %v836_v5 = vshll.u32 %v2413_v0, 16  ;;  %v842_v6 = vshll.u32 %v2416_v1, 16  ;;  %v2425_v7 = vld [vmem:[%s2410_s30 + $0x10] sm:$0xf] }
  0x17   : > { %v846_v8 = vshrl.u32 %v2416_v1, 16  ;;  %v2069_v9 = vcombine.low %v2045_v2, %v2425_v7  ;;  %v809_v10 = vshrl.u32 %v2045_v2, 16  ;;  %v812_v11 = vshll.u32 %v2045_v2, 16  ;;  %v2430_v12 = vld [vmem:[%s2410_s30 + $0x24] sm:$0xf] }
  0x18   : > { %v2432_v13 = vrot.slane %v833_v4, 4  ;;  %v2434_v14 = vrot.slane %v836_v5, 5  ;;  %777 = vrot.lane.b32.xlu1 %v2070_v3, %s2333_s6  ;;  %v818_v15 = vshll.u32 %v2425_v7, 16  ;;  %v822_v16 = vshrl.u32 %v2425_v7, 16  ;;  %v2440_v17 = vld [vmem:[%s2410_s30 + $0x28] sm:$0xf] }
  0x19   : > { %v2442_v18 = vrot.slane %v846_v8, 4  ;;  %v2444_v19 = vrot.slane %v809_v10, 4  ;;  %v2446_v20 = vrot.slane %v812_v11, 5  ;;  %775 = vrot.lane.b32.xlu0 %v2069_v9, %s2333_s6  ;;  %v2128_v21 = vcombine.low %v2430_v12, %v2440_v17  ;;  %v2452_v22 = vld [vmem:[%s2410_s30 + $0x18] sm:$0xf] }
  0x1a   : > { %v2454_v23 = vrot.slane %v822_v16, 4  ;;  %v1304_v24 = vshrl.u32 %v2430_v12, 16  ;;  %v1307_v25 = vshll.u32 %v2430_v12, 16  ;;  %v1317_v26 = vshrl.u32 %v2440_v17, 16  ;;  %v2460_v27 = vld [vmem:[%s2410_s30 + $0x1c] sm:$0xf] }
  0x1b   : > { %v2127_v28 = vcombine.low %v2452_v22, %v2460_v27  ;;  %v1280_v29 = vshrl.u32 %v2452_v22, 16  ;;  %v1283_v30 = vshll.u32 %v2452_v22, 16  ;;  %v1293_v31 = vshrl.u32 %v2460_v27, 16  ;;  %v2474_v33 = vld [vmem:[%s2410_s30 + $0x14] sm:$0x1] }
  0x1c   : > { %1248 = vrot.lane.b32.xlu1 %v2128_v21, %s2334_s7  ;;  %v2085_v34 = vrot.slane %v2045_v2, 9  ;;  %v1067_v35 = vrot.slane %v2425_v7, 5  ;;  %v1070_v36 = vrot.slane %v2474_v33, 5  ;;  %v250_v37 = vld [vmem:[%s2410_s30] sm:$0xf]  ;;  %v2086_v38 = vrot.slane %v2413_v0, 9 }
  0x1d   : > { %1246 = vrot.lane.b32.xlu0 %v2127_v28, %s2334_s7  ;;  %v251_v39 = vld [vmem:[%s2410_s30 + $0x4] sm:$0xf]  ;;  %v252_v40 = vld [vmem:[%s2410_s30 + $0x8] sm:$0x1]  ;;  %v2027_v41 = vrot.slane %v250_v37, 9  ;;  %v335_v42 = vshrl.u32 %v250_v37, 16  ;;  %v839_v52 = vor.u32 %v2434_v14, %v2432_v13  ;;  %v815_v53 = vor.u32 %v2446_v20, %v2444_v19 }
  0x1e   : > { %v1068_v43 = vsel %vm2469_vm2, %v2085_v34, %v1067_v35  ;;  %v1069_v44 = vrot.slane %v1067_v35, 4  ;;  %v596_v45 = vrot.slane %v251_v39, 5  ;;  %v599_v46 = vrot.slane %v252_v40, 5  ;;  %v253_v47 = vld [vmem:[%s2410_s30 + $0xc] sm:$0xf] }
  0x1f   : > { %v254_v48 = vld [vmem:[%s2410_s30 + $0x10] sm:$0xf]  ;;  %v255_v49 = vld [vmem:[%s2410_s30 + $0x14] sm:$0x1]  ;;  %v2028_v50 = vrot.slane %v253_v47, 9  ;;  %v337_v51 = vrot.slane %v335_v42, 4 }
  0x20   : > { %v1071_v54 = vsel %vm2469_vm2, %v1069_v44, %v1070_v36  ;;  %v597_v55 = vsel %vm2469_vm2, %v2027_v41, %v596_v45  ;;  %v598_v56 = vrot.slane %v596_v45, 4  ;;  %v603_v57 = vrot.slane %v254_v48, 5  ;;  %v2050_v62 = vld [vmem:[%s2410_s30 + $0x20] sm:$0x1]  ;;  %v2287_v28 = vld [vmem:[%s2410_s30 + $0xc] sm:$0xf] }
  0x21   : > { %v2093_v58 = vcombine.low %v1068_v43, %v1071_v54  ;;  %v606_v59 = vrot.slane %v255_v49, 5  ;;  %v338_v60 = vshll.u32 %v250_v37, 16  ;;  %v344_v61 = vshll.u32 %v251_v39, 16 }
  0x22   : > { %v600_v63 = vsel %vm2469_vm2, %v598_v56, %v599_v46  ;;  %v604_v0 = vsel %vm2469_vm2, %v2028_v50, %v603_v57  ;;  %v605_v2 = vrot.slane %v603_v57, 4  ;;  %v348_v3 = vshrl.u32 %v251_v39, 16 }
  0x23   : > { %1145 = vrot.lane.b32.xlu0 %v2093_v58, %s2335_s8  ;;  %v2035_v4 = vcombine.low %v597_v55, %v600_v63  ;;  %v340_v5 = vrot.slane %v338_v60, 5  ;;  %v346_v8 = vrot.slane %v344_v61, 5  ;;  %v354_v9 = vshll.u32 %v252_v40, 16 }
  0x24   : > { %v607_v10 = vsel %vm2469_vm2, %v605_v2, %v606_v59  ;;  %v350_v11 = vrot.slane %v348_v3, 4  ;;  %v1074_v13 = vrot.slane %v2416_v1, 5  ;;  %v1077_v14 = vrot.slane %v2050_v62, 5 }
  0x25   : > { %674 = vrot.lane.b32.xlu1 %v2035_v4, %s2336_s9  ;;  %v2036_v16 = vcombine.low %v604_v0, %v607_v10  ;;  %v341_v19 = vor.u32 %v340_v5, %v337_v51  ;;  %v356_v20 = vrot.slane %v354_v9, 5  ;;  %v359_v21 = vshrl.u32 %v253_v47, 16 }
  0x26   : > { %v351_v34 = vor.u32 %v350_v11, %v346_v8  ;;  %v1075_v35 = vsel %vm2469_vm2, %v2086_v38, %v1074_v13  ;;  %v1076_v36 = vrot.slane %v1074_v13, 4  ;;  %v362_v37 = vshll.u32 %v253_v47, 16 }
  0x27   : > { %v342_v39 = vrot.slane %v341_v19, 4  ;;  %v361_v40 = vrot.slane %v359_v21, 4  ;;  %v368_v41 = vshll.u32 %v254_v48, 16  ;;  %v372_v42 = vshrl.u32 %v254_v48, 16 }
  0x28   : > { %v352_v43 = vrot.slane %v351_v34, 4  ;;  %v1078_v44 = vsel %vm2469_vm2, %v1076_v36, %v1077_v14  ;;  %v364_v45 = vrot.slane %v362_v37, 5  ;;  %v378_v46 = vshll.u32 %v255_v49, 16 }
  0x29   : > { %676 = vrot.lane.b32.xlu1 %v2036_v16, %s2336_s9  ;;  %v347_v50 = vsel %vm2509_vm5, %v342_v39, %v346_v8  ;;  %v2094_v51 = vcombine.low %v1075_v35, %v1078_v44  ;;  %v370_v54 = vrot.slane %v368_v41, 5  ;;  %v374_v38 = vrot.slane %v372_v42, 4  ;;  %v2550_v16 = vld [vmem:[%s2410_s30 + $0x2c] sm:$0x1]  ;;  %v2565_v41 = vld [vmem:[%s2410_s30 + $0x18] sm:$0xf] }
  0x2a   : > { %v357_v47 = vsel %vm2509_vm5, %v352_v43, %v356_v20  ;;  %v365_v55 = vor.u32 %v364_v45, %v361_v40  ;;  %v380_v56 = vrot.slane %v378_v46, 5  ;;  %v840_v48 = vrot.slane %v839_v52, 4  ;;  %v2572_v45 = vld [vmem:[%s2410_s30 + $0x1c] sm:$0xf]  ;;  %v2280_v46 = vld [vmem:[%s3208_s1] sm:$0xff]  }
  0x2b   : > { %v2019_v57 = vcombine.low %v347_v50, %v357_v47  ;;  %v375_v58 = vor.u32 %v374_v38, %v370_v54  ;;  %v844_v59 = vrot.slane %v842_v6, 5  ;;  %v852_v49 = vshll.u32 %v2050_v62, 16  ;;  %v2105_v62 = vld [vmem:[%s2410_s30 + $0x20] sm:$0x1]  ;;  %2184 = vmatprep.subr.bf16.mxu0 %v2280_v46  ;;  %2206 = vmatprep.subr.bf16.mxu1 %v2280_v46 }
  0x2c   : > { %v366_v60 = vrot.slane %v365_v55, 4  ;;  %v816_v61 = vrot.slane %v815_v53, 4  ;;  %v820_v63 = vrot.slane %v818_v15, 5  ;;  %v828_v0 = vshll.u32 %v2474_v33, 16  ;;  %2185 = vmatpush3.bf16.msra.mxu0 %v2280_v46  ;;  %2209 = vmatpush3.bf16.msra.mxu1 %v2280_v46 }
  0x2d   : > { %550 = vrot.lane.b32.xlu0 %v2019_v57, %s2337_s10  ;;  %1147 = vrot.lane.b32.xlu1 %v2094_v51, %s2335_s8  ;;  %v376_v52 = vrot.slane %v375_v58, 4  ;;  %v845_v2 = vsel %vm2509_vm5, %v840_v48, %v844_v59  ;;  %v849_v1 = vor.u32 %v2442_v18, %v844_v59  ;;  %v854_v6 = vrot.slane %v852_v49, 5  ;;  %v2586_v48 = vld [vmem:[%s2410_s30 + $0x20] sm:$0x1] }
  0x2e   : > { %v371_v53 = vsel %vm2509_vm5, %v366_v60, %v370_v54  ;;  %v821_v7 = vsel %vm2509_vm5, %v816_v61, %v820_v63  ;;  %v825_v15 = vor.u32 %v2454_v23, %v820_v63  ;;  %v830_v33 = vrot.slane %v828_v0, 5 }
  0x2f   : > { %v381_v3 = vsel %vm2509_vm5, %v376_v52, %v380_v56  ;;  %v850_v4 = vrot.slane %v849_v1, 4  ;;  %v1282_v5 = vrot.slane %v1280_v29, 4  ;;  %v1285_v18 = vrot.slane %v1283_v30, 5  ;;  %v259_v1 = vld [vmem:[%s2410_s30 + $0x24] sm:$0xf] }
  0x30   : > { %v2020_v8 = vcombine.low %v371_v53, %v381_v3  ;;  %v826_v9 = vrot.slane %v825_v15, 4  ;;  %v1289_v10 = vshll.u32 %v2460_v27, 16  ;;  %v1295_v11 = vrot.slane %v1293_v31, 4 }
  0x31   : > { %v855_v23 = vsel %vm2509_vm5, %v850_v4, %v854_v6  ;;  %v1286_v13 = vor.u32 %v1285_v18, %v1282_v5  ;;  %v1299_v14 = vshll.u32 %v2105_v62, 16  ;;  %v1306_v29 = vrot.slane %v1304_v24, 4  ;;  %v2281_v6 = vld [vmem:[%s3208_s1 + $0x8] sm:$0xff]  }
  0x32   : > { %552 = vrot.lane.b32.xlu0 %v2020_v8, %s2337_s10  ;;  %v2078_v30 = vcombine.low %v845_v2, %v855_v23  ;;  %v831_v19 = vsel %vm2509_vm5, %v826_v9, %v830_v33  ;;  %v1291_v20 = vrot.slane %v1289_v10, 5  ;;  %v1309_v31 = vrot.slane %v1307_v25, 5  ;;  %v261_v8 = vld [vmem:[%s2410_s30 + $0x2c] sm:$0x1]  ;;  %2186 = vmatprep.subr.bf16.mxu0 %v2281_v6 }
  0x33   : > { %v2077_v21 = vcombine.low %v821_v7, %v831_v19  ;;  %v1287_v34 = vrot.slane %v1286_v13, 4  ;;  %v1301_v35 = vrot.slane %v1299_v14, 5  ;;  %v1313_v36 = vshll.u32 %v2440_v17, 16  ;;  %2207 = vmatprep.subr.bf16.mxu1 %v2281_v6  ;;  %2187 = vmatpush3.bf16.msra.mxu0 %v2281_v6 }
  0x34   : > { %1026 = vrot.lane.b32.xlu1 %v2078_v30, %s2338_s11  ;;  %v1296_v24 = vor.u32 %v1295_v11, %v1291_v20  ;;  %v1310_v37 = vor.u32 %v1309_v31, %v1306_v29  ;;  %v1319_v39 = vrot.slane %v1317_v26, 4  ;;  %v1323_v40 = vshll.u32 %v2550_v16, 16  ;;  %2210 = vmatpush3.bf16.msra.mxu1 %v2281_v6 }
  0x35   : > { %v1292_v25 = vsel %vm2509_vm5, %v1287_v34, %v1291_v20  ;;  %v1315_v42 = vrot.slane %v1313_v36, 5  ;;  %v2143_v43 = vrot.slane %v2452_v22, 9  ;;  %v1538_v44 = vrot.slane %v2460_v27, 5 }
  0x36   : > { %1024 = vrot.lane.b32.xlu0 %v2077_v21, %s2338_s11  ;;  %v1297_v26 = vrot.slane %v1296_v24, 4  ;;  %v1311_v50 = vrot.slane %v1310_v37, 4  ;;  %v1325_v51 = vrot.slane %v1323_v40, 5  ;;  %v1541_v54 = vrot.slane %v2105_v62, 5  ;;  %v260_v62 = vld [vmem:[%s2410_s30 + $0x28] sm:$0xf] }
  0x37   : > { %v1320_v38 = vor.u32 %v1319_v39, %v1315_v42  ;;  %v1539_v47 = vsel %vm2469_vm2, %v2143_v43, %v1538_v44  ;;  %v1540_v22 = vrot.slane %v1538_v44, 4  ;;  %v383_v27 = vshrl.u32 %v2565_v41, 16 }
  0x38   : > { %v1302_v55 = vsel %vm2509_vm5, %v1297_v26, %v1301_v35  ;;  %v1316_v56 = vsel %vm2509_vm5, %v1311_v50, %v1315_v42  ;;  %v386_v57 = vshll.u32 %v2565_v41, 16  ;;  %v392_v58 = vshll.u32 %v2572_v45, 16  ;;  %v2051_v50 = vld [vmem:[%s2410_s30 + $0x24] sm:$0xf] }
  0x39   : > { %v2135_v59 = vcombine.low %v1292_v25, %v1302_v55  ;;  %v1321_v49 = vrot.slane %v1320_v38, 4  ;;  %v1542_v60 = vsel %vm2469_vm2, %v1540_v22, %v1541_v54  ;;  %v385_v61 = vrot.slane %v383_v27, 4 }
  0x3a   : > { %v2151_v63 = vcombine.low %v1539_v47, %v1542_v60  ;;  %v388_v0 = vrot.slane %v386_v57, 5  ;;  %v394_v52 = vrot.slane %v392_v58, 5  ;;  %v396_v2 = vshrl.u32 %v2572_v45, 16  ;;  %v2052_v47 = vld [vmem:[%s2410_s30 + $0x28] sm:$0xf] }
  0x3b   : > { %1495 = vrot.lane.b32.xlu0 %v2135_v59, %s2339_s16  ;;  %v1326_v53 = vsel %vm2509_vm5, %v1321_v49, %v1325_v51  ;;  %v402_v7 = vshll.u32 %v2586_v48, 16  ;;  %v2144_v15 = vrot.slane %v2430_v12, 9  ;;  %v1545_v33 = vrot.slane %v2440_v17, 5  ;;  %v2055_v49 = vld [vmem:[%s2410_s30 + $0x34] sm:$0xf] }
  0x3c   : > { %v2136_v3 = vcombine.low %v1316_v56, %v1326_v53  ;;  %v389_v4 = vor.u32 %v388_v0, %v385_v61  ;;  %v398_v5 = vrot.slane %v396_v2, 4  ;;  %v1548_v18 = vrot.slane %v2550_v16, 5  ;;  %v2628_v56 = vld [vmem:[%s2410_s30 + $0x30] sm:$0xf] }
  0x3d   : > { %v404_v9 = vrot.slane %v402_v7, 5  ;;  %v1546_v10 = vsel %vm2469_vm2, %v2144_v15, %v1545_v33  ;;  %v1547_v11 = vrot.slane %v1545_v33, 4  ;;  %v407_v23 = vshrl.u32 %v259_v1, 16 }
  0x3e   : > { %1497 = vrot.lane.b32.xlu1 %v2136_v3, %s2339_s16  ;;  %v390_v12 = vrot.slane %v389_v4, 4  ;;  %v399_v17 = vor.u32 %v398_v5, %v394_v52  ;;  %v410_v13 = vshll.u32 %v259_v1, 16  ;;  %v416_v14 = vshll.u32 %v260_v62, 16  ;;  %v2056_v3 = vld [vmem:[%s2410_s30 + $0x38] sm:$0x1] }
  0x3f   : > { %1616 = vrot.lane.b32.xlu0 %v2151_v63, %s2340_s17  ;;  %v1549_v16 = vsel %vm2469_vm2, %v1547_v11, %v1548_v18  ;;  %v409_v29 = vrot.slane %v407_v23, 4  ;;  %v420_v30 = vshrl.u32 %v260_v62, 16  ;;  %v426_v19 = vshll.u32 %v261_v8, 16 }
  0x40   : > { %v395_v20 = vsel %vm2509_vm5, %v390_v12, %v394_v52  ;;  %v400_v31 = vrot.slane %v399_v17, 4  ;;  %v2152_v21 = vcombine.low %v1546_v10, %v1549_v16  ;;  %v412_v34 = vrot.slane %v410_v13, 5  ;;  %v2053_v52 = vld [vmem:[%s2410_s30 + $0x2c] sm:$0x1] }
  0x41   : > { %v418_v35 = vrot.slane %v416_v14, 5  ;;  %v422_v36 = vrot.slane %v420_v30, 4  ;;  %v428_v24 = vrot.slane %v426_v19, 5  ;;  %v2029_v37 = vrot.slane %v2565_v41, 9 }
  0x42   : > { %v405_v39 = vsel %vm2509_vm5, %v400_v31, %v404_v9  ;;  %v413_v40 = vor.u32 %v412_v34, %v409_v29  ;;  %v610_v25 = vrot.slane %v2572_v45, 5  ;;  %v613_v42 = vrot.slane %v2586_v48, 5 }
  0x43   : > { %v2021_v43 = vcombine.low %v395_v20, %v405_v39  ;;  %1618 = vrot.lane.b32.xlu0 %v2152_v21, %s2340_s17  ;;  %v423_v44 = vor.u32 %v422_v36, %v418_v35  ;;  %v2030_v46 = vrot.slane %v259_v1, 9  ;;  %v617_v26 = vrot.slane %v260_v62, 5 }
  0x44   : > { %v414_v51 = vrot.slane %v413_v40, 4  ;;  %v611_v41 = vsel %vm2469_vm2, %v2029_v37, %v610_v25  ;;  %v612_v54 = vrot.slane %v610_v25, 4  ;;  %v620_v38 = vrot.slane %v261_v8, 5 }
  0x45   : > { %554 = vrot.lane.b32.xlu1 %v2021_v43, %s2337_s10  ;;  %v424_v45 = vrot.slane %v423_v44, 4  ;;  %v618_v22 = vsel %vm2469_vm2, %v2030_v46, %v617_v26  ;;  %v619_v27 = vrot.slane %v617_v26, 4  ;;  %v2071_v55 = vcombine.low %v2051_v50, %v2052_v47  ;;  %v2110_v44 = vld [vmem:[%s2410_s30 + $0x34] sm:$0xf] }
  0x46   : > { %v419_v48 = vsel %vm2509_vm5, %v414_v51, %v418_v35  ;;  %v614_v57 = vsel %vm2469_vm2, %v612_v54, %v613_v42  ;;  %v857_v58 = vshrl.u32 %v2051_v50, 16  ;;  %v860_v59 = vshll.u32 %v2051_v50, 16  ;;  %v2650_v35 = vld [vmem:[%s2410_s30 + $0x30] sm:$0xf] }
  0x47   : > { %v429_v60 = vsel %vm2509_vm5, %v424_v45, %v428_v24  ;;  %v2037_v61 = vcombine.low %v611_v41, %v614_v57  ;;  %v621_v63 = vsel %vm2469_vm2, %v619_v27, %v620_v38  ;;  %v870_v0 = vshrl.u32 %v2052_v47, 16  ;;  %v2669_v45 = vld [vmem:[%s2410_s30 + $0x3c] sm:$0xf] }
  0x48   : > { %v2022_v2 = vcombine.low %v419_v48, %v429_v60  ;;  %v2038_v1 = vcombine.low %v618_v22, %v621_v63  ;;  %v2072_v6 = vcombine.low %v2628_v56, %v2055_v49  ;;  %v881_v53 = vshrl.u32 %v2628_v56, 16  ;;  %v2672_v22 = vld [vmem:[%s2410_s30 + $0x40] sm:$0xf]  ;;  %v2111_v60 = vld [vmem:[%s2410_s30 + $0x38] sm:$0x1] }
  0x49   : > { %678 = vrot.lane.b32.xlu0 %v2037_v61, %s2336_s9  ;;  %v884_v7 = vshll.u32 %v2628_v56, 16  ;;  %v894_v15 = vshrl.u32 %v2055_v49, 16  ;;  %v859_v33 = vrot.slane %v857_v58, 4  ;;  %v862_v62 = vrot.slane %v860_v59, 5 }
  0x4a   : > { %556 = vrot.lane.b32.xlu1 %v2022_v2, %s2337_s10  ;;  %v866_v4 = vshll.u32 %v2052_v47, 16  ;;  %v872_v5 = vrot.slane %v870_v0, 4  ;;  %v876_v18 = vshll.u32 %v2053_v52, 16  ;;  %v883_v8 = vrot.slane %v881_v53, 4  ;;  %v2687_v2 = vld [vmem:[%s2410_s30 + $0x44] sm:$0x1] }
  0x4b   : > { %v863_v9 = vor.u32 %v862_v62, %v859_v33  ;;  %v886_v10 = vrot.slane %v884_v7, 5  ;;  %v890_v11 = vshll.u32 %v2055_v49, 16  ;;  %v896_v23 = vrot.slane %v894_v15, 4 }
  0x4c   : > { %v868_v12 = vrot.slane %v866_v4, 5  ;;  %v878_v17 = vrot.slane %v876_v18, 5  ;;  %v900_v13 = vshll.u32 %v2056_v3, 16  ;;  %v2087_v14 = vrot.slane %v2051_v50, 9 }
  0x4d   : > { %779 = vrot.lane.b32.xlu0 %v2071_v55, %s2333_s6  ;;  %v864_v16 = vrot.slane %v863_v9, 4  ;;  %v887_v29 = vor.u32 %v886_v10, %v883_v8  ;;  %v892_v30 = vrot.slane %v890_v11, 5  ;;  %v1081_v19 = vrot.slane %v2052_v47, 5  ;;  %v2693_v9 = vld [vmem:[%s2410_s30 + $0x30] sm:$0xf] }
  0x4e   : > { %680 = vrot.lane.b32.xlu1 %v2038_v1, %s2336_s9  ;;  %v873_v20 = vor.u32 %v872_v5, %v868_v12  ;;  %v902_v31 = vrot.slane %v900_v13, 5  ;;  %v1084_v21 = vrot.slane %v2053_v52, 5  ;;  %v2088_v34 = vrot.slane %v2628_v56, 9 }
  0x4f   : > { %v869_v36 = vsel %vm2509_vm5, %v864_v16, %v868_v12  ;;  %v888_v24 = vrot.slane %v887_v29, 4  ;;  %v897_v37 = vor.u32 %v896_v23, %v892_v30  ;;  %v1082_v39 = vsel %vm2469_vm2, %v2087_v14, %v1081_v19 }
  0x50   : > { %v874_v40 = vrot.slane %v873_v20, 4  ;;  %v1083_v25 = vrot.slane %v1081_v19, 4  ;;  %v1088_v42 = vrot.slane %v2055_v49, 5  ;;  %v1091_v43 = vrot.slane %v2056_v3, 5  ;;  %v2699_v20 = vld [vmem:[%s2410_s30 + $0x34] sm:$0xf] }
  0x51   : > { %v893_v46 = vsel %vm2509_vm5, %v888_v24, %v892_v30  ;;  %v898_v26 = vrot.slane %v897_v37, 4  ;;  %v2129_v50 = vcombine.low %v2650_v35, %v2110_v44  ;;  %v1328_v51 = vshrl.u32 %v2650_v35, 16 }
  0x52   : > { %781 = vrot.lane.b32.xlu1 %v2072_v6, %s2333_s6  ;;  %v879_v41 = vsel %vm2509_vm5, %v874_v40, %v878_v17  ;;  %v1085_v54 = vsel %vm2469_vm2, %v1083_v25, %v1084_v21  ;;  %v1089_v38 = vsel %vm2469_vm2, %v2088_v34, %v1088_v42  ;;  %v1090_v47 = vrot.slane %v1088_v42, 4 }
  0x53   : > { %v2079_v27 = vcombine.low %v869_v36, %v879_v41  ;;  %v903_v55 = vsel %vm2509_vm5, %v898_v26, %v902_v31  ;;  %v2095_v56 = vcombine.low %v1082_v39, %v1085_v54  ;;  %v1331_v48 = vshll.u32 %v2650_v35, 16  ;;  %v2710_v39 = vld [vmem:[%s2410_s30 + $0x38] sm:$0x1]  ;;  %v2723_v54 = vld [vmem:[%s2410_s30 + $0x3c] sm:$0xf] }
  0x54   : > { %v2080_v57 = vcombine.low %v893_v46, %v903_v55  ;;  %v1092_v58 = vsel %vm2469_vm2, %v1090_v47, %v1091_v43  ;;  %v1341_v59 = vshrl.u32 %v2110_v44, 16  ;;  %v2130_v49 = vcombine.low %v2669_v45, %v2672_v22 }
  0x55   : > { %1028 = vrot.lane.b32.xlu0 %v2079_v27, %s2338_s11  ;;  %v2096_v61 = vcombine.low %v1089_v38, %v1092_v58  ;;  %v1352_v63 = vshrl.u32 %v2669_v45, 16  ;;  %v1355_v0 = vshll.u32 %v2669_v45, 16  ;;  %v1365_v52 = vshrl.u32 %v2672_v22, 16 }
  0x56   : > { %1030 = vrot.lane.b32.xlu1 %v2080_v57, %s2338_s11  ;;  %v1330_v1 = vrot.slane %v1328_v51, 4  ;;  %v1333_v6 = vrot.slane %v1331_v48, 5  ;;  %v1337_v53 = vshll.u32 %v2110_v44, 16  ;;  %v1343_v7 = vrot.slane %v1341_v59, 4 }
  0x57   : > { %v1347_v15 = vshll.u32 %v2111_v60, 16  ;;  %v1354_v33 = vrot.slane %v1352_v63, 4  ;;  %v1357_v62 = vrot.slane %v1355_v0, 5  ;;  %v1361_v3 = vshll.u32 %v2672_v22, 16 }
  0x58   : > { %v1334_v4 = vor.u32 %v1333_v6, %v1330_v1  ;;  %v1339_v5 = vrot.slane %v1337_v53, 5  ;;  %v1367_v18 = vrot.slane %v1365_v52, 4  ;;  %v1371_v8 = vshll.u32 %v2687_v2, 16 }
  0x59   : > { %1149 = vrot.lane.b32.xlu0 %v2095_v56, %s2335_s8  ;;  %v1349_v10 = vrot.slane %v1347_v15, 5  ;;  %v1358_v11 = vor.u32 %v1357_v62, %v1354_v33  ;;  %v1363_v23 = vrot.slane %v1361_v3, 5  ;;  %v2145_v12 = vrot.slane %v2650_v35, 9  ;;  %v2727_v56 = vld [vmem:[%s2410_s30 + $0x40] sm:$0xf] }
  0x5a   : > { %1151 = vrot.lane.b32.xlu1 %v2096_v61, %s2335_s8  ;;  %v1335_v17 = vrot.slane %v1334_v4, 4  ;;  %v1344_v13 = vor.u32 %v1343_v7, %v1339_v5  ;;  %v1373_v14 = vrot.slane %v1371_v8, 5  ;;  %v1552_v16 = vrot.slane %v2110_v44, 5  ;;  %v267_v61 = vld [vmem:[%s2410_s30 + $0x44] sm:$0x1] }
  0x5b   : > { %v1359_v29 = vrot.slane %v1358_v11, 4  ;;  %v1368_v30 = vor.u32 %v1367_v18, %v1363_v23  ;;  %v1555_v19 = vrot.slane %v2111_v60, 5  ;;  %v431_v31 = vshrl.u32 %v2693_v9, 16 }
  0x5c   : > { %v1340_v21 = vsel %vm2509_vm5, %v1335_v17, %v1339_v5  ;;  %v1345_v34 = vrot.slane %v1344_v13, 4  ;;  %v1553_v35 = vsel %vm2469_vm2, %v2145_v12, %v1552_v16  ;;  %v1554_v36 = vrot.slane %v1552_v16, 4  ;;  %v2751_v17 = vld [vmem:[%s2410_s30 + $0x3c] sm:$0xf] }
  0x5d   : > { %1250 = vrot.lane.b32.xlu0 %v2129_v50, %s2334_s7  ;;  %v1364_v24 = vsel %vm2509_vm5, %v1359_v29, %v1363_v23  ;;  %v1369_v37 = vrot.slane %v1368_v30, 4  ;;  %v433_v40 = vrot.slane %v431_v31, 4  ;;  %v434_v25 = vshll.u32 %v2693_v9, 16 }
  0x5e   : > { %1252 = vrot.lane.b32.xlu1 %v2130_v49, %s2334_s7  ;;  %v1350_v42 = vsel %vm2509_vm5, %v1345_v34, %v1349_v10  ;;  %v1556_v43 = vsel %vm2469_vm2, %v1554_v36, %v1555_v19  ;;  %v440_v44 = vshll.u32 %v2699_v20, 16  ;;  %v444_v46 = vshrl.u32 %v2699_v20, 16  ;;  %v2058_v34 = vld [vmem:[%s2410_s30 + $0x40] sm:$0xf] }
  0x5f   : > { %v2137_v26 = vcombine.low %v1340_v21, %v1350_v42  ;;  %v1374_v50 = vsel %vm2509_vm5, %v1369_v37, %v1373_v14  ;;  %v2153_v51 = vcombine.low %v1553_v35, %v1556_v43  ;;  %v436_v41 = vrot.slane %v434_v25, 5 }
  0x60   : > { %v2138_v38 = vcombine.low %v1364_v24, %v1374_v50  ;;  %v442_v47 = vrot.slane %v440_v44, 5  ;;  %v446_v27 = vrot.slane %v444_v46, 4  ;;  %v450_v55 = vshll.u32 %v2710_v39, 16  ;;  %v2061_v44 = vld [vmem:[%s2410_s30 + $0x4c] sm:$0xf] }
  0x61   : > { %1499 = vrot.lane.b32.xlu0 %v2137_v26, %s2339_s16  ;;  %v437_v48 = vor.u32 %v436_v41, %v433_v40  ;;  %v2146_v57 = vrot.slane %v2669_v45, 9  ;;  %v1559_v58 = vrot.slane %v2672_v22, 5  ;;  %v1562_v59 = vrot.slane %v2687_v2, 5  ;;  %v2059_v41 = vld [vmem:[%s2410_s30 + $0x44] sm:$0x1] }
  0x62   : > { %1501 = vrot.lane.b32.xlu1 %v2138_v38, %s2339_s16  ;;  %v447_v49 = vor.u32 %v446_v27, %v442_v47  ;;  %v452_v60 = vrot.slane %v450_v55, 5  ;;  %v455_v63 = vshrl.u32 %v2723_v54, 16  ;;  %v458_v0 = vshll.u32 %v2723_v54, 16 }
  0x63   : > { %v438_v52 = vrot.slane %v437_v48, 4  ;;  %v1560_v1 = vsel %vm2469_vm2, %v2146_v57, %v1559_v58  ;;  %v1561_v6 = vrot.slane %v1559_v58, 4  ;;  %v464_v45 = vshll.u32 %v2727_v56, 16 }
  0x64   : > { %v448_v53 = vrot.slane %v447_v49, 4  ;;  %v457_v22 = vrot.slane %v455_v63, 4  ;;  %v460_v2 = vrot.slane %v458_v0, 5  ;;  %v468_v7 = vshrl.u32 %v2727_v56, 16  ;;  %v2062_v49 = vld [vmem:[%s2410_s30 + $0x50] sm:$0x1] }
  0x65   : > { %1620 = vrot.lane.b32.xlu0 %v2153_v51, %s2340_s17  ;;  %v443_v15 = vsel %vm2509_vm5, %v438_v52, %v442_v47  ;;  %v1563_v33 = vsel %vm2469_vm2, %v1561_v6, %v1562_v59  ;;  %v466_v62 = vrot.slane %v464_v45, 5  ;;  %v474_v3 = vshll.u32 %v267_v61, 16 }
  0x66   : > { %v453_v4 = vsel %vm2509_vm5, %v448_v53, %v452_v60  ;;  %v2154_v5 = vcombine.low %v1560_v1, %v1563_v33  ;;  %v461_v18 = vor.u32 %v460_v2, %v457_v22  ;;  %v470_v8 = vrot.slane %v468_v7, 4 }
  0x67   : > { %v2023_v10 = vcombine.low %v443_v15, %v453_v4  ;;  %v476_v11 = vrot.slane %v474_v3, 5  ;;  %v2031_v23 = vrot.slane %v2693_v9, 9  ;;  %v624_v12 = vrot.slane %v2699_v20, 5 }
  0x68   : > { %v462_v13 = vrot.slane %v461_v18, 4  ;;  %v471_v14 = vor.u32 %v470_v8, %v466_v62  ;;  %v627_v16 = vrot.slane %v2710_v39, 5  ;;  %v2032_v29 = vrot.slane %v2723_v54, 9  ;;  %v2766_v39 = vld [vmem:[%s2410_s30 + $0x48] sm:$0xf] }
  0x69   : > { %558 = vrot.lane.b32.xlu1 %v2023_v10, %s2337_s10  ;;  %1622 = vrot.lane.b32.xlu0 %v2154_v5, %s2340_s17  ;;  %v625_v30 = vsel %vm2469_vm2, %v2031_v23, %v624_v12  ;;  %v626_v19 = vrot.slane %v624_v12, 4  ;;  %v631_v31 = vrot.slane %v2727_v56, 5  ;;  %v634_v21 = vrot.slane %v267_v61, 5  ;;  %v2790_v10 = vld [vmem:[%s2410_s30 + $0x48] sm:$0xf] }
  0x6a   : > { %v467_v35 = vsel %vm2509_vm5, %v462_v13, %v466_v62  ;;  %v472_v36 = vrot.slane %v471_v14, 4  ;;  %v2073_v24 = vcombine.low %v2751_v17, %v2058_v34  ;;  %v905_v37 = vshrl.u32 %v2751_v17, 16 }
  0x6b   : > { %v628_v40 = vsel %vm2469_vm2, %v626_v19, %v627_v16  ;;  %v632_v25 = vsel %vm2469_vm2, %v2032_v29, %v631_v31  ;;  %v633_v42 = vrot.slane %v631_v31, 4  ;;  %v908_v43 = vshll.u32 %v2751_v17, 16 }
  0x6c   : > { %v477_v46 = vsel %vm2509_vm5, %v472_v36, %v476_v11  ;;  %v2039_v26 = vcombine.low %v625_v30, %v628_v40  ;;  %v918_v50 = vshrl.u32 %v2058_v34, 16  ;;  %v2074_v51 = vcombine.low %v2766_v39, %v2061_v44  ;;  %v2116_v30 = vld [vmem:[%s2410_s30 + $0x4c] sm:$0xf]  ;;  %v2812_v40 = vld [vmem:[%s2410_s30 + $0x58] sm:$0xf] }
  0x6d   : > { %v2024_v38 = vcombine.low %v467_v35, %v477_v46  ;;  %v635_v47 = vsel %vm2469_vm2, %v633_v42, %v634_v21  ;;  %v929_v27 = vshrl.u32 %v2766_v39, 16  ;;  %v932_v55 = vshll.u32 %v2766_v39, 16 }
  0x6e   : > { %682 = vrot.lane.b32.xlu0 %v2039_v26, %s2336_s9  ;;  %v2040_v48 = vcombine.low %v632_v25, %v635_v47  ;;  %v942_v57 = vshrl.u32 %v2061_v44, 16  ;;  %v907_v58 = vrot.slane %v905_v37, 4  ;;  %v910_v59 = vrot.slane %v908_v43, 5 }
  0x6f   : > { %560 = vrot.lane.b32.xlu1 %v2024_v38, %s2337_s10  ;;  %v914_v60 = vshll.u32 %v2058_v34, 16  ;;  %v920_v61 = vrot.slane %v918_v50, 4  ;;  %v924_v63 = vshll.u32 %v2059_v41, 16  ;;  %v931_v0 = vrot.slane %v929_v27, 4 }
  0x70   : > { %v911_v52 = vor.u32 %v910_v59, %v907_v58  ;;  %v934_v1 = vrot.slane %v932_v55, 5  ;;  %v938_v6 = vshll.u32 %v2061_v44, 16  ;;  %v944_v45 = vrot.slane %v942_v57, 4 }
  0x71   : > { %v916_v53 = vrot.slane %v914_v60, 5  ;;  %v926_v22 = vrot.slane %v924_v63, 5  ;;  %v948_v2 = vshll.u32 %v2062_v49, 16  ;;  %v2089_v7 = vrot.slane %v2751_v17, 9 }
  0x72   : > { %783 = vrot.lane.b32.xlu0 %v2073_v24, %s2333_s6  ;;  %v912_v15 = vrot.slane %v911_v52, 4  ;;  %v935_v33 = vor.u32 %v934_v1, %v931_v0  ;;  %v940_v62 = vrot.slane %v938_v6, 5  ;;  %v1095_v3 = vrot.slane %v2058_v34, 5 }
  0x73   : > { %684 = vrot.lane.b32.xlu1 %v2040_v48, %s2336_s9  ;;  %v921_v4 = vor.u32 %v920_v61, %v916_v53  ;;  %v950_v5 = vrot.slane %v948_v2, 5  ;;  %v1098_v18 = vrot.slane %v2059_v41, 5  ;;  %v2090_v8 = vrot.slane %v2766_v39, 9  ;;  %v2809_v39 = vld [vmem:[%s2410_s30 + $0x54] sm:$0xf] }
  0x74   : > { %v917_v11 = vsel %vm2509_vm5, %v912_v15, %v916_v53  ;;  %v936_v23 = vrot.slane %v935_v33, 4  ;;  %v945_v12 = vor.u32 %v944_v45, %v940_v62  ;;  %v1096_v17 = vsel %vm2469_vm2, %v2089_v7, %v1095_v3  ;;  %v2117_v41 = vld [vmem:[%s2410_s30 + $0x50] sm:$0x1]  ;;  %v2827_v48 = vld [vmem:[%s2410_s30 + $0x5c] sm:$0x1] }
  0x75   : > { %v922_v13 = vrot.slane %v921_v4, 4  ;;  %v1097_v14 = vrot.slane %v1095_v3, 4  ;;  %v1102_v16 = vrot.slane %v2061_v44, 5  ;;  %v1105_v29 = vrot.slane %v2062_v49, 5  ;;  %v2833_v53 = vld [vmem:[%s2410_s30 + $0x48] sm:$0xf] }
  0x76   : > { %v941_v19 = vsel %vm2509_vm5, %v936_v23, %v940_v62  ;;  %v946_v31 = vrot.slane %v945_v12, 4  ;;  %v2131_v21 = vcombine.low %v2790_v10, %v2116_v30  ;;  %v1376_v34 = vshrl.u32 %v2790_v10, 16 }
  0x77   : > { %785 = vrot.lane.b32.xlu1 %v2074_v51, %s2333_s6  ;;  %v927_v35 = vsel %vm2509_vm5, %v922_v13, %v926_v22  ;;  %v1099_v36 = vsel %vm2469_vm2, %v1097_v14, %v1098_v18  ;;  %v1103_v24 = vsel %vm2469_vm2, %v2090_v8, %v1102_v16  ;;  %v1104_v37 = vrot.slane %v1102_v16, 4 }
  0x78   : > { %v2081_v25 = vcombine.low %v917_v11, %v927_v35  ;;  %v951_v42 = vsel %vm2509_vm5, %v946_v31, %v950_v5  ;;  %v2097_v43 = vcombine.low %v1096_v17, %v1099_v36  ;;  %v1379_v44 = vshll.u32 %v2790_v10, 16  ;;  %v2839_v11 = vld [vmem:[%s2410_s30 + $0x4c] sm:$0xf] }
  0x79   : > { %v2082_v46 = vcombine.low %v941_v19, %v951_v42  ;;  %v1106_v26 = vsel %vm2469_vm2, %v1104_v37, %v1105_v29  ;;  %v1389_v50 = vshrl.u32 %v2116_v30, 16  ;;  %v2132_v51 = vcombine.low %v2809_v39, %v2812_v40  ;;  %v2850_v29 = vld [vmem:[%s2410_s30 + $0x50] sm:$0x1]  ;;  %v2863_v42 = vld [vmem:[%s2410_s30 + $0x54] sm:$0xf] }
  0x7a   : > { %1032 = vrot.lane.b32.xlu0 %v2081_v25, %s2338_s11  ;;  %v2098_v38 = vcombine.low %v1103_v24, %v1106_v26  ;;  %v1400_v47 = vshrl.u32 %v2809_v39, 16  ;;  %v1403_v27 = vshll.u32 %v2809_v39, 16  ;;  %v1413_v55 = vshrl.u32 %v2812_v40, 16 }
  0x7b   : > { %1034 = vrot.lane.b32.xlu1 %v2082_v46, %s2338_s11  ;;  %v1378_v57 = vrot.slane %v1376_v34, 4  ;;  %v1381_v58 = vrot.slane %v1379_v44, 5  ;;  %v1385_v59 = vshll.u32 %v2116_v30, 16  ;;  %v1391_v49 = vrot.slane %v1389_v50, 4  ;;  %v2867_v50 = vld [vmem:[%s2410_s30 + $0x58] sm:$0xf] }
  0x7c   : > { %v1395_v60 = vshll.u32 %v2117_v41, 16  ;;  %v1402_v61 = vrot.slane %v1400_v47, 4  ;;  %v1405_v63 = vrot.slane %v1403_v27, 5  ;;  %v1409_v0 = vshll.u32 %v2812_v40, 16 }
  0x7d   : > { %v1382_v52 = vor.u32 %v1381_v58, %v1378_v57  ;;  %v1387_v1 = vrot.slane %v1385_v59, 5  ;;  %v1415_v6 = vrot.slane %v1413_v55, 4  ;;  %v1419_v45 = vshll.u32 %v2827_v48, 16  ;;  %v273_v57 = vld [vmem:[%s2410_s30 + $0x5c] sm:$0x1] }
  0x7e   : > { %1153 = vrot.lane.b32.xlu0 %v2097_v43, %s2335_s8  ;;  %v1397_v22 = vrot.slane %v1395_v60, 5  ;;  %v1406_v2 = vor.u32 %v1405_v63, %v1402_v61  ;;  %v1411_v7 = vrot.slane %v1409_v0, 5  ;;  %v2147_v15 = vrot.slane %v2790_v10, 9 }
  0x7f   : > { %1155 = vrot.lane.b32.xlu1 %v2098_v38, %s2335_s8  ;;  %v1383_v33 = vrot.slane %v1382_v52, 4  ;;  %v1392_v62 = vor.u32 %v1391_v49, %v1387_v1  ;;  %v1421_v3 = vrot.slane %v1419_v45, 5  ;;  %v1566_v4 = vrot.slane %v2116_v30, 5 }
  0x80   : > { %v1407_v5 = vrot.slane %v1406_v2, 4  ;;  %v1416_v18 = vor.u32 %v1415_v6, %v1411_v7  ;;  %v1569_v8 = vrot.slane %v2117_v41, 5  ;;  %v479_v23 = vshrl.u32 %v2833_v53, 16 }
  0x81   : > { %v1388_v12 = vsel %vm2509_vm5, %v1383_v33, %v1387_v1  ;;  %v1393_v17 = vrot.slane %v1392_v62, 4  ;;  %v1567_v10 = vsel %vm2469_vm2, %v2147_v15, %v1566_v4  ;;  %v1568_v13 = vrot.slane %v1566_v4, 4 }
  0x82   : > { %1254 = vrot.lane.b32.xlu0 %v2131_v21, %s2334_s7  ;;  %v1412_v14 = vsel %vm2509_vm5, %v1407_v5, %v1411_v7  ;;  %v1417_v16 = vrot.slane %v1416_v18, 4  ;;  %v481_v30 = vrot.slane %v479_v23, 4  ;;  %v482_v19 = vshll.u32 %v2833_v53, 16  ;;  %v2891_v5 = vld [vmem:[%s2410_s30 + $0x54] sm:$0xf] }
  0x83   : > { %1256 = vrot.lane.b32.xlu1 %v2132_v51, %s2334_s7  ;;  %v1398_v31 = vsel %vm2509_vm5, %v1393_v17, %v1397_v22  ;;  %v1570_v34 = vsel %vm2469_vm2, %v1568_v13, %v1569_v8  ;;  %v488_v21 = vshll.u32 %v2839_v11, 16  ;;  %v492_v35 = vshrl.u32 %v2839_v11, 16 }
  0x84   : > { %v2139_v36 = vcombine.low %v1388_v12, %v1398_v31  ;;  %v1422_v24 = vsel %vm2509_vm5, %v1417_v16, %v1421_v3  ;;  %v2155_v37 = vcombine.low %v1567_v10, %v1570_v34  ;;  %v484_v25 = vrot.slane %v482_v19, 5 }
  0x85   : > { %v2140_v43 = vcombine.low %v1412_v14, %v1422_v24  ;;  %v490_v44 = vrot.slane %v488_v21, 5  ;;  %v494_v46 = vrot.slane %v492_v35, 4  ;;  %v498_v26 = vshll.u32 %v2850_v29, 16  ;;  %v2911_v21 = vld [vmem:[%s2410_s30 + $0x60] sm:$0xf] }
  0x86   : > { %1503 = vrot.lane.b32.xlu0 %v2139_v36, %s2339_s16  ;;  %v485_v51 = vor.u32 %v484_v25, %v481_v30  ;;  %v2148_v41 = vrot.slane %v2809_v39, 9  ;;  %v1573_v38 = vrot.slane %v2812_v40, 5  ;;  %v1576_v47 = vrot.slane %v2827_v48, 5  ;;  %v2067_v25 = vld [vmem:[%s2410_s30 + $0x64] sm:$0xf] }
  0x87   : > { %1505 = vrot.lane.b32.xlu1 %v2140_v43, %s2339_s16  ;;  %v495_v27 = vor.u32 %v494_v46, %v490_v44  ;;  %v500_v55 = vrot.slane %v498_v26, 5  ;;  %v503_v58 = vshrl.u32 %v2863_v42, 16  ;;  %v506_v59 = vshll.u32 %v2863_v42, 16 }
  0x88   : > { %v486_v49 = vrot.slane %v485_v51, 4  ;;  %v1574_v60 = vsel %vm2469_vm2, %v2148_v41, %v1573_v38  ;;  %v1575_v61 = vrot.slane %v1573_v38, 4  ;;  %v512_v39 = vshll.u32 %v2867_v50, 16  ;;  %v2065_v51 = vld [vmem:[%s2410_s30 + $0x5c] sm:$0x1] }
  0x89   : > { %v496_v63 = vrot.slane %v495_v27, 4  ;;  %v505_v40 = vrot.slane %v503_v58, 4  ;;  %v508_v48 = vrot.slane %v506_v59, 5  ;;  %v516_v0 = vshrl.u32 %v2867_v50, 16 }
  0x8a   : > { %1624 = vrot.lane.b32.xlu0 %v2155_v37, %s2340_s17  ;;  %v491_v52 = vsel %vm2509_vm5, %v486_v49, %v490_v44  ;;  %v1577_v1 = vsel %vm2469_vm2, %v1575_v61, %v1576_v47  ;;  %v514_v6 = vrot.slane %v512_v39, 5  ;;  %v522_v45 = vshll.u32 %v273_v57, 16  ;;  %v2895_v17 = vpop.permute.xlu1 %777  ;;  %v2068_v49 = vld [vmem:[%s2410_s30 + $0x68] sm:$0x1] }
  0x8b   : > { %v501_v22 = vsel %vm2509_vm5, %v496_v63, %v500_v55  ;;  %v2156_v2 = vcombine.low %v1574_v60, %v1577_v1  ;;  %v509_v7 = vor.u32 %v508_v48, %v505_v40  ;;  %v518_v15 = vrot.slane %v516_v0, 4  ;;  %v2897_v10 = vpop.permute.xlu0 %775 }
  0x8c   : > { %v2025_v33 = vcombine.low %v491_v52, %v501_v22  ;;  %v524_v62 = vrot.slane %v522_v45, 5  ;;  %v2033_v3 = vrot.slane %v2833_v53, 9  ;;  %v638_v4 = vrot.slane %v2839_v11, 5 }
  0x8d   : > { %v510_v18 = vrot.slane %v509_v7, 4  ;;  %v519_v8 = vor.u32 %v518_v15, %v514_v6  ;;  %v641_v23 = vrot.slane %v2850_v29, 5  ;;  %v2034_v12 = vrot.slane %v2863_v42, 9  ;;  %v2905_v29 = vld [vmem:[%s2410_s30 + $0x58] sm:$0xf] }
  0x8e   : > { %562 = vrot.lane.b32.xlu1 %v2025_v33, %s2337_s10  ;;  %1626 = vrot.lane.b32.xlu0 %v2156_v2, %s2340_s17  ;;  %v639_v13 = vsel %vm2469_vm2, %v2033_v3, %v638_v4  ;;  %v640_v14 = vrot.slane %v638_v4, 4  ;;  %v645_v16 = vrot.slane %v2867_v50, 5  ;;  %v648_v30 = vrot.slane %v273_v57, 5  ;;  %v2931_v60 = vpop.permute.xlu1 %1248 }
  0x8f   : > { %v515_v19 = vsel %vm2509_vm5, %v510_v18, %v514_v6  ;;  %v520_v31 = vrot.slane %v519_v8, 4  ;;  %v953_v34 = vshrl.u32 %v2891_v5, 16  ;;  %v956_v37 = vshll.u32 %v2891_v5, 16  ;;  %v2933_v61 = vpop.permute.xlu0 %1246 }
  0x90   : > { %v642_v35 = vsel %vm2469_vm2, %v640_v14, %v641_v23  ;;  %v646_v36 = vsel %vm2469_vm2, %v2034_v12, %v645_v16  ;;  %v647_v24 = vrot.slane %v645_v16, 4  ;;  %v2075_v46 = vcombine.low %v2891_v5, %v2905_v29  ;;  %v2944_v12 = vld [vmem:[%s2410_s30 + $0x60] sm:$0xf] }
  0x91   : > { %v525_v43 = vsel %vm2509_vm5, %v520_v31, %v524_v62  ;;  %v2041_v44 = vcombine.low %v639_v13, %v642_v35  ;;  %v966_v26 = vshrl.u32 %v2905_v29, 16  ;;  %v977_v47 = vshrl.u32 %v2911_v21, 16 }
  0x92   : > { %v2026_v41 = vcombine.low %v515_v19, %v525_v43  ;;  %v649_v38 = vsel %vm2469_vm2, %v647_v24, %v648_v30  ;;  %v980_v27 = vshll.u32 %v2911_v21, 16  ;;  %v990_v57 = vshrl.u32 %v2067_v25, 16 }
  0x93   : > { %686 = vrot.lane.b32.xlu0 %v2041_v44, %s2336_s9  ;;  %v2042_v55 = vcombine.low %v646_v36, %v649_v38  ;;  %v955_v58 = vrot.slane %v953_v34, 4  ;;  %v958_v59 = vrot.slane %v956_v37, 5  ;;  %v962_v39 = vshll.u32 %v2905_v29, 16  ;;  %v2957_v37 = vld [vmem:[%s2410_s30 + $0x64] sm:$0xf] }
  0x94   : > { %564 = vrot.lane.b32.xlu1 %v2026_v41, %s2337_s10  ;;  %v968_v63 = vrot.slane %v966_v26, 4  ;;  %v972_v40 = vshll.u32 %v2065_v51, 16  ;;  %v979_v48 = vrot.slane %v977_v47, 4  ;;  %v982_v52 = vrot.slane %v980_v27, 5  ;;  %v2971_v41 = vld [vmem:[%s2410_s30 + $0x70] sm:$0xf] }
  0x95   : > { %v959_v0 = vor.u32 %v958_v59, %v955_v58  ;;  %v986_v1 = vshll.u32 %v2067_v25, 16  ;;  %v992_v6 = vrot.slane %v990_v57, 4  ;;  %v2076_v45 = vcombine.low %v2911_v21, %v2067_v25  ;;  %v2948_v30 = vpop.permute.xlu0 %1145  ;;  %s2006_s10 = sshll.u32 %s3228_s19, 1 }
  0x96   : > { %v964_v22 = vrot.slane %v962_v39, 5  ;;  %v996_v2 = vshll.u32 %v2068_v49, 16  ;;  %v2091_v7 = vrot.slane %v2891_v5, 9  ;;  %v983_v33 = vor.u32 %v982_v52, %v979_v48  ;;  %v2123_v39 = vld [vmem:[%s2410_s30 + $0x68] sm:$0x1] }
  0x97   : > { %787 = vrot.lane.b32.xlu0 %v2075_v46, %s2333_s6  ;;  %v960_v15 = vrot.slane %v959_v0, 4  ;;  %v988_v62 = vrot.slane %v986_v1, 5  ;;  %v1109_v3 = vrot.slane %v2905_v29, 5  ;;  %v974_v18 = vrot.slane %v972_v40, 5  ;;  %v2950_v29 = vpop.permute.xlu1 %674  ;;  %v2987_v52 = vld [vmem:[%s2410_s30 + $0x74] sm:$0x1] }
  0x98   : > { %688 = vrot.lane.b32.xlu1 %v2042_v55, %s2336_s9  ;;  %v969_v4 = vor.u32 %v968_v63, %v964_v22  ;;  %v1112_v8 = vrot.slane %v2065_v51, 5  ;;  %v2092_v23 = vrot.slane %v2911_v21, 9  ;;  %v984_v13 = vrot.slane %v983_v33, 4  ;;  %v2968_v51 = vld [vmem:[%s2410_s30 + $0x6c] sm:$0xf] }
  0x99   : > { %v965_v5 = vsel %vm2509_vm5, %v960_v15, %v964_v22  ;;  %v993_v14 = vor.u32 %v992_v6, %v988_v62  ;;  %v998_v16 = vrot.slane %v996_v2, 5  ;;  %v1111_v31 = vrot.slane %v1109_v3, 4 }
  0x9a   : > { %v970_v19 = vrot.slane %v969_v4, 4  ;;  %v1116_v34 = vrot.slane %v2067_v25, 5  ;;  %v1119_v35 = vrot.slane %v2068_v49, 5  ;;  %v989_v21 = vsel %vm2509_vm5, %v984_v13, %v988_v62 }
  0x9b   : > { %v994_v36 = vrot.slane %v993_v14, 4  ;;  %v1110_v24 = vsel %vm2469_vm2, %v2091_v7, %v1109_v3  ;;  %v1424_v43 = vshrl.u32 %v2944_v12, 16  ;;  %v1113_v25 = vsel %vm2469_vm2, %v1111_v31, %v1112_v8  ;;  %v2989_v1 = vpop.permute.xlu1 %676 }
  0x9c   : > { %789 = vrot.lane.b32.xlu1 %v2076_v45, %s2333_s6  ;;  %v975_v44 = vsel %vm2509_vm5, %v970_v19, %v974_v18  ;;  %v1117_v46 = vsel %vm2469_vm2, %v2092_v23, %v1116_v34  ;;  %v1118_v26 = vrot.slane %v1116_v34, 4  ;;  %v2133_v27 = vcombine.low %v2944_v12, %v2957_v37 }
  0x9d   : > { %v2083_v38 = vcombine.low %v965_v5, %v975_v44  ;;  %v999_v47 = vsel %vm2509_vm5, %v994_v36, %v998_v16  ;;  %v1427_v55 = vshll.u32 %v2944_v12, 16  ;;  %v2099_v58 = vcombine.low %v1110_v24, %v1113_v25 }
  0x9e   : > { %v2084_v57 = vcombine.low %v989_v21, %v999_v47  ;;  %v1120_v59 = vsel %vm2469_vm2, %v1118_v26, %v1119_v35  ;;  %v1437_v49 = vshrl.u32 %v2957_v37, 16  ;;  %v1448_v40 = vshrl.u32 %v2968_v51, 16 }
  0x9f   : > { %1036 = vrot.lane.b32.xlu0 %v2083_v38, %s2338_s11  ;;  %v2100_v63 = vcombine.low %v1117_v46, %v1120_v59  ;;  %v1451_v48 = vshll.u32 %v2968_v51, 16  ;;  %v1461_v0 = vshrl.u32 %v2971_v41, 16  ;;  %v2991_v6 = vpop.permute.xlu0 %550  ;;  %v1426_v45 = vrot.slane %v1424_v43, 4  ;;  %v3003_v25 = vpop.permute.xlu1 %1147 }
  0xa0   : > { %1038 = vrot.lane.b32.xlu1 %v2084_v57, %s2338_s11  ;;  %v1429_v22 = vrot.slane %v1427_v55, 5  ;;  %v1433_v2 = vshll.u32 %v2957_v37, 16  ;;  %v1439_v7 = vrot.slane %v1437_v49, 4  ;;  %v1443_v15 = vshll.u32 %v2123_v39, 16  ;;  %s242_s11 = sadd.s32 %s2006_s10, %s3230_s18 }
  0xa1   : > { %v1450_v33 = vrot.slane %v1448_v40, 4  ;;  %v1453_v62 = vrot.slane %v1451_v48, 5  ;;  %v1457_v3 = vshll.u32 %v2971_v41, 16  ;;  %v1463_v8 = vrot.slane %v1461_v0, 4  ;;  %v2285_v48 = vld [vmem:[%s2410_s30] sm:$0xf] }
  0xa2   : > { %v1430_v4 = vor.u32 %v1429_v22, %v1426_v45  ;;  %v1435_v18 = vrot.slane %v1433_v2, 5  ;;  %v1467_v23 = vshll.u32 %v2987_v52, 16  ;;  %v2134_v5 = vcombine.low %v2968_v51, %v2971_v41  ;;  %v2286_v0 = vld [vmem:[%s2410_s30 + $0x4] sm:$0xf]  ;;  %v2288_v2 = vld [vmem:[%s2410_s30 + $0x10] sm:$0xf] }
  0xa3   : > { %1157 = vrot.lane.b32.xlu0 %v2099_v58, %s2335_s8  ;;  %v1445_v13 = vrot.slane %v1443_v15, 5  ;;  %v1454_v14 = vor.u32 %v1453_v62, %v1450_v33  ;;  %v1459_v16 = vrot.slane %v1457_v3, 5  ;;  %v2149_v34 = vrot.slane %v2944_v12, 9  ;;  %s2007_s12 = sshll.u32 %s242_s11, 3 }
  0xa4   : > { %1159 = vrot.lane.b32.xlu1 %v2100_v63, %s2335_s8  ;;  %v1431_v19 = vrot.slane %v1430_v4, 4  ;;  %v1440_v31 = vor.u32 %v1439_v7, %v1435_v18  ;;  %v1580_v35 = vrot.slane %v2957_v37, 5  ;;  %v553_v21 = vpop.permute.xlu0 %552  ;;  %v1469_v43 = vrot.slane %v1467_v23, 5  ;;  %v2289_v4 = vld [vmem:[%s2410_s30 + $0x18] sm:$0xf]  ;;  %s244_s15 = scalar_lea.vmem %s3212_s5, %s2007_s12 }
  0xa5   : > { %v1455_v36 = vrot.slane %v1454_v14, 4  ;;  %v1464_v24 = vor.u32 %v1463_v8, %v1459_v16  ;;  %v1583_v44 = vrot.slane %v2123_v39, 5  ;;  %v2150_v47 = vrot.slane %v2968_v51, 9  ;;  %v2291_v23 = vld [vmem:[%s2410_s30 + $0x24] sm:$0xf] }
  0xa6   : > { %v1436_v46 = vsel %vm2509_vm5, %v1431_v19, %v1435_v18  ;;  %v1441_v26 = vrot.slane %v1440_v31, 4  ;;  %v1582_v38 = vrot.slane %v1580_v35, 4  ;;  %v1587_v55 = vrot.slane %v2971_v41, 5  ;;  %v1027_v15 = vpop.permute.xlu1 %1026  ;;  %v2290_v18 = vld [vmem:[%s2410_s30 + $0x1c] sm:$0xf] }
  0xa7   : > { %1258 = vrot.lane.b32.xlu0 %v2133_v27, %s2334_s7  ;;  %v1460_v12 = vsel %vm2509_vm5, %v1455_v36, %v1459_v16  ;;  %v1465_v37 = vrot.slane %v1464_v24, 4  ;;  %v1581_v58 = vsel %vm2469_vm2, %v2149_v34, %v1580_v35  ;;  %v1590_v27 = vrot.slane %v2987_v52, 5  ;;  %v2282_v52 = vld [vmem:[%s3208_s1 + $0x10] ss:$0 sps:$4 sm:$0x33]  }
  0xa8   : > { %1260 = vrot.lane.b32.xlu1 %v2134_v5, %s2334_s7  ;;  %v1446_v57 = vsel %vm2509_vm5, %v1441_v26, %v1445_v13  ;;  %v1584_v51 = vsel %vm2469_vm2, %v1582_v38, %v1583_v44  ;;  %v1025_v59 = vpop.permute.xlu0 %1024  ;;  %v1588_v63 = vsel %vm2469_vm2, %v2150_v47, %v1587_v55  ;;  %v1589_v40 = vrot.slane %v1587_v55, 4  ;;  %v2292_v5 = vld [vmem:[%s2410_s30 + $0x28] sm:$0xf]  ;;  %2212 = vmatprep.subr.msk.bf16.mxu0 %vm1702_vm11, %v2282_v52 }
  0xa9   : > { %v2141_v49 = vcombine.low %v1436_v46, %v1446_v57  ;;  %v1470_v41 = vsel %vm2509_vm5, %v1465_v37, %v1469_v43  ;;  %v2011_v45 = vcombine.low %v2285_v48, %v2286_v0  ;;  %v2157_v22 = vcombine.low %v1581_v58, %v1584_v51  ;;  %2213 = vmatprep.subr.msk.bf16.mxu1 %vm1702_vm11, %v2282_v52 }
  0xaa   : > { %v2142_v39 = vcombine.low %v1460_v12, %v1470_v41  ;;  %v2012_v7 = vcombine.low %v2287_v28, %v2288_v2  ;;  %v1591_v33 = vsel %vm2469_vm2, %v1589_v40, %v1590_v27  ;;  %v2013_v8 = vcombine.low %v2289_v4, %v2290_v18 }
  0xab   : > { %1507 = vrot.lane.b32.xlu0 %v2141_v49, %s2339_s16  ;;  %323 = vst.msk [vmem:[#allocation2] sm:$0xff] %vm322_vm6, %v2011_v45  ;;  %v2158_v62 = vcombine.low %v1588_v63, %v1591_v33  ;;  %v2014_v13 = vcombine.low %v2291_v23, %v2292_v5  ;;  %v1704_v32 = vsel %vm1702_vm11, %v2282_v52, 0  ;;  %v2016_v14 = vcombine.low %v2723_v54, %v2727_v56 }
  0xac   : > { %1509 = vrot.lane.b32.xlu1 %v2142_v39, %s2339_s16  ;;  %575 = vst.msk [vmem:[#allocation2] sm:$0xff] %vm574_vm7, %v2991_v6  ;;  %v2015_v6 = vcombine.low %v2693_v9, %v2699_v20  ;;  %2189 = vmatpush3.bf16.msra.mxu0 %v1704_v32  ;;  %v2017_v9 = vcombine.low %v2833_v53, %v2839_v11 }
  0xad   : > { %324 = vst.msk [vmem:[#allocation2 + $0x8] sm:$0xff] %vm322_vm6, %v2012_v7  ;;  %v1496_v3 = vpop.permute.xlu0 %1495  ;;  %325 = vst.msk [vmem:[#allocation2 + $0x10] sm:$0xff] %vm322_vm6, %v2013_v8  ;;  %v2018_v20 = vcombine.low %v2863_v42, %v2867_v50  ;;  %2211 = vmatpush3.bf16.msra.mxu1 %v1704_v32  ;;  %v1803_v32 = vld [vmem:[%s3209_s2] sm:$0x1] }
  0xae   : > { %699 = vst.msk [vmem:[#allocation2] sm:$0xff] %vm698_vm8, %v2950_v29 }
  0xaf   : > { %576 = vst.msk [vmem:[#allocation2 + $0x8] sm:$0xff] %vm574_vm7, %v553_v21  ;;  %1628 = vrot.lane.b32.xlu0 %v2157_v22, %s2340_s17 }
  0xb0   : > { %700 = vst.msk [vmem:[#allocation2 + $0x8] sm:$0xff] %vm698_vm8, %v2989_v1  ;;  %1630 = vrot.lane.b32.xlu1 %v2158_v62, %s2340_s17  ;;  %v1498_v54 = vpop.permute.xlu1 %1497 }
  0xb1   : > { %800 = vst.msk [vmem:[#allocation2] sm:$0xff] %vm799_vm9, %v2897_v10  ;;  %801 = vst.msk [vmem:[#allocation2 + $0x8] sm:$0xff] %vm799_vm9, %v2895_v17  ;;  %v1617_v56 = vpop.permute.xlu0 %1616 }
  0xb2   : > { %326 = vst.msk [vmem:[#allocation2 + $0x18] sm:$0xff] %vm322_vm6, %v2014_v13  ;;  %327 = vst.msk [vmem:[#allocation2 + $0x20] sm:$0xff] %vm322_vm6, %v2015_v6  ;;  %v1804_v6 = vmul.f32 0.001953125, %v1803_v32 }
  0xb3   : > { %1049 = vst.msk [vmem:[#allocation2] sm:$0xff] %vm1048_vm10, %v1025_v59  ;;  %1050 = vst.msk [vmem:[#allocation2 + $0x8] sm:$0xff] %vm1048_vm10, %v1027_v15 }
  0xb4   : > { %328 = vst.msk [vmem:[#allocation2 + $0x28] sm:$0xff] %vm322_vm6, %v2016_v14  ;;  %329 = vst.msk [vmem:[#allocation2 + $0x30] sm:$0xff] %vm322_vm6, %v2017_v9  ;;  %v1805_v14 = vld [vmem:[%s3209_s2 + $0x1] sm:$0x1] }
  0xb5   : > { %1170 = vst.msk [vmem:[#allocation2] sm:$0xff] %vm1169_vm12, %v2948_v30  ;;  %1171 = vst.msk [vmem:[#allocation2 + $0x8] sm:$0xff] %vm1169_vm12, %v3003_v25  ;;  %v1619_v53 = vpop.permute.xlu0 %1618  ;;  %v1806_v9 = vmul.f32 0.001953125, %v1805_v14 }
  0xb6   : > { %330 = vst.msk [vmem:[#allocation2 + $0x38] sm:$0xff] %vm322_vm6, %v2018_v20  ;;  %v1807_v20 = vmul.f32 %v1804_v6, %v1804_v6 }
  0xb7   : > { %1271 = vst.msk [vmem:[#allocation2] sm:$0xff] %vm1270_vm13, %v2933_v61  ;;  %1272 = vst.msk [vmem:[#allocation2 + $0x8] sm:$0xff] %vm1270_vm13, %v2931_v60  ;;  %v555_v11 = vpop.permute.xlu1 %554 }
  0xb8   : > { %1520 = vst.msk [vmem:[#allocation2] sm:$0xff] %vm1519_vm14, %v1496_v3  ;;  %1521 = vst.msk [vmem:[#allocation2 + $0x8] sm:$0xff] %vm1519_vm14, %v1498_v54  ;;  %v1808_v54 = vsub.f32 %v1806_v9, %v1807_v20 }
  0xb9   : > { %1641 = vst.msk [vmem:[#allocation2] sm:$0xff] %vm1640_vm15, %v1617_v56  ;;  %1642 = vst.msk [vmem:[#allocation2 + $0x8] sm:$0xff] %vm1640_vm15, %v1619_v53 }
  0xba   : > { %577 = vst.msk [vmem:[#allocation2 + $0x10] sm:$0xff] %vm574_vm7, %v555_v11  ;;  %v1809_v56 = vmax.f32 %v1808_v54, 0.0 }
  0xbb   : > { %v679_v42 = vpop.permute.xlu0 %678 }
  0xbc   : > { %v557_v17 = vpop.permute.xlu1 %556  ;;  %701 = vst.msk [vmem:[#allocation2 + $0x10] sm:$0xff] %vm698_vm8, %v679_v42  ;;  %v1811_v53 = vadd.f32 1e-05, %v1809_v56  ;;  %v1810_v42 = vld [vmem:[%s3210_s3] sm:$0x1] }
  0xbd   : > { %578 = vst.msk [vmem:[#allocation2 + $0x18] sm:$0xff] %vm574_vm7, %v557_v17 }
  0xbe   : > { %2283 = vrsqrt.f32 %v1811_v53 }
  0xbf   : > { %v780_v60 = vpop.permute.xlu0 %779 }
  0xc0   : > { %v1649_v50 = vld [vmem:[#allocation2] sm:$0xff]  ;;  %v1650_v10 = vld [vmem:[#allocation2 + $0x8] sm:$0xff]  ;;  %v681_v61 = vpop.permute.xlu1 %680  ;;  %802 = vst.msk [vmem:[#allocation2 + $0x10] sm:$0xff] %vm799_vm9, %v780_v60 }
  0xc1   : > { %2190 = vmatprep.mubr.msk.bf16.mxu0 %vm1677_vm0, %v1649_v50  ;;  %702 = vst.msk [vmem:[#allocation2 + $0x18] sm:$0xff] %vm698_vm8, %v681_v61  ;;  %v1818_v50 = vlaneseq  ;;  %v1814_v61 = vld [vmem:[%s3211_s4] sm:$0x1] }
  0xc2   : > { %2191 = vmatmul.mubr.msk.bf16.vlgmr.msra.gmra.mrb[0].mxu0 %vm1677_vm0, %v1650_v10 }
  0xc3   : > { %v1819_v10 = vshrl.u32 %v1818_v50, 7 }
  0xc4   : > { %v782_v30 = vpop.permute.xlu1 %781 }
  0xc5   : > { %803 = vst.msk [vmem:[#allocation2 + $0x18] sm:$0xff] %vm799_vm9, %v782_v30  ;;  %v1820_v30 = vsub.s32 0, %v1819_v10 }
  0xc7   : > { %v1029_v29 = vpop.permute.xlu0 %1028 }
  0xc8   : > { %1051 = vst.msk [vmem:[#allocation2 + $0x10] sm:$0xff] %vm1048_vm10, %v1029_v29  ;;  %v1031_v1 = vpop.permute.xlu1 %1030  ;;  %v2284_v11 = vpop.eup %2283 }
  0xc9   : > { %1052 = vst.msk [vmem:[#allocation2 + $0x18] sm:$0xff] %vm1048_vm10, %v1031_v1  ;;  %v1813_v17 = vmul.f32 %v2284_v11, %v1810_v42 }
  0xcb   : > { %v1150_v16 = vpop.permute.xlu0 %1149  ;;  %v1815_v60 = vmul.f32 %v1813_v17, %v1804_v6  ;;  %v3150_v1 = vrot.slane %v1813_v17, %v1820_v30 }
  0xcc   : > { %1172 = vst.msk [vmem:[#allocation2 + $0x10] sm:$0xff] %vm1169_vm12, %v1150_v16  ;;  %v1152_v19 = vpop.permute.xlu1 %1151 }
  0xcd   : > { %1173 = vst.msk [vmem:[#allocation2 + $0x18] sm:$0xff] %vm1169_vm12, %v1152_v19  ;;  %v1816_v29 = vsub.f32 %v1814_v61, %v1815_v60 }
  0xcf   : > { %v1251_v31 = vpop.permute.xlu0 %1250  ;;  %v3152_v19 = vrot.slane %v1816_v29, %v1820_v30 }
  0xd0   : > { %1273 = vst.msk [vmem:[#allocation2 + $0x10] sm:$0xff] %vm1270_vm13, %v1251_v31  ;;  %v1253_v34 = vpop.permute.xlu1 %1252 }
  0xd1   : > { %1274 = vst.msk [vmem:[#allocation2 + $0x18] sm:$0xff] %vm1270_vm13, %v1253_v34 }
  0xd3   : > { %v1500_v35 = vpop.permute.xlu0 %1499 }
  0xd4   : > { %1522 = vst.msk [vmem:[#allocation2 + $0x10] sm:$0xff] %vm1519_vm14, %v1500_v35  ;;  %v1502_v21 = vpop.permute.xlu1 %1501 }
  0xd5   : > { %1523 = vst.msk [vmem:[#allocation2 + $0x18] sm:$0xff] %vm1519_vm14, %v1502_v21 }
  0xd7   : > { %v1621_v36 = vpop.permute.xlu0 %1620 }
  0xd8   : > { %1643 = vst.msk [vmem:[#allocation2 + $0x10] sm:$0xff] %vm1640_vm15, %v1621_v36 }
  0xdb   : > { %v559_v24 = vpop.permute.xlu1 %558  ;;  %v1623_v43 = vpop.permute.xlu0 %1622 }
  0xdc   : > { %579 = vst.msk [vmem:[#allocation2 + $0x20] sm:$0xff] %vm574_vm7, %v559_v24 }
  0xdd   : > { %1644 = vst.msk [vmem:[#allocation2 + $0x18] sm:$0xff] %vm1640_vm15, %v1623_v43 }
  0xdf   : > { %v1651_v44 = vld [vmem:[#allocation2 + $0x10] sm:$0xff] }
  0xe0   : > { %v683_v25 = vpop.permute.xlu0 %682  ;;  %2194 = vmatprep.mubr.msk.bf16.mxu0 %vm1677_vm0, %v1651_v44 }
  0xe1   : > { %v561_v46 = vpop.permute.xlu1 %560  ;;  %703 = vst.msk [vmem:[#allocation2 + $0x20] sm:$0xff] %vm698_vm8, %v683_v25 }
  0xe2   : > { %580 = vst.msk [vmem:[#allocation2 + $0x28] sm:$0xff] %vm574_vm7, %v561_v46 }
  0xe4   : > { %v1652_v26 = vld [vmem:[#allocation2 + $0x18] sm:$0xff]  ;;  %v784_v38 = vpop.permute.xlu0 %783 }
  0xe5   : > { %2195 = vmatmul.mubr.msk.bf16.gmra.mrb[4].mxu0 %vm1677_vm0, %v1652_v26  ;;  %v685_v47 = vpop.permute.xlu1 %684  ;;  %804 = vst.msk [vmem:[#allocation2 + $0x20] sm:$0xff] %vm799_vm9, %v784_v38 }
  0xe6   : > { %704 = vst.msk [vmem:[#allocation2 + $0x28] sm:$0xff] %vm698_vm8, %v685_v47 }
  0xe9   : > { %v786_v12 = vpop.permute.xlu1 %785 }
  0xea   : > { %805 = vst.msk [vmem:[#allocation2 + $0x28] sm:$0xff] %vm799_vm9, %v786_v12 }
  0xec   : > { %v1033_v37 = vpop.permute.xlu0 %1032 }
  0xed   : > { %1053 = vst.msk [vmem:[#allocation2 + $0x20] sm:$0xff] %vm1048_vm10, %v1033_v37  ;;  %v1035_v55 = vpop.permute.xlu1 %1034 }
  0xee   : > { %1054 = vst.msk [vmem:[#allocation2 + $0x28] sm:$0xff] %vm1048_vm10, %v1035_v55 }
  0xf0   : > { %v1154_v57 = vpop.permute.xlu0 %1153 }
  0xf1   : > { %1174 = vst.msk [vmem:[#allocation2 + $0x20] sm:$0xff] %vm1169_vm12, %v1154_v57  ;;  %v1156_v58 = vpop.permute.xlu1 %1155 }
  0xf2   : > { %1175 = vst.msk [vmem:[#allocation2 + $0x28] sm:$0xff] %vm1169_vm12, %v1156_v58 }
  0xf4   : > { %v1255_v51 = vpop.permute.xlu0 %1254 }
  0xf5   : > { %1275 = vst.msk [vmem:[#allocation2 + $0x20] sm:$0xff] %vm1270_vm13, %v1255_v51  ;;  %v1257_v27 = vpop.permute.xlu1 %1256 }
  0xf6   : > { %1276 = vst.msk [vmem:[#allocation2 + $0x28] sm:$0xff] %vm1270_vm13, %v1257_v27 }
  0xf8   : > { %v1504_v59 = vpop.permute.xlu0 %1503 }
  0xf9   : > { %1524 = vst.msk [vmem:[#allocation2 + $0x20] sm:$0xff] %vm1519_vm14, %v1504_v59  ;;  %v1506_v49 = vpop.permute.xlu1 %1505 }
  0xfa   : > { %1525 = vst.msk [vmem:[#allocation2 + $0x28] sm:$0xff] %vm1519_vm14, %v1506_v49 }
  0xfc   : > { %v1625_v41 = vpop.permute.xlu0 %1624 }
  0xfd   : > { %1645 = vst.msk [vmem:[#allocation2 + $0x20] sm:$0xff] %vm1640_vm15, %v1625_v41 }
 0x100   : > { %v563_v39 = vpop.permute.xlu1 %562  ;;  %v1627_v63 = vpop.permute.xlu0 %1626 }
 0x101   : > { %581 = vst.msk [vmem:[#allocation2 + $0x30] sm:$0xff] %vm574_vm7, %v563_v39 }
 0x102   : > { %1646 = vst.msk [vmem:[#allocation2 + $0x28] sm:$0xff] %vm1640_vm15, %v1627_v63 }
 0x104   : > { %v1653_v40 = vld [vmem:[#allocation2 + $0x20] sm:$0xff] }
 0x105   : > { %v687_v48 = vpop.permute.xlu0 %686  ;;  %2198 = vmatprep.mubr.msk.bf16.mxu1 %vm1677_vm0, %v1653_v40 }
 0x106   : > { %v565_v0 = vpop.permute.xlu1 %564  ;;  %705 = vst.msk [vmem:[#allocation2 + $0x30] sm:$0xff] %vm698_vm8, %v687_v48 }
 0x107   : > { %582 = vst.msk [vmem:[#allocation2 + $0x38] sm:$0xff] %vm574_vm7, %v565_v0 }
 0x109   : > { %v1654_v45 = vld [vmem:[#allocation2 + $0x28] sm:$0xff]  ;;  %v788_v52 = vpop.permute.xlu0 %787 }
 0x10a   : > { %2199 = vmatmul.mubr.msk.bf16.vlgmr.msra.gmra.mrb[0].mxu1 %vm1677_vm0, %v1654_v45  ;;  %v689_v22 = vpop.permute.xlu1 %688  ;;  %806 = vst.msk [vmem:[#allocation2 + $0x30] sm:$0xff] %vm799_vm9, %v788_v52 }
 0x10b   : > { %706 = vst.msk [vmem:[#allocation2 + $0x38] sm:$0xff] %vm698_vm8, %v689_v22 }
 0x10e   : > { %v790_v28 = vpop.permute.xlu1 %789 }
 0x10f   : > { %807 = vst.msk [vmem:[#allocation2 + $0x38] sm:$0xff] %vm799_vm9, %v790_v28 }
 0x111   : > { %v1037_v2 = vpop.permute.xlu0 %1036 }
 0x112   : > { %1055 = vst.msk [vmem:[#allocation2 + $0x30] sm:$0xff] %vm1048_vm10, %v1037_v2  ;;  %v1039_v7 = vpop.permute.xlu1 %1038 }
 0x113   : > { %1056 = vst.msk [vmem:[#allocation2 + $0x38] sm:$0xff] %vm1048_vm10, %v1039_v7 }
 0x115   : > { %v1158_v15 = vpop.permute.xlu0 %1157 }
 0x116   : > { %1176 = vst.msk [vmem:[#allocation2 + $0x30] sm:$0xff] %vm1169_vm12, %v1158_v15  ;;  %v1160_v33 = vpop.permute.xlu1 %1159 }
 0x117   : > { %1177 = vst.msk [vmem:[#allocation2 + $0x38] sm:$0xff] %vm1169_vm12, %v1160_v33 }
 0x119   : > { %v1259_v62 = vpop.permute.xlu0 %1258 }
 0x11a   : > { %1277 = vst.msk [vmem:[#allocation2 + $0x30] sm:$0xff] %vm1270_vm13, %v1259_v62  ;;  %v1261_v3 = vpop.permute.xlu1 %1260 }
 0x11b   : > { %1278 = vst.msk [vmem:[#allocation2 + $0x38] sm:$0xff] %vm1270_vm13, %v1261_v3 }
 0x11d   : > { %v1508_v4 = vpop.permute.xlu0 %1507 }
 0x11e   : > { %1526 = vst.msk [vmem:[#allocation2 + $0x30] sm:$0xff] %vm1519_vm14, %v1508_v4  ;;  %v1510_v18 = vpop.permute.xlu1 %1509 }
 0x11f   : > { %1527 = vst.msk [vmem:[#allocation2 + $0x38] sm:$0xff] %vm1519_vm14, %v1510_v18 }
 0x121   : > { %v1629_v8 = vpop.permute.xlu0 %1628 }
 0x122   : > { %1647 = vst.msk [vmem:[#allocation2 + $0x30] sm:$0xff] %vm1640_vm15, %v1629_v8  ;;  %v1631_v23 = vpop.permute.xlu1 %1630 }
 0x123   : > { %1648 = vst.msk [vmem:[#allocation2 + $0x38] sm:$0xff] %vm1640_vm15, %v1631_v23 }
 0x129   : > { %v1655_v5 = vld [vmem:[#allocation2 + $0x30] sm:$0xff] }
 0x12a   : > { %2202 = vmatprep.mubr.msk.bf16.mxu1 %vm1677_vm0, %v1655_v5  ;;  %v1656_v13 = vld [vmem:[#allocation2 + $0x38] sm:$0xff] }
 0x12b   : > { %2203 = vmatmul.mubr.msk.bf16.gmra.mrb[4].mxu1 %vm1677_vm0, %v1656_v13 }
 0x195   : > { %v2192_v16 = vpop.f32.mrb[0].mxu0 }
 0x196   : > { %v1740_v31 = vpop.f32.mrb[1].mxu0  ;;  %v1825_v43 = vmul.f32 %v2192_v16, %v3150_v1 }
 0x197   : > { %v1823_v34 = vmul.f32 %v3150_v1, %v1740_v31  ;;  %v2193_v35 = vpop.f32.mrb[2].mxu0 }
 0x198   : > { %v1743_v21 = vpop.f32.mrb[3].mxu0  ;;  %v1847_v46 = vadd.f32 %v3152_v19, %v1825_v43  ;;  %v1826_v26 = vmul.f32 %v2193_v35, %v3150_v1 }
 0x199   : > { %v1824_v36 = vmul.f32 %v3150_v1, %v1743_v21  ;;  %v1845_v24 = vadd.f32 %v3152_v19, %v1823_v34 }
 0x19a   : > { %v1863_v47 = vmax.f32 %v1847_v46, 0.0  ;;  %v1848_v12 = vadd.f32 %v3152_v19, %v1826_v26 }
 0x19b   : > { %v1846_v44 = vadd.f32 %v3152_v19, %v1824_v36  ;;  %v1861_v25 = vmax.f32 %v1845_v24, 0.0 }
 0x19c   : > { %v1864_v37 = vmax.f32 %v1848_v12, 0.0 }
 0x19d   : > { %1877 = vxpose.xlu0.b32.start [1/16] (narrow) %v1861_v25, 8  ;;  %v1862_v38 = vmax.f32 %v1846_v44, 0.0 }
 0x1a1   : > { %1878 = vxpose.xlu0.b32.cont [2/16] (narrow) %v1862_v38, 8 }
 0x1a5   : > { %1879 = vxpose.xlu0.b32.cont [3/16] (narrow) %v1863_v47, 8 }
 0x1a9   : > { %1880 = vxpose.xlu0.b32.cont [4/16] (narrow) %v1864_v37, 8 }
 0x1b8   : > { %v2196_v55 = vpop.f32.mrb[4].mxu0 }
 0x1b9   : > { %v1756_v57 = vpop.f32.mrb[5].mxu0  ;;  %v1829_v41 = vmul.f32 %v2196_v55, %v3150_v1 }
 0x1ba   : > { %v1827_v58 = vmul.f32 %v3150_v1, %v1756_v57  ;;  %v2197_v51 = vpop.f32.mrb[6].mxu0 }
 0x1bb   : > { %v1759_v27 = vpop.f32.mrb[7].mxu0  ;;  %v1851_v40 = vadd.f32 %v3152_v19, %v1829_v41  ;;  %v1830_v48 = vmul.f32 %v2197_v51, %v3150_v1 }
 0x1bc   : > { %v1849_v59 = vadd.f32 %v3152_v19, %v1827_v58  ;;  %v1828_v49 = vmul.f32 %v3150_v1, %v1759_v27 }
 0x1bd   : > { %v1867_v45 = vmax.f32 %v1851_v40, 0.0  ;;  %v1852_v52 = vadd.f32 %v3152_v19, %v1830_v48 }
 0x1be   : > { %v1865_v39 = vmax.f32 %v1849_v59, 0.0  ;;  %v1850_v63 = vadd.f32 %v3152_v19, %v1828_v49 }
 0x1bf   : > { %v1868_v22 = vmax.f32 %v1852_v52, 0.0 }
 0x1c0   : > { %1881 = vxpose.xlu0.b32.cont [5/16] (narrow) %v1865_v39, 8  ;;  %v1866_v0 = vmax.f32 %v1850_v63, 0.0 }
 0x1c4   : > { %1882 = vxpose.xlu0.b32.cont [6/16] (narrow) %v1866_v0, 8 }
 0x1c8   : > { %1883 = vxpose.xlu0.b32.cont [7/16] (narrow) %v1867_v45, 8 }
 0x1cc   : > { %1884 = vxpose.xlu0.b32.cont [8/16] (narrow) %v1868_v22, 8 }
 0x1dd   : > { %v2200_v28 = vpop.f32.mrb[0].mxu1 }
 0x1de   : > { %v1772_v2 = vpop.f32.mrb[1].mxu1  ;;  %v1833_v4 = vmul.f32 %v2200_v28, %v3150_v1 }
 0x1df   : > { %v1831_v7 = vmul.f32 %v3150_v1, %v1772_v2  ;;  %v2201_v15 = vpop.f32.mrb[2].mxu1 }
 0x1e0   : > { %v1775_v33 = vpop.f32.mrb[3].mxu1  ;;  %v1855_v23 = vadd.f32 %v3152_v19, %v1833_v4  ;;  %v1834_v5 = vmul.f32 %v2201_v15, %v3150_v1 }
 0x1e1   : > { %v1853_v62 = vadd.f32 %v3152_v19, %v1831_v7  ;;  %v1832_v3 = vmul.f32 %v3150_v1, %v1775_v33 }
 0x1e2   : > { %v1871_v32 = vmax.f32 %v1855_v23, 0.0  ;;  %v1856_v6 = vadd.f32 %v3152_v19, %v1834_v5 }
 0x1e3   : > { %v1869_v18 = vmax.f32 %v1853_v62, 0.0  ;;  %v1854_v8 = vadd.f32 %v3152_v19, %v1832_v3 }
 0x1e4   : > { %v1872_v14 = vmax.f32 %v1856_v6, 0.0 }
 0x1e5   : > { %1885 = vxpose.xlu0.b32.cont [9/16] (narrow) %v1869_v18, 8  ;;  %v1870_v13 = vmax.f32 %v1854_v8, 0.0 }
 0x1e9   : > { %1886 = vxpose.xlu0.b32.cont [10/16] (narrow) %v1870_v13, 8 }
 0x1ed   : > { %1887 = vxpose.xlu0.b32.cont [11/16] (narrow) %v1871_v32, 8 }
 0x1f1   : > { %1888 = vxpose.xlu0.b32.cont [12/16] (narrow) %v1872_v14, 8 }
 0x1fe   : > { %v2204_v9 = vpop.f32.mrb[4].mxu1 }
 0x1ff   : > { %v1788_v20 = vpop.f32.mrb[5].mxu1  ;;  %v1837_v50 = vmul.f32 %v2204_v9, %v3150_v1 }
 0x200   : > { %v1835_v54 = vmul.f32 %v3150_v1, %v1788_v20  ;;  %v2205_v56 = vpop.f32.mrb[6].mxu1 }
 0x201   : > { %v1791_v53 = vpop.f32.mrb[7].mxu1  ;;  %v1859_v60 = vadd.f32 %v3152_v19, %v1837_v50  ;;  %v1838_v61 = vmul.f32 %v2205_v56, %v3150_v1 }
 0x202   : > { %v1857_v11 = vadd.f32 %v3152_v19, %v1835_v54  ;;  %v1836_v42 = vmul.f32 %v3150_v1, %v1791_v53 }
 0x203   : > { %v1875_v29 = vmax.f32 %v1859_v60, 0.0  ;;  %v1860_v16 = vadd.f32 %v3152_v19, %v1838_v61 }
 0x204   : > { %v1873_v17 = vmax.f32 %v1857_v11, 0.0  ;;  %v1858_v10 = vadd.f32 %v3152_v19, %v1836_v42 }
 0x205   : > { %v1876_v31 = vmax.f32 %v1860_v16, 0.0 }
 0x206   : > { %1889 = vxpose.xlu0.b32.cont [13/16] (narrow) %v1873_v17, 8  ;;  %v1874_v30 = vmax.f32 %v1858_v10, 0.0 }
 0x20a   : > { %1890 = vxpose.xlu0.b32.cont [14/16] (narrow) %v1874_v30, 8 }
 0x20e   : > { %1891 = vxpose.xlu0.b32.cont [15/16] (narrow) %v1875_v29, 8 }
 0x212   : > { %1892 = vxpose.xlu0.b32.end [16/16] (narrow) %v1876_v31, 8 }
 0x256   : > { %v1893_v34 = vpop.trf.xlu0 }
 0x257   : > { %1909 = vst [vmem:[%s244_s15] sm:$0xff] %v1893_v34 }
 0x258 PF: > { %s15_s22 = sadd.s32 1, %s2331_s22   ;;  %s3217_s18 = smov %s2323_s20 }
 0x259   : > { %p12_p7 = scmp.ge.s32.totalorder %s15_s22, 6   ;;  %s3218_s19 = smov %s2327_s21 }
 0x25a   : > { %s3219_s20 = smov %s3222_s23  ;;  %s3220_s21 = smov %s3226_s24 }
 0x25b   :  { %14 = sbr.rel (!%p12_p7) target bundleno = 3 (0x3), region = 73 }

</bundles_post_ra>
